<compile_context>
chip_gen: v5e
topology: v5e:2x2
jax: 0.10.0
libtpu: 0.0.40
codegen_flags: <defaults>
</compile_context>

<pallas_src>
import jax
import jax.numpy as jnp
import numpy as np
from jax.experimental import pallas as pl
from jax.experimental.pallas import tpu as pltpu


# ----------------------------------------------------------------------------
# Fused whole-network kernel: one grid step = one sample.
# ----------------------------------------------------------------------------
def _convnet_kernel(x_ref, w_ref, b_ref, g_ref, bt_ref, o_ref,
                    xp_ref, pt_ref, rbuf_ref, pbuf_ref):
    # x_ref   : (1, H0, W0, C) f32   one sample, channels pre-padded to C
    # w_ref   : (D, 9*C, C)    bf16  per-block im2col conv weights
    # b_ref   : (D, 1, C)      f32   conv bias
    # g_ref   : (D, 1, C)      f32   instance-norm gamma
    # bt_ref  : (D, 1, C)      f32   instance-norm beta
    # o_ref   : (1, Hf*Wf, C)  f32   final pooled activations (row = oh*Wf+ow)
    # xp_ref  : (H0+2, W0+2, C) f32  zero-bordered activation staging buffer
    # pt_ref  : (H0*W0, 9*C)   bf16  im2col patch matrix
    # rbuf_ref: (H0*W0, C)     f32   row buffer for the W-direction pool
    # pbuf_ref: (H0, W0//2, C) f32   buffer for the H-direction pool
    C = x_ref.shape[3]
    H = x_ref.shape[1]
    D = w_ref.shape[0]

    # Stage the (channel-padded) input into the zero-bordered buffer (VMEM).
    xp_ref[0:H + 2, 0:H + 2, :] = jnp.zeros((H + 2, H + 2, C), jnp.float32)
    xp_ref[1:H + 1, 1:H + 1, :] = x_ref[0]

    for d in range(D):                         # static unroll over blocks
        W = H
        HW = H * W
        OH, OW = H // 2, W // 2

        # ---- conv3x3 (pad=1) as ONE im2col matmul: (HW, 9C) x (9C, C) on MXU
        for dy in range(3):
            for dx in range(3):
                k = dy * 3 + dx
                pt_ref[0:HW, k * C:(k + 1) * C] = (
                    xp_ref[dy:dy + H, dx:dx + W, :]
                    .reshape(HW, C).astype(jnp.bfloat16))
        acc = jnp.dot(pt_ref[0:HW, :], w_ref[d],
                      preferred_element_type=jnp.float32)           # (HW, C)
        acc = acc + b_ref[d]

        # ---- instance norm (GroupNorm(C, C)): per-channel stats over H*W
        mean = jnp.mean(acc, axis=0, keepdims=True)
        xc = acc - mean
        var = jnp.mean(xc * xc, axis=0, keepdims=True)
        y = xc * jax.lax.rsqrt(var + 1e-5)
        y = y * g_ref[d] + bt_ref[d]

        # ---- ReLU
        y = jnp.maximum(y, 0.0)

        # ---- AvgPool 2x2 stride 2 via strided-row adds (no pooling matmul)
        rbuf_ref[0:HW, :] = y                          # rows ordered h*W + w
        wp = (rbuf_ref[pl.ds(0, HW // 2, stride=2), :]
              + rbuf_ref[pl.ds(1, HW // 2, stride=2), :])          # (H*OW, C)
        pbuf_ref[0:H, 0:OW, :] = wp.reshape(H, OW, C)
        pooled = (pbuf_ref[pl.ds(0, OH, stride=2), 0:OW, :]
                  + pbuf_ref[pl.ds(1, OH, stride=2), 0:OW, :]) * 0.25  # (OH,OW,C)

        if d + 1 < D:
            # Stage pooled activation (with zero border) for the next block.
            xp_ref[0:OH + 2, 0:OW + 2, :] = jnp.zeros(
                (OH + 2, OW + 2, C), jnp.float32)
            xp_ref[1:OH + 1, 1:OW + 1, :] = pooled
        else:
            o_ref[0, ...] = pooled.reshape(OH * OW, C)
        H = OH


# ----------------------------------------------------------------------------
# Wrapper: layout glue + the single pallas_call
# ----------------------------------------------------------------------------
@jax.jit
def convnet_forward(x_nchw, params):
    """Full ConvNet forward. x_nchw: (N, Cin, H, W) -> (N, C*Hf*Wf)."""
    N, cin, H, W = x_nchw.shape
    D = len(params)
    C = params[0][0].shape[-1]                 # net_width (shared by all blocks)

    # NCHW -> NHWC, zero-pad channels up to C so every block sees Cin == C.
    x = jnp.transpose(x_nchw, (0, 2, 3, 1))
    x = jnp.pad(x, ((0, 0), (0, 0), (0, 0), (0, C - cin)))

    w_l, b_l, g_l, bt_l = [], [], [], []
    for (w, b, g, bt) in params:
        ci = w.shape[2]
        if ci < C:                             # block 1: pad Cin with zeros
            w = jnp.pad(w, ((0, 0), (0, 0), (0, C - ci), (0, 0)))
        w_l.append(w.reshape(9 * C, C))        # K ordered (dy, dx, cin)
        b_l.append(b.reshape(1, C))
        g_l.append(g.reshape(1, C))
        bt_l.append(bt.reshape(1, C))
    w_all = jnp.stack(w_l).astype(jnp.bfloat16)      # (D, 9C, C)
    b_all = jnp.stack(b_l).astype(jnp.float32)       # (D, 1, C)
    g_all = jnp.stack(g_l).astype(jnp.float32)
    bt_all = jnp.stack(bt_l).astype(jnp.float32)

    Hf = H >> D                                      # final spatial size

    out = pl.pallas_call(
        _convnet_kernel,
        out_shape=jax.ShapeDtypeStruct((N, Hf * Hf, C), jnp.float32),
        grid=(N,),
        in_specs=[
            pl.BlockSpec((1, H, W, C), lambda n: (n, 0, 0, 0)),
            pl.BlockSpec((D, 9 * C, C), lambda n: (0, 0, 0)),
            pl.BlockSpec((D, 1, C), lambda n: (0, 0, 0)),
            pl.BlockSpec((D, 1, C), lambda n: (0, 0, 0)),
            pl.BlockSpec((D, 1, C), lambda n: (0, 0, 0)),
        ],
        out_specs=pl.BlockSpec((1, Hf * Hf, C), lambda n: (n, 0, 0)),
        scratch_shapes=[
            pltpu.VMEM((H + 2, W + 2, C), jnp.float32),   # padded activations
            pltpu.VMEM((H * W, 9 * C), jnp.bfloat16),     # im2col patches
            pltpu.VMEM((H * W, C), jnp.float32),          # W-pool row buffer
            pltpu.VMEM((H, W // 2, C), jnp.float32),      # H-pool buffer
        ],
        compiler_params=pltpu.CompilerParams(
            dimension_semantics=("parallel",)),
    )(x, w_all, b_all, g_all, bt_all)

    # Kernel rows are (oh*Wf + ow) with channels last; convert to torch's
    # NCHW `view(N, -1)` ordering: flat index = c*Hf*Wf + oh*Wf + ow.
    return jnp.transpose(out, (0, 2, 1)).reshape(N, -1)


# ----------------------------------------------------------------------------
# Pure-JAX reference matching the kernel's bf16-conv / f32-stats arithmetic
# (conv inputs cast to bf16, f32 accumulation, norm/relu/pool in f32).
# ----------------------------------------------------------------------------
def reference_forward(x_nchw, params):
    x = x_nchw
    for (w, b, g, bt) in params:
        w_oihw = jnp.transpose(w, (3, 2, 0, 1)).astype(jnp.bfloat16)
        x = jax.lax.conv_general_dilated(
            x.astype(jnp.bfloat16), w_oihw, (1, 1), ((1, 1), (1, 1)),
            dimension_numbers=("NCHW", "OIHW", "NCHW"),
            preferred_element_type=jnp.float32)
        x = x + b.reshape(1, -1, 1, 1)
        mean = x.mean(axis=(2, 3), keepdims=True)
        var = ((x - mean) ** 2).mean(axis=(2, 3), keepdims=True)
        x = (x - mean) * jax.lax.rsqrt(var + 1e-5)
        x = x * g.reshape(1, -1, 1, 1) + bt.reshape(1, -1, 1, 1)
        x = jnp.maximum(x, 0.0)
        n, c, h, wd = x.shape
        x = x.reshape(n, c, h // 2, 2, wd // 2, 2).mean(axis=(3, 5))
    return x.reshape(x.shape[0], -1)


def init_params(key, in_channels, net_width, net_depth):
    params = []
    cin = in_channels
    for _ in range(net_depth):
        key, kw = jax.random.split(key)
        fan_in = cin * 9
        w = jax.random.normal(kw, (3, 3, cin, net_width), jnp.float32)
        w = w * (1.0 / np.sqrt(fan_in))
        b = jnp.zeros((1, net_width), jnp.float32)
        gamma = jnp.ones((1, net_width), jnp.float32)   # GroupNorm affine init
        beta = jnp.zeros((1, net_width), jnp.float32)
        params.append((w, b, gamma, beta))
        cin = net_width
    return params


if __name__ == "__main__":
    # Small shapes consistent with the module: RGB input, 3 conv blocks,
    # spatial halves each block (16 -> 8 -> 4 -> 2).
    N, CIN, HW = 2, 3, 16
    NET_WIDTH, NET_DEPTH = 32, 3

    key = jax.random.PRNGKey(0)
    kx, kp = jax.random.split(key)
    x = jax.random.normal(kx, (N, CIN, HW, HW), jnp.float32)   # NCHW like torch
    params = init_params(kp, CIN, NET_WIDTH, NET_DEPTH)

    out = jax.block_until_ready(convnet_forward(x, params))
    assert out.shape == (N, NET_WIDTH * (HW >> NET_DEPTH) ** 2), out.shape

    ref = jax.block_until_ready(reference_forward(x, params))
    np.testing.assert_allclose(np.asarray(out), np.asarray(ref),
                               atol=2e-2, rtol=2e-2)

    print("KERNEL_OK")
</pallas_src>

<mosaic_0001>
module attributes {stable_mosaic.version = 11 : i64} {
  func.func @_convnet_kernel(%arg0: i32, %arg1: memref<1x16x16x32xf32, #tpu.memory_space<vmem>>, %arg2: memref<3x288x32xbf16, #tpu.memory_space<vmem>>, %arg3: memref<3x1x32xf32, #tpu.memory_space<vmem>>, %arg4: memref<3x1x32xf32, #tpu.memory_space<vmem>>, %arg5: memref<3x1x32xf32, #tpu.memory_space<vmem>>, %arg6: memref<1x4x32xf32, #tpu.memory_space<vmem>>, %arg7: memref<18x18x32xf32, #tpu.memory_space<vmem>>, %arg8: memref<256x288xbf16, #tpu.memory_space<vmem>>, %arg9: memref<256x32xf32, #tpu.memory_space<vmem>>, %arg10: memref<16x8x32xf32, #tpu.memory_space<vmem>>) attributes {dimension_semantics = [#tpu.dimension_semantics<parallel>], iteration_bounds = array<i64: 2>, scalar_prefetch = 0 : i64, scratch_operands = 4 : i64, tpu.core_type = #tpu.core_type<tc>, window_params = [{transform_indices = @transform_0, window_bounds = array<i64: 1, 16, 16, 32>}, {pipeline_mode = #tpu.pipeline_mode<synchronous>, transform_indices = @transform_1, window_bounds = array<i64: 3, 288, 32>}, {pipeline_mode = #tpu.pipeline_mode<synchronous>, transform_indices = @transform_2, window_bounds = array<i64: 3, 1, 32>}, {pipeline_mode = #tpu.pipeline_mode<synchronous>, transform_indices = @transform_3, window_bounds = array<i64: 3, 1, 32>}, {pipeline_mode = #tpu.pipeline_mode<synchronous>, transform_indices = @transform_4, window_bounds = array<i64: 3, 1, 32>}, {transform_indices = @transform_5, window_bounds = array<i64: 1, 4, 32>}]} {
    %cst = arith.constant 0.000000e+00 : f32
    %0 = vector.broadcast %cst : f32 to vector<18x18x32xf32>
    %c0 = arith.constant 0 : index
    %c0_0 = arith.constant 0 : index
    %c0_1 = arith.constant 0 : index
    %1 = vector.load %arg7[%c0, %c0_0, %c0_1] : memref<18x18x32xf32, #tpu.memory_space<vmem>>, vector<18x18x32xf32>
    tpu.vector_store %arg7[%c0, %c0_0, %c0_1], %0 {strides = array<i32>} : memref<18x18x32xf32, #tpu.memory_space<vmem>>, vector<18x18x32xf32>,
    %c0_2 = arith.constant 0 : index
    %c0_3 = arith.constant 0 : index
    %c0_4 = arith.constant 0 : index
    %c0_5 = arith.constant 0 : index
    %2 = vector.load %arg1[%c0_2, %c0_3, %c0_4, %c0_5] : memref<1x16x16x32xf32, #tpu.memory_space<vmem>>, vector<1x16x16x32xf32>
    %3 = vector.shape_cast %2 : vector<1x16x16x32xf32> to vector<16x16x32xf32>
    %c1 = arith.constant 1 : index
    %c1_6 = arith.constant 1 : index
    %c0_7 = arith.constant 0 : index
    %4 = vector.load %arg7[%c1, %c1_6, %c0_7] : memref<18x18x32xf32, #tpu.memory_space<vmem>>, vector<16x16x32xf32>
    tpu.vector_store %arg7[%c1, %c1_6, %c0_7], %3 {strides = array<i32>} : memref<18x18x32xf32, #tpu.memory_space<vmem>>, vector<16x16x32xf32>,
    %c0_8 = arith.constant 0 : index
    %c0_9 = arith.constant 0 : index
    %c0_10 = arith.constant 0 : index
    %5 = vector.load %arg7[%c0_8, %c0_9, %c0_10] : memref<18x18x32xf32, #tpu.memory_space<vmem>>, vector<16x16x32xf32>
    %6 = vector.shape_cast %5 : vector<16x16x32xf32> to vector<256x32xf32>
    %7 = arith.truncf %6 : vector<256x32xf32> to vector<256x32xbf16>
    %c0_11 = arith.constant 0 : index
    %c0_12 = arith.constant 0 : index
    %8 = vector.load %arg8[%c0_11, %c0_12] : memref<256x288xbf16, #tpu.memory_space<vmem>>, vector<256x32xbf16>
    tpu.vector_store %arg8[%c0_11, %c0_12], %7 {strides = array<i32>} : memref<256x288xbf16, #tpu.memory_space<vmem>>, vector<256x32xbf16>,
    %c0_13 = arith.constant 0 : index
    %c1_14 = arith.constant 1 : index
    %c0_15 = arith.constant 0 : index
    %9 = vector.load %arg7[%c0_13, %c1_14, %c0_15] : memref<18x18x32xf32, #tpu.memory_space<vmem>>, vector<16x16x32xf32>
    %10 = vector.shape_cast %9 : vector<16x16x32xf32> to vector<256x32xf32>
    %11 = arith.truncf %10 : vector<256x32xf32> to vector<256x32xbf16>
    %c0_16 = arith.constant 0 : index
    %c32 = arith.constant 32 : index
    %12 = vector.load %arg8[%c0_16, %c32] : memref<256x288xbf16, #tpu.memory_space<vmem>>, vector<256x32xbf16>
    tpu.vector_store %arg8[%c0_16, %c32], %11 {strides = array<i32>} : memref<256x288xbf16, #tpu.memory_space<vmem>>, vector<256x32xbf16>,
    %c0_17 = arith.constant 0 : index
    %c2 = arith.constant 2 : index
    %c0_18 = arith.constant 0 : index
    %13 = vector.load %arg7[%c0_17, %c2, %c0_18] : memref<18x18x32xf32, #tpu.memory_space<vmem>>, vector<16x16x32xf32>
    %14 = vector.shape_cast %13 : vector<16x16x32xf32> to vector<256x32xf32>
    %15 = arith.truncf %14 : vector<256x32xf32> to vector<256x32xbf16>
    %c0_19 = arith.constant 0 : index
    %c64 = arith.constant 64 : index
    %16 = vector.load %arg8[%c0_19, %c64] : memref<256x288xbf16, #tpu.memory_space<vmem>>, vector<256x32xbf16>
    tpu.vector_store %arg8[%c0_19, %c64], %15 {strides = array<i32>} : memref<256x288xbf16, #tpu.memory_space<vmem>>, vector<256x32xbf16>,
    %c1_20 = arith.constant 1 : index
    %c0_21 = arith.constant 0 : index
    %c0_22 = arith.constant 0 : index
    %17 = vector.load %arg7[%c1_20, %c0_21, %c0_22] : memref<18x18x32xf32, #tpu.memory_space<vmem>>, vector<16x16x32xf32>
    %18 = vector.shape_cast %17 : vector<16x16x32xf32> to vector<256x32xf32>
    %19 = arith.truncf %18 : vector<256x32xf32> to vector<256x32xbf16>
    %c0_23 = arith.constant 0 : index
    %c96 = arith.constant 96 : index
    %20 = vector.load %arg8[%c0_23, %c96] : memref<256x288xbf16, #tpu.memory_space<vmem>>, vector<256x32xbf16>
    tpu.vector_store %arg8[%c0_23, %c96], %19 {strides = array<i32>} : memref<256x288xbf16, #tpu.memory_space<vmem>>, vector<256x32xbf16>,
    %c1_24 = arith.constant 1 : index
    %c1_25 = arith.constant 1 : index
    %c0_26 = arith.constant 0 : index
    %21 = vector.load %arg7[%c1_24, %c1_25, %c0_26] : memref<18x18x32xf32, #tpu.memory_space<vmem>>, vector<16x16x32xf32>
    %22 = vector.shape_cast %21 : vector<16x16x32xf32> to vector<256x32xf32>
    %23 = arith.truncf %22 : vector<256x32xf32> to vector<256x32xbf16>
    %c0_27 = arith.constant 0 : index
    %c128 = arith.constant 128 : index
    %24 = vector.load %arg8[%c0_27, %c128] : memref<256x288xbf16, #tpu.memory_space<vmem>>, vector<256x32xbf16>
    tpu.vector_store %arg8[%c0_27, %c128], %23 {strides = array<i32>} : memref<256x288xbf16, #tpu.memory_space<vmem>>, vector<256x32xbf16>,
    %c1_28 = arith.constant 1 : index
    %c2_29 = arith.constant 2 : index
    %c0_30 = arith.constant 0 : index
    %25 = vector.load %arg7[%c1_28, %c2_29, %c0_30] : memref<18x18x32xf32, #tpu.memory_space<vmem>>, vector<16x16x32xf32>
    %26 = vector.shape_cast %25 : vector<16x16x32xf32> to vector<256x32xf32>
    %27 = arith.truncf %26 : vector<256x32xf32> to vector<256x32xbf16>
    %c0_31 = arith.constant 0 : index
    %c160 = arith.constant 160 : index
    %28 = vector.load %arg8[%c0_31, %c160] : memref<256x288xbf16, #tpu.memory_space<vmem>>, vector<256x32xbf16>
    tpu.vector_store %arg8[%c0_31, %c160], %27 {strides = array<i32>} : memref<256x288xbf16, #tpu.memory_space<vmem>>, vector<256x32xbf16>,
    %c2_32 = arith.constant 2 : index
    %c0_33 = arith.constant 0 : index
    %c0_34 = arith.constant 0 : index
    %29 = vector.load %arg7[%c2_32, %c0_33, %c0_34] : memref<18x18x32xf32, #tpu.memory_space<vmem>>, vector<16x16x32xf32>
    %30 = vector.shape_cast %29 : vector<16x16x32xf32> to vector<256x32xf32>
    %31 = arith.truncf %30 : vector<256x32xf32> to vector<256x32xbf16>
    %c0_35 = arith.constant 0 : index
    %c192 = arith.constant 192 : index
    %32 = vector.load %arg8[%c0_35, %c192] : memref<256x288xbf16, #tpu.memory_space<vmem>>, vector<256x32xbf16>
    tpu.vector_store %arg8[%c0_35, %c192], %31 {strides = array<i32>} : memref<256x288xbf16, #tpu.memory_space<vmem>>, vector<256x32xbf16>,
    %c2_36 = arith.constant 2 : index
    %c1_37 = arith.constant 1 : index
    %c0_38 = arith.constant 0 : index
    %33 = vector.load %arg7[%c2_36, %c1_37, %c0_38] : memref<18x18x32xf32, #tpu.memory_space<vmem>>, vector<16x16x32xf32>
    %34 = vector.shape_cast %33 : vector<16x16x32xf32> to vector<256x32xf32>
    %35 = arith.truncf %34 : vector<256x32xf32> to vector<256x32xbf16>
    %c0_39 = arith.constant 0 : index
    %c224 = arith.constant 224 : index
    %36 = vector.load %arg8[%c0_39, %c224] : memref<256x288xbf16, #tpu.memory_space<vmem>>, vector<256x32xbf16>
    tpu.vector_store %arg8[%c0_39, %c224], %35 {strides = array<i32>} : memref<256x288xbf16, #tpu.memory_space<vmem>>, vector<256x32xbf16>,
    %c2_40 = arith.constant 2 : index
    %c2_41 = arith.constant 2 : index
    %c0_42 = arith.constant 0 : index
    %37 = vector.load %arg7[%c2_40, %c2_41, %c0_42] : memref<18x18x32xf32, #tpu.memory_space<vmem>>, vector<16x16x32xf32>
    %38 = vector.shape_cast %37 : vector<16x16x32xf32> to vector<256x32xf32>
    %39 = arith.truncf %38 : vector<256x32xf32> to vector<256x32xbf16>
    %c0_43 = arith.constant 0 : index
    %c256 = arith.constant 256 : index
    %40 = vector.load %arg8[%c0_43, %c256] : memref<256x288xbf16, #tpu.memory_space<vmem>>, vector<256x32xbf16>
    tpu.vector_store %arg8[%c0_43, %c256], %39 {strides = array<i32>} : memref<256x288xbf16, #tpu.memory_space<vmem>>, vector<256x32xbf16>,
    %c0_44 = arith.constant 0 : index
    %c0_45 = arith.constant 0 : index
    %41 = vector.load %arg8[%c0_44, %c0_45] : memref<256x288xbf16, #tpu.memory_space<vmem>>, vector<256x288xbf16>
    %c0_46 = arith.constant 0 : index
    %c0_47 = arith.constant 0 : index
    %c0_48 = arith.constant 0 : index
    %42 = vector.load %arg2[%c0_46, %c0_47, %c0_48] : memref<3x288x32xbf16, #tpu.memory_space<vmem>>, vector<1x288x32xbf16>
    %43 = vector.shape_cast %42 : vector<1x288x32xbf16> to vector<288x32xbf16>
    %cst_49 = arith.constant dense<0.000000e+00> : vector<256x32xf32>
    %44 = tpu.matmul %41, %43, %cst_49 {dimension_numbers = #tpu.dot_dimension_numbers<[1], [0], [0], [1], [0, 0, 1, 1], [], []>} : vector<256x288xbf16>, vector<288x32xbf16>, vector<256x32xf32> -> vector<256x32xf32>
    %c0_50 = arith.constant 0 : index
    %c0_51 = arith.constant 0 : index
    %c0_52 = arith.constant 0 : index
    %45 = vector.load %arg3[%c0_50, %c0_51, %c0_52] : memref<3x1x32xf32, #tpu.memory_space<vmem>>, vector<1x1x32xf32>
    %46 = vector.shape_cast %45 : vector<1x1x32xf32> to vector<1x32xf32>
    %47 = vector.broadcast %46 : vector<1x32xf32> to vector<256x32xf32>
    %48 = arith.addf %44, %47 : vector<256x32xf32>
    %cst_53 = arith.constant dense<0.000000e+00> : vector<32xf32>
    %49 = vector.multi_reduction <add>, %48, %cst_53 [0] : vector<256x32xf32> to vector<32xf32>
    %50 = vector.shape_cast %49 : vector<32xf32> to vector<1x32xf32>
    %cst_54 = arith.constant 2.560000e+02 : f32
    %51 = vector.broadcast %cst_54 : f32 to vector<1x32xf32>
    %52 = arith.divf %50, %51 : vector<1x32xf32>
    %53 = vector.broadcast %52 : vector<1x32xf32> to vector<256x32xf32>
    %54 = arith.subf %48, %53 : vector<256x32xf32>
    %55 = arith.mulf %54, %54 : vector<256x32xf32>
    %cst_55 = arith.constant dense<0.000000e+00> : vector<32xf32>
    %56 = vector.multi_reduction <add>, %55, %cst_55 [0] : vector<256x32xf32> to vector<32xf32>
    %57 = vector.shape_cast %56 : vector<32xf32> to vector<1x32xf32>
    %cst_56 = arith.constant 2.560000e+02 : f32
    %58 = vector.broadcast %cst_56 : f32 to vector<1x32xf32>
    %59 = arith.divf %57, %58 : vector<1x32xf32>
    %cst_57 = arith.constant 9.99999974E-6 : f32
    %60 = vector.broadcast %cst_57 : f32 to vector<1x32xf32>
    %61 = arith.addf %59, %60 : vector<1x32xf32>
    %62 = math.rsqrt %61 : vector<1x32xf32>
    %63 = vector.broadcast %62 : vector<1x32xf32> to vector<256x32xf32>
    %64 = arith.mulf %54, %63 : vector<256x32xf32>
    %c0_58 = arith.constant 0 : index
    %c0_59 = arith.constant 0 : index
    %c0_60 = arith.constant 0 : index
    %65 = vector.load %arg4[%c0_58, %c0_59, %c0_60] : memref<3x1x32xf32, #tpu.memory_space<vmem>>, vector<1x1x32xf32>
    %66 = vector.shape_cast %65 : vector<1x1x32xf32> to vector<1x32xf32>
    %67 = vector.broadcast %66 : vector<1x32xf32> to vector<256x32xf32>
    %68 = arith.mulf %64, %67 : vector<256x32xf32>
    %c0_61 = arith.constant 0 : index
    %c0_62 = arith.constant 0 : index
    %c0_63 = arith.constant 0 : index
    %69 = vector.load %arg5[%c0_61, %c0_62, %c0_63] : memref<3x1x32xf32, #tpu.memory_space<vmem>>, vector<1x1x32xf32>
    %70 = vector.shape_cast %69 : vector<1x1x32xf32> to vector<1x32xf32>
    %71 = vector.broadcast %70 : vector<1x32xf32> to vector<256x32xf32>
    %72 = arith.addf %68, %71 : vector<256x32xf32>
    %cst_64 = arith.constant 0.000000e+00 : f32
    %73 = vector.broadcast %cst_64 : f32 to vector<256x32xf32>
    %74 = arith.maximumf %72, %73 : vector<256x32xf32>
    %c0_65 = arith.constant 0 : index
    %c0_66 = arith.constant 0 : index
    %75 = vector.load %arg9[%c0_65, %c0_66] : memref<256x32xf32, #tpu.memory_space<vmem>>, vector<256x32xf32>
    tpu.vector_store %arg9[%c0_65, %c0_66], %74 {strides = array<i32>} : memref<256x32xf32, #tpu.memory_space<vmem>>, vector<256x32xf32>,
    %c0_67 = arith.constant 0 : index
    %c0_68 = arith.constant 0 : index
    %76 = tpu.strided_load %arg9[%c0_67, %c0_68] {strides = array<i32: 2, 1>} : memref<256x32xf32, #tpu.memory_space<vmem>>, vector<128x32xf32>
    %c1_69 = arith.constant 1 : index
    %c0_70 = arith.constant 0 : index
    %77 = tpu.strided_load %arg9[%c1_69, %c0_70] {strides = array<i32: 2, 1>} : memref<256x32xf32, #tpu.memory_space<vmem>>, vector<128x32xf32>
    %78 = arith.addf %76, %77 : vector<128x32xf32>
    %79 = vector.shape_cast %78 : vector<128x32xf32> to vector<16x8x32xf32>
    %c0_71 = arith.constant 0 : index
    %c0_72 = arith.constant 0 : index
    %c0_73 = arith.constant 0 : index
    %80 = vector.load %arg10[%c0_71, %c0_72, %c0_73] : memref<16x8x32xf32, #tpu.memory_space<vmem>>, vector<16x8x32xf32>
    tpu.vector_store %arg10[%c0_71, %c0_72, %c0_73], %79 {strides = array<i32>} : memref<16x8x32xf32, #tpu.memory_space<vmem>>, vector<16x8x32xf32>,
    %c0_74 = arith.constant 0 : index
    %c0_75 = arith.constant 0 : index
    %c0_76 = arith.constant 0 : index
    %81 = tpu.strided_load %arg10[%c0_74, %c0_75, %c0_76] {strides = array<i32: 2, 1, 1>} : memref<16x8x32xf32, #tpu.memory_space<vmem>>, vector<8x8x32xf32>
    %c1_77 = arith.constant 1 : index
    %c0_78 = arith.constant 0 : index
    %c0_79 = arith.constant 0 : index
    %82 = tpu.strided_load %arg10[%c1_77, %c0_78, %c0_79] {strides = array<i32: 2, 1, 1>} : memref<16x8x32xf32, #tpu.memory_space<vmem>>, vector<8x8x32xf32>
    %83 = arith.addf %81, %82 : vector<8x8x32xf32>
    %cst_80 = arith.constant 2.500000e-01 : f32
    %84 = vector.broadcast %cst_80 : f32 to vector<8x8x32xf32>
    %85 = arith.mulf %83, %84 : vector<8x8x32xf32>
    %cst_81 = arith.constant 0.000000e+00 : f32
    %86 = vector.broadcast %cst_81 : f32 to vector<10x10x32xf32>
    %c0_82 = arith.constant 0 : index
    %c0_83 = arith.constant 0 : index
    %c0_84 = arith.constant 0 : index
    %87 = vector.load %arg7[%c0_82, %c0_83, %c0_84] : memref<18x18x32xf32, #tpu.memory_space<vmem>>, vector<10x10x32xf32>
    tpu.vector_store %arg7[%c0_82, %c0_83, %c0_84], %86 {strides = array<i32>} : memref<18x18x32xf32, #tpu.memory_space<vmem>>, vector<10x10x32xf32>,
    %c1_85 = arith.constant 1 : index
    %c1_86 = arith.constant 1 : index
    %c0_87 = arith.constant 0 : index
    %88 = vector.load %arg7[%c1_85, %c1_86, %c0_87] : memref<18x18x32xf32, #tpu.memory_space<vmem>>, vector<8x8x32xf32>
    tpu.vector_store %arg7[%c1_85, %c1_86, %c0_87], %85 {strides = array<i32>} : memref<18x18x32xf32, #tpu.memory_space<vmem>>, vector<8x8x32xf32>,
    %c0_88 = arith.constant 0 : index
    %c0_89 = arith.constant 0 : index
    %c0_90 = arith.constant 0 : index
    %89 = vector.load %arg7[%c0_88, %c0_89, %c0_90] : memref<18x18x32xf32, #tpu.memory_space<vmem>>, vector<8x8x32xf32>
    %90 = vector.shape_cast %89 : vector<8x8x32xf32> to vector<64x32xf32>
    %91 = arith.truncf %90 : vector<64x32xf32> to vector<64x32xbf16>
    %c0_91 = arith.constant 0 : index
    %c0_92 = arith.constant 0 : index
    %92 = vector.load %arg8[%c0_91, %c0_92] : memref<256x288xbf16, #tpu.memory_space<vmem>>, vector<64x32xbf16>
    tpu.vector_store %arg8[%c0_91, %c0_92], %91 {strides = array<i32>} : memref<256x288xbf16, #tpu.memory_space<vmem>>, vector<64x32xbf16>,
    %c0_93 = arith.constant 0 : index
    %c1_94 = arith.constant 1 : index
    %c0_95 = arith.constant 0 : index
    %93 = vector.load %arg7[%c0_93, %c1_94, %c0_95] : memref<18x18x32xf32, #tpu.memory_space<vmem>>, vector<8x8x32xf32>
    %94 = vector.shape_cast %93 : vector<8x8x32xf32> to vector<64x32xf32>
    %95 = arith.truncf %94 : vector<64x32xf32> to vector<64x32xbf16>
    %c0_96 = arith.constant 0 : index
    %c32_97 = arith.constant 32 : index
    %96 = vector.load %arg8[%c0_96, %c32_97] : memref<256x288xbf16, #tpu.memory_space<vmem>>, vector<64x32xbf16>
    tpu.vector_store %arg8[%c0_96, %c32_97], %95 {strides = array<i32>} : memref<256x288xbf16, #tpu.memory_space<vmem>>, vector<64x32xbf16>,
    %c0_98 = arith.constant 0 : index
    %c2_99 = arith.constant 2 : index
    %c0_100 = arith.constant 0 : index
    %97 = vector.load %arg7[%c0_98, %c2_99, %c0_100] : memref<18x18x32xf32, #tpu.memory_space<vmem>>, vector<8x8x32xf32>
    %98 = vector.shape_cast %97 : vector<8x8x32xf32> to vector<64x32xf32>
    %99 = arith.truncf %98 : vector<64x32xf32> to vector<64x32xbf16>
    %c0_101 = arith.constant 0 : index
    %c64_102 = arith.constant 64 : index
    %100 = vector.load %arg8[%c0_101, %c64_102] : memref<256x288xbf16, #tpu.memory_space<vmem>>, vector<64x32xbf16>
    tpu.vector_store %arg8[%c0_101, %c64_102], %99 {strides = array<i32>} : memref<256x288xbf16, #tpu.memory_space<vmem>>, vector<64x32xbf16>,
    %c1_103 = arith.constant 1 : index
    %c0_104 = arith.constant 0 : index
    %c0_105 = arith.constant 0 : index
    %101 = vector.load %arg7[%c1_103, %c0_104, %c0_105] : memref<18x18x32xf32, #tpu.memory_space<vmem>>, vector<8x8x32xf32>
    %102 = vector.shape_cast %101 : vector<8x8x32xf32> to vector<64x32xf32>
    %103 = arith.truncf %102 : vector<64x32xf32> to vector<64x32xbf16>
    %c0_106 = arith.constant 0 : index
    %c96_107 = arith.constant 96 : index
    %104 = vector.load %arg8[%c0_106, %c96_107] : memref<256x288xbf16, #tpu.memory_space<vmem>>, vector<64x32xbf16>
    tpu.vector_store %arg8[%c0_106, %c96_107], %103 {strides = array<i32>} : memref<256x288xbf16, #tpu.memory_space<vmem>>, vector<64x32xbf16>,
    %c1_108 = arith.constant 1 : index
    %c1_109 = arith.constant 1 : index
    %c0_110 = arith.constant 0 : index
    %105 = vector.load %arg7[%c1_108, %c1_109, %c0_110] : memref<18x18x32xf32, #tpu.memory_space<vmem>>, vector<8x8x32xf32>
    %106 = vector.shape_cast %105 : vector<8x8x32xf32> to vector<64x32xf32>
    %107 = arith.truncf %106 : vector<64x32xf32> to vector<64x32xbf16>
    %c0_111 = arith.constant 0 : index
    %c128_112 = arith.constant 128 : index
    %108 = vector.load %arg8[%c0_111, %c128_112] : memref<256x288xbf16, #tpu.memory_space<vmem>>, vector<64x32xbf16>
    tpu.vector_store %arg8[%c0_111, %c128_112], %107 {strides = array<i32>} : memref<256x288xbf16, #tpu.memory_space<vmem>>, vector<64x32xbf16>,
    %c1_113 = arith.constant 1 : index
    %c2_114 = arith.constant 2 : index
    %c0_115 = arith.constant 0 : index
    %109 = vector.load %arg7[%c1_113, %c2_114, %c0_115] : memref<18x18x32xf32, #tpu.memory_space<vmem>>, vector<8x8x32xf32>
    %110 = vector.shape_cast %109 : vector<8x8x32xf32> to vector<64x32xf32>
    %111 = arith.truncf %110 : vector<64x32xf32> to vector<64x32xbf16>
    %c0_116 = arith.constant 0 : index
    %c160_117 = arith.constant 160 : index
    %112 = vector.load %arg8[%c0_116, %c160_117] : memref<256x288xbf16, #tpu.memory_space<vmem>>, vector<64x32xbf16>
    tpu.vector_store %arg8[%c0_116, %c160_117], %111 {strides = array<i32>} : memref<256x288xbf16, #tpu.memory_space<vmem>>, vector<64x32xbf16>,
    %c2_118 = arith.constant 2 : index
    %c0_119 = arith.constant 0 : index
    %c0_120 = arith.constant 0 : index
    %113 = vector.load %arg7[%c2_118, %c0_119, %c0_120] : memref<18x18x32xf32, #tpu.memory_space<vmem>>, vector<8x8x32xf32>
    %114 = vector.shape_cast %113 : vector<8x8x32xf32> to vector<64x32xf32>
    %115 = arith.truncf %114 : vector<64x32xf32> to vector<64x32xbf16>
    %c0_121 = arith.constant 0 : index
    %c192_122 = arith.constant 192 : index
    %116 = vector.load %arg8[%c0_121, %c192_122] : memref<256x288xbf16, #tpu.memory_space<vmem>>, vector<64x32xbf16>
    tpu.vector_store %arg8[%c0_121, %c192_122], %115 {strides = array<i32>} : memref<256x288xbf16, #tpu.memory_space<vmem>>, vector<64x32xbf16>,
    %c2_123 = arith.constant 2 : index
    %c1_124 = arith.constant 1 : index
    %c0_125 = arith.constant 0 : index
    %117 = vector.load %arg7[%c2_123, %c1_124, %c0_125] : memref<18x18x32xf32, #tpu.memory_space<vmem>>, vector<8x8x32xf32>
    %118 = vector.shape_cast %117 : vector<8x8x32xf32> to vector<64x32xf32>
    %119 = arith.truncf %118 : vector<64x32xf32> to vector<64x32xbf16>
    %c0_126 = arith.constant 0 : index
    %c224_127 = arith.constant 224 : index
    %120 = vector.load %arg8[%c0_126, %c224_127] : memref<256x288xbf16, #tpu.memory_space<vmem>>, vector<64x32xbf16>
    tpu.vector_store %arg8[%c0_126, %c224_127], %119 {strides = array<i32>} : memref<256x288xbf16, #tpu.memory_space<vmem>>, vector<64x32xbf16>,
    %c2_128 = arith.constant 2 : index
    %c2_129 = arith.constant 2 : index
    %c0_130 = arith.constant 0 : index
    %121 = vector.load %arg7[%c2_128, %c2_129, %c0_130] : memref<18x18x32xf32, #tpu.memory_space<vmem>>, vector<8x8x32xf32>
    %122 = vector.shape_cast %121 : vector<8x8x32xf32> to vector<64x32xf32>
    %123 = arith.truncf %122 : vector<64x32xf32> to vector<64x32xbf16>
    %c0_131 = arith.constant 0 : index
    %c256_132 = arith.constant 256 : index
    %124 = vector.load %arg8[%c0_131, %c256_132] : memref<256x288xbf16, #tpu.memory_space<vmem>>, vector<64x32xbf16>
    tpu.vector_store %arg8[%c0_131, %c256_132], %123 {strides = array<i32>} : memref<256x288xbf16, #tpu.memory_space<vmem>>, vector<64x32xbf16>,
    %c0_133 = arith.constant 0 : index
    %c0_134 = arith.constant 0 : index
    %125 = vector.load %arg8[%c0_133, %c0_134] : memref<256x288xbf16, #tpu.memory_space<vmem>>, vector<64x288xbf16>
    %c1_135 = arith.constant 1 : index
    %c0_136 = arith.constant 0 : index
    %c0_137 = arith.constant 0 : index
    %126 = vector.load %arg2[%c1_135, %c0_136, %c0_137] : memref<3x288x32xbf16, #tpu.memory_space<vmem>>, vector<1x288x32xbf16>
    %127 = vector.shape_cast %126 : vector<1x288x32xbf16> to vector<288x32xbf16>
    %cst_138 = arith.constant dense<0.000000e+00> : vector<64x32xf32>
    %128 = tpu.matmul %125, %127, %cst_138 {dimension_numbers = #tpu.dot_dimension_numbers<[1], [0], [0], [1], [0, 0, 1, 1], [], []>} : vector<64x288xbf16>, vector<288x32xbf16>, vector<64x32xf32> -> vector<64x32xf32>
    %c1_139 = arith.constant 1 : index
    %c0_140 = arith.constant 0 : index
    %c0_141 = arith.constant 0 : index
    %129 = vector.load %arg3[%c1_139, %c0_140, %c0_141] : memref<3x1x32xf32, #tpu.memory_space<vmem>>, vector<1x1x32xf32>
    %130 = vector.shape_cast %129 : vector<1x1x32xf32> to vector<1x32xf32>
    %131 = vector.broadcast %130 : vector<1x32xf32> to vector<64x32xf32>
    %132 = arith.addf %128, %131 : vector<64x32xf32>
    %cst_142 = arith.constant dense<0.000000e+00> : vector<32xf32>
    %133 = vector.multi_reduction <add>, %132, %cst_142 [0] : vector<64x32xf32> to vector<32xf32>
    %134 = vector.shape_cast %133 : vector<32xf32> to vector<1x32xf32>
    %cst_143 = arith.constant 6.400000e+01 : f32
    %135 = vector.broadcast %cst_143 : f32 to vector<1x32xf32>
    %136 = arith.divf %134, %135 : vector<1x32xf32>
    %137 = vector.broadcast %136 : vector<1x32xf32> to vector<64x32xf32>
    %138 = arith.subf %132, %137 : vector<64x32xf32>
    %139 = arith.mulf %138, %138 : vector<64x32xf32>
    %cst_144 = arith.constant dense<0.000000e+00> : vector<32xf32>
    %140 = vector.multi_reduction <add>, %139, %cst_144 [0] : vector<64x32xf32> to vector<32xf32>
    %141 = vector.shape_cast %140 : vector<32xf32> to vector<1x32xf32>
    %cst_145 = arith.constant 6.400000e+01 : f32
    %142 = vector.broadcast %cst_145 : f32 to vector<1x32xf32>
    %143 = arith.divf %141, %142 : vector<1x32xf32>
    %cst_146 = arith.constant 9.99999974E-6 : f32
    %144 = vector.broadcast %cst_146 : f32 to vector<1x32xf32>
    %145 = arith.addf %143, %144 : vector<1x32xf32>
    %146 = math.rsqrt %145 : vector<1x32xf32>
    %147 = vector.broadcast %146 : vector<1x32xf32> to vector<64x32xf32>
    %148 = arith.mulf %138, %147 : vector<64x32xf32>
    %c1_147 = arith.constant 1 : index
    %c0_148 = arith.constant 0 : index
    %c0_149 = arith.constant 0 : index
    %149 = vector.load %arg4[%c1_147, %c0_148, %c0_149] : memref<3x1x32xf32, #tpu.memory_space<vmem>>, vector<1x1x32xf32>
    %150 = vector.shape_cast %149 : vector<1x1x32xf32> to vector<1x32xf32>
    %151 = vector.broadcast %150 : vector<1x32xf32> to vector<64x32xf32>
    %152 = arith.mulf %148, %151 : vector<64x32xf32>
    %c1_150 = arith.constant 1 : index
    %c0_151 = arith.constant 0 : index
    %c0_152 = arith.constant 0 : index
    %153 = vector.load %arg5[%c1_150, %c0_151, %c0_152] : memref<3x1x32xf32, #tpu.memory_space<vmem>>, vector<1x1x32xf32>
    %154 = vector.shape_cast %153 : vector<1x1x32xf32> to vector<1x32xf32>
    %155 = vector.broadcast %154 : vector<1x32xf32> to vector<64x32xf32>
    %156 = arith.addf %152, %155 : vector<64x32xf32>
    %cst_153 = arith.constant 0.000000e+00 : f32
    %157 = vector.broadcast %cst_153 : f32 to vector<64x32xf32>
    %158 = arith.maximumf %156, %157 : vector<64x32xf32>
    %c0_154 = arith.constant 0 : index
    %c0_155 = arith.constant 0 : index
    %159 = vector.load %arg9[%c0_154, %c0_155] : memref<256x32xf32, #tpu.memory_space<vmem>>, vector<64x32xf32>
    tpu.vector_store %arg9[%c0_154, %c0_155], %158 {strides = array<i32>} : memref<256x32xf32, #tpu.memory_space<vmem>>, vector<64x32xf32>,
    %c0_156 = arith.constant 0 : index
    %c0_157 = arith.constant 0 : index
    %160 = tpu.strided_load %arg9[%c0_156, %c0_157] {strides = array<i32: 2, 1>} : memref<256x32xf32, #tpu.memory_space<vmem>>, vector<32x32xf32>
    %c1_158 = arith.constant 1 : index
    %c0_159 = arith.constant 0 : index
    %161 = tpu.strided_load %arg9[%c1_158, %c0_159] {strides = array<i32: 2, 1>} : memref<256x32xf32, #tpu.memory_space<vmem>>, vector<32x32xf32>
    %162 = arith.addf %160, %161 : vector<32x32xf32>
    %163 = vector.shape_cast %162 : vector<32x32xf32> to vector<8x4x32xf32>
    %c0_160 = arith.constant 0 : index
    %c0_161 = arith.constant 0 : index
    %c0_162 = arith.constant 0 : index
    %164 = vector.load %arg10[%c0_160, %c0_161, %c0_162] : memref<16x8x32xf32, #tpu.memory_space<vmem>>, vector<8x4x32xf32>
    tpu.vector_store %arg10[%c0_160, %c0_161, %c0_162], %163 {strides = array<i32>} : memref<16x8x32xf32, #tpu.memory_space<vmem>>, vector<8x4x32xf32>,
    %c0_163 = arith.constant 0 : index
    %c0_164 = arith.constant 0 : index
    %c0_165 = arith.constant 0 : index
    %165 = tpu.strided_load %arg10[%c0_163, %c0_164, %c0_165] {strides = array<i32: 2, 1, 1>} : memref<16x8x32xf32, #tpu.memory_space<vmem>>, vector<4x4x32xf32>
    %c1_166 = arith.constant 1 : index
    %c0_167 = arith.constant 0 : index
    %c0_168 = arith.constant 0 : index
    %166 = tpu.strided_load %arg10[%c1_166, %c0_167, %c0_168] {strides = array<i32: 2, 1, 1>} : memref<16x8x32xf32, #tpu.memory_space<vmem>>, vector<4x4x32xf32>
    %167 = arith.addf %165, %166 : vector<4x4x32xf32>
    %cst_169 = arith.constant 2.500000e-01 : f32
    %168 = vector.broadcast %cst_169 : f32 to vector<4x4x32xf32>
    %169 = arith.mulf %167, %168 : vector<4x4x32xf32>
    %cst_170 = arith.constant 0.000000e+00 : f32
    %170 = vector.broadcast %cst_170 : f32 to vector<6x6x32xf32>
    %c0_171 = arith.constant 0 : index
    %c0_172 = arith.constant 0 : index
    %c0_173 = arith.constant 0 : index
    %171 = vector.load %arg7[%c0_171, %c0_172, %c0_173] : memref<18x18x32xf32, #tpu.memory_space<vmem>>, vector<6x6x32xf32>
    tpu.vector_store %arg7[%c0_171, %c0_172, %c0_173], %170 {strides = array<i32>} : memref<18x18x32xf32, #tpu.memory_space<vmem>>, vector<6x6x32xf32>,
    %c1_174 = arith.constant 1 : index
    %c1_175 = arith.constant 1 : index
    %c0_176 = arith.constant 0 : index
    %172 = vector.load %arg7[%c1_174, %c1_175, %c0_176] : memref<18x18x32xf32, #tpu.memory_space<vmem>>, vector<4x4x32xf32>
    tpu.vector_store %arg7[%c1_174, %c1_175, %c0_176], %169 {strides = array<i32>} : memref<18x18x32xf32, #tpu.memory_space<vmem>>, vector<4x4x32xf32>,
    %c0_177 = arith.constant 0 : index
    %c0_178 = arith.constant 0 : index
    %c0_179 = arith.constant 0 : index
    %173 = vector.load %arg7[%c0_177, %c0_178, %c0_179] : memref<18x18x32xf32, #tpu.memory_space<vmem>>, vector<4x4x32xf32>
    %174 = vector.shape_cast %173 : vector<4x4x32xf32> to vector<16x32xf32>
    %175 = arith.truncf %174 : vector<16x32xf32> to vector<16x32xbf16>
    %c0_180 = arith.constant 0 : index
    %c0_181 = arith.constant 0 : index
    %176 = vector.load %arg8[%c0_180, %c0_181] : memref<256x288xbf16, #tpu.memory_space<vmem>>, vector<16x32xbf16>
    tpu.vector_store %arg8[%c0_180, %c0_181], %175 {strides = array<i32>} : memref<256x288xbf16, #tpu.memory_space<vmem>>, vector<16x32xbf16>,
    %c0_182 = arith.constant 0 : index
    %c1_183 = arith.constant 1 : index
    %c0_184 = arith.constant 0 : index
    %177 = vector.load %arg7[%c0_182, %c1_183, %c0_184] : memref<18x18x32xf32, #tpu.memory_space<vmem>>, vector<4x4x32xf32>
    %178 = vector.shape_cast %177 : vector<4x4x32xf32> to vector<16x32xf32>
    %179 = arith.truncf %178 : vector<16x32xf32> to vector<16x32xbf16>
    %c0_185 = arith.constant 0 : index
    %c32_186 = arith.constant 32 : index
    %180 = vector.load %arg8[%c0_185, %c32_186] : memref<256x288xbf16, #tpu.memory_space<vmem>>, vector<16x32xbf16>
    tpu.vector_store %arg8[%c0_185, %c32_186], %179 {strides = array<i32>} : memref<256x288xbf16, #tpu.memory_space<vmem>>, vector<16x32xbf16>,
    %c0_187 = arith.constant 0 : index
    %c2_188 = arith.constant 2 : index
    %c0_189 = arith.constant 0 : index
    %181 = vector.load %arg7[%c0_187, %c2_188, %c0_189] : memref<18x18x32xf32, #tpu.memory_space<vmem>>, vector<4x4x32xf32>
    %182 = vector.shape_cast %181 : vector<4x4x32xf32> to vector<16x32xf32>
    %183 = arith.truncf %182 : vector<16x32xf32> to vector<16x32xbf16>
    %c0_190 = arith.constant 0 : index
    %c64_191 = arith.constant 64 : index
    %184 = vector.load %arg8[%c0_190, %c64_191] : memref<256x288xbf16, #tpu.memory_space<vmem>>, vector<16x32xbf16>
    tpu.vector_store %arg8[%c0_190, %c64_191], %183 {strides = array<i32>} : memref<256x288xbf16, #tpu.memory_space<vmem>>, vector<16x32xbf16>,
    %c1_192 = arith.constant 1 : index
    %c0_193 = arith.constant 0 : index
    %c0_194 = arith.constant 0 : index
    %185 = vector.load %arg7[%c1_192, %c0_193, %c0_194] : memref<18x18x32xf32, #tpu.memory_space<vmem>>, vector<4x4x32xf32>
    %186 = vector.shape_cast %185 : vector<4x4x32xf32> to vector<16x32xf32>
    %187 = arith.truncf %186 : vector<16x32xf32> to vector<16x32xbf16>
    %c0_195 = arith.constant 0 : index
    %c96_196 = arith.constant 96 : index
    %188 = vector.load %arg8[%c0_195, %c96_196] : memref<256x288xbf16, #tpu.memory_space<vmem>>, vector<16x32xbf16>
    tpu.vector_store %arg8[%c0_195, %c96_196], %187 {strides = array<i32>} : memref<256x288xbf16, #tpu.memory_space<vmem>>, vector<16x32xbf16>,
    %c1_197 = arith.constant 1 : index
    %c1_198 = arith.constant 1 : index
    %c0_199 = arith.constant 0 : index
    %189 = vector.load %arg7[%c1_197, %c1_198, %c0_199] : memref<18x18x32xf32, #tpu.memory_space<vmem>>, vector<4x4x32xf32>
    %190 = vector.shape_cast %189 : vector<4x4x32xf32> to vector<16x32xf32>
    %191 = arith.truncf %190 : vector<16x32xf32> to vector<16x32xbf16>
    %c0_200 = arith.constant 0 : index
    %c128_201 = arith.constant 128 : index
    %192 = vector.load %arg8[%c0_200, %c128_201] : memref<256x288xbf16, #tpu.memory_space<vmem>>, vector<16x32xbf16>
    tpu.vector_store %arg8[%c0_200, %c128_201], %191 {strides = array<i32>} : memref<256x288xbf16, #tpu.memory_space<vmem>>, vector<16x32xbf16>,
    %c1_202 = arith.constant 1 : index
    %c2_203 = arith.constant 2 : index
    %c0_204 = arith.constant 0 : index
    %193 = vector.load %arg7[%c1_202, %c2_203, %c0_204] : memref<18x18x32xf32, #tpu.memory_space<vmem>>, vector<4x4x32xf32>
    %194 = vector.shape_cast %193 : vector<4x4x32xf32> to vector<16x32xf32>
    %195 = arith.truncf %194 : vector<16x32xf32> to vector<16x32xbf16>
    %c0_205 = arith.constant 0 : index
    %c160_206 = arith.constant 160 : index
    %196 = vector.load %arg8[%c0_205, %c160_206] : memref<256x288xbf16, #tpu.memory_space<vmem>>, vector<16x32xbf16>
    tpu.vector_store %arg8[%c0_205, %c160_206], %195 {strides = array<i32>} : memref<256x288xbf16, #tpu.memory_space<vmem>>, vector<16x32xbf16>,
    %c2_207 = arith.constant 2 : index
    %c0_208 = arith.constant 0 : index
    %c0_209 = arith.constant 0 : index
    %197 = vector.load %arg7[%c2_207, %c0_208, %c0_209] : memref<18x18x32xf32, #tpu.memory_space<vmem>>, vector<4x4x32xf32>
    %198 = vector.shape_cast %197 : vector<4x4x32xf32> to vector<16x32xf32>
    %199 = arith.truncf %198 : vector<16x32xf32> to vector<16x32xbf16>
    %c0_210 = arith.constant 0 : index
    %c192_211 = arith.constant 192 : index
    %200 = vector.load %arg8[%c0_210, %c192_211] : memref<256x288xbf16, #tpu.memory_space<vmem>>, vector<16x32xbf16>
    tpu.vector_store %arg8[%c0_210, %c192_211], %199 {strides = array<i32>} : memref<256x288xbf16, #tpu.memory_space<vmem>>, vector<16x32xbf16>,
    %c2_212 = arith.constant 2 : index
    %c1_213 = arith.constant 1 : index
    %c0_214 = arith.constant 0 : index
    %201 = vector.load %arg7[%c2_212, %c1_213, %c0_214] : memref<18x18x32xf32, #tpu.memory_space<vmem>>, vector<4x4x32xf32>
    %202 = vector.shape_cast %201 : vector<4x4x32xf32> to vector<16x32xf32>
    %203 = arith.truncf %202 : vector<16x32xf32> to vector<16x32xbf16>
    %c0_215 = arith.constant 0 : index
    %c224_216 = arith.constant 224 : index
    %204 = vector.load %arg8[%c0_215, %c224_216] : memref<256x288xbf16, #tpu.memory_space<vmem>>, vector<16x32xbf16>
    tpu.vector_store %arg8[%c0_215, %c224_216], %203 {strides = array<i32>} : memref<256x288xbf16, #tpu.memory_space<vmem>>, vector<16x32xbf16>,
    %c2_217 = arith.constant 2 : index
    %c2_218 = arith.constant 2 : index
    %c0_219 = arith.constant 0 : index
    %205 = vector.load %arg7[%c2_217, %c2_218, %c0_219] : memref<18x18x32xf32, #tpu.memory_space<vmem>>, vector<4x4x32xf32>
    %206 = vector.shape_cast %205 : vector<4x4x32xf32> to vector<16x32xf32>
    %207 = arith.truncf %206 : vector<16x32xf32> to vector<16x32xbf16>
    %c0_220 = arith.constant 0 : index
    %c256_221 = arith.constant 256 : index
    %208 = vector.load %arg8[%c0_220, %c256_221] : memref<256x288xbf16, #tpu.memory_space<vmem>>, vector<16x32xbf16>
    tpu.vector_store %arg8[%c0_220, %c256_221], %207 {strides = array<i32>} : memref<256x288xbf16, #tpu.memory_space<vmem>>, vector<16x32xbf16>,
    %c0_222 = arith.constant 0 : index
    %c0_223 = arith.constant 0 : index
    %209 = vector.load %arg8[%c0_222, %c0_223] : memref<256x288xbf16, #tpu.memory_space<vmem>>, vector<16x288xbf16>
    %c2_224 = arith.constant 2 : index
    %c0_225 = arith.constant 0 : index
    %c0_226 = arith.constant 0 : index
    %210 = vector.load %arg2[%c2_224, %c0_225, %c0_226] : memref<3x288x32xbf16, #tpu.memory_space<vmem>>, vector<1x288x32xbf16>
    %211 = vector.shape_cast %210 : vector<1x288x32xbf16> to vector<288x32xbf16>
    %cst_227 = arith.constant dense<0.000000e+00> : vector<16x32xf32>
    %212 = tpu.matmul %209, %211, %cst_227 {dimension_numbers = #tpu.dot_dimension_numbers<[1], [0], [0], [1], [0, 0, 1, 1], [], []>} : vector<16x288xbf16>, vector<288x32xbf16>, vector<16x32xf32> -> vector<16x32xf32>
    %c2_228 = arith.constant 2 : index
    %c0_229 = arith.constant 0 : index
    %c0_230 = arith.constant 0 : index
    %213 = vector.load %arg3[%c2_228, %c0_229, %c0_230] : memref<3x1x32xf32, #tpu.memory_space<vmem>>, vector<1x1x32xf32>
    %214 = vector.shape_cast %213 : vector<1x1x32xf32> to vector<1x32xf32>
    %215 = vector.broadcast %214 : vector<1x32xf32> to vector<16x32xf32>
    %216 = arith.addf %212, %215 : vector<16x32xf32>
    %cst_231 = arith.constant dense<0.000000e+00> : vector<32xf32>
    %217 = vector.multi_reduction <add>, %216, %cst_231 [0] : vector<16x32xf32> to vector<32xf32>
    %218 = vector.shape_cast %217 : vector<32xf32> to vector<1x32xf32>
    %cst_232 = arith.constant 1.600000e+01 : f32
    %219 = vector.broadcast %cst_232 : f32 to vector<1x32xf32>
    %220 = arith.divf %218, %219 : vector<1x32xf32>
    %221 = vector.broadcast %220 : vector<1x32xf32> to vector<16x32xf32>
    %222 = arith.subf %216, %221 : vector<16x32xf32>
    %223 = arith.mulf %222, %222 : vector<16x32xf32>
    %cst_233 = arith.constant dense<0.000000e+00> : vector<32xf32>
    %224 = vector.multi_reduction <add>, %223, %cst_233 [0] : vector<16x32xf32> to vector<32xf32>
    %225 = vector.shape_cast %224 : vector<32xf32> to vector<1x32xf32>
    %cst_234 = arith.constant 1.600000e+01 : f32
    %226 = vector.broadcast %cst_234 : f32 to vector<1x32xf32>
    %227 = arith.divf %225, %226 : vector<1x32xf32>
    %cst_235 = arith.constant 9.99999974E-6 : f32
    %228 = vector.broadcast %cst_235 : f32 to vector<1x32xf32>
    %229 = arith.addf %227, %228 : vector<1x32xf32>
    %230 = math.rsqrt %229 : vector<1x32xf32>
    %231 = vector.broadcast %230 : vector<1x32xf32> to vector<16x32xf32>
    %232 = arith.mulf %222, %231 : vector<16x32xf32>
    %c2_236 = arith.constant 2 : index
    %c0_237 = arith.constant 0 : index
    %c0_238 = arith.constant 0 : index
    %233 = vector.load %arg4[%c2_236, %c0_237, %c0_238] : memref<3x1x32xf32, #tpu.memory_space<vmem>>, vector<1x1x32xf32>
    %234 = vector.shape_cast %233 : vector<1x1x32xf32> to vector<1x32xf32>
    %235 = vector.broadcast %234 : vector<1x32xf32> to vector<16x32xf32>
    %236 = arith.mulf %232, %235 : vector<16x32xf32>
    %c2_239 = arith.constant 2 : index
    %c0_240 = arith.constant 0 : index
    %c0_241 = arith.constant 0 : index
    %237 = vector.load %arg5[%c2_239, %c0_240, %c0_241] : memref<3x1x32xf32, #tpu.memory_space<vmem>>, vector<1x1x32xf32>
    %238 = vector.shape_cast %237 : vector<1x1x32xf32> to vector<1x32xf32>
    %239 = vector.broadcast %238 : vector<1x32xf32> to vector<16x32xf32>
    %240 = arith.addf %236, %239 : vector<16x32xf32>
    %cst_242 = arith.constant 0.000000e+00 : f32
    %241 = vector.broadcast %cst_242 : f32 to vector<16x32xf32>
    %242 = arith.maximumf %240, %241 : vector<16x32xf32>
    %c0_243 = arith.constant 0 : index
    %c0_244 = arith.constant 0 : index
    %243 = vector.load %arg9[%c0_243, %c0_244] : memref<256x32xf32, #tpu.memory_space<vmem>>, vector<16x32xf32>
    tpu.vector_store %arg9[%c0_243, %c0_244], %242 {strides = array<i32>} : memref<256x32xf32, #tpu.memory_space<vmem>>, vector<16x32xf32>,
    %c0_245 = arith.constant 0 : index
    %c0_246 = arith.constant 0 : index
    %244 = tpu.strided_load %arg9[%c0_245, %c0_246] {strides = array<i32: 2, 1>} : memref<256x32xf32, #tpu.memory_space<vmem>>, vector<8x32xf32>
    %c1_247 = arith.constant 1 : index
    %c0_248 = arith.constant 0 : index
    %245 = tpu.strided_load %arg9[%c1_247, %c0_248] {strides = array<i32: 2, 1>} : memref<256x32xf32, #tpu.memory_space<vmem>>, vector<8x32xf32>
    %246 = arith.addf %244, %245 : vector<8x32xf32>
    %247 = vector.shape_cast %246 : vector<8x32xf32> to vector<4x2x32xf32>
    %c0_249 = arith.constant 0 : index
    %c0_250 = arith.constant 0 : index
    %c0_251 = arith.constant 0 : index
    %248 = vector.load %arg10[%c0_249, %c0_250, %c0_251] : memref<16x8x32xf32, #tpu.memory_space<vmem>>, vector<4x2x32xf32>
    tpu.vector_store %arg10[%c0_249, %c0_250, %c0_251], %247 {strides = array<i32>} : memref<16x8x32xf32, #tpu.memory_space<vmem>>, vector<4x2x32xf32>,
    %c0_252 = arith.constant 0 : index
    %c0_253 = arith.constant 0 : index
    %c0_254 = arith.constant 0 : index
    %249 = tpu.strided_load %arg10[%c0_252, %c0_253, %c0_254] {strides = array<i32: 2, 1, 1>} : memref<16x8x32xf32, #tpu.memory_space<vmem>>, vector<2x2x32xf32>
    %c1_255 = arith.constant 1 : index
    %c0_256 = arith.constant 0 : index
    %c0_257 = arith.constant 0 : index
    %250 = tpu.strided_load %arg10[%c1_255, %c0_256, %c0_257] {strides = array<i32: 2, 1, 1>} : memref<16x8x32xf32, #tpu.memory_space<vmem>>, vector<2x2x32xf32>
    %251 = arith.addf %249, %250 : vector<2x2x32xf32>
    %cst_258 = arith.constant 2.500000e-01 : f32
    %252 = vector.broadcast %cst_258 : f32 to vector<2x2x32xf32>
    %253 = arith.mulf %251, %252 : vector<2x2x32xf32>
    %254 = vector.shape_cast %253 : vector<2x2x32xf32> to vector<4x32xf32>
    %c0_259 = arith.constant 0 : index
    %c0_260 = arith.constant 0 : index
    %c0_261 = arith.constant 0 : index
    %255 = vector.load %arg6[%c0_259, %c0_260, %c0_261] : memref<1x4x32xf32, #tpu.memory_space<vmem>>, vector<1x4x32xf32>
    %256 = vector.shape_cast %255 : vector<1x4x32xf32> to vector<4x32xf32>
    %257 = vector.shape_cast %254 : vector<4x32xf32> to vector<1x4x32xf32>
    tpu.vector_store %arg6[%c0_259, %c0_260, %c0_261], %257 {strides = array<i32>} : memref<1x4x32xf32, #tpu.memory_space<vmem>>, vector<1x4x32xf32>,
    return
  }
  func.func @transform_0(%arg0: i32) -> (i32, i32, i32, i32) {
    %c0_i32 = arith.constant 0 : i32
    %c0_i32_0 = arith.constant 0 : i32
    %c0_i32_1 = arith.constant 0 : i32
    %c0_i32_2 = arith.constant 0 : i32
    return %arg0, %c0_i32, %c0_i32_0, %c0_i32_1 : i32, i32, i32, i32
  }
  func.func @transform_1(%arg0: i32) -> (i32, i32, i32) {
    %c0_i32 = arith.constant 0 : i32
    %c0_i32_0 = arith.constant 0 : i32
    %c0_i32_1 = arith.constant 0 : i32
    %c0_i32_2 = arith.constant 0 : i32
    return %c0_i32, %c0_i32_0, %c0_i32_1 : i32, i32, i32
  }
  func.func @transform_2(%arg0: i32) -> (i32, i32, i32) {
    %c0_i32 = arith.constant 0 : i32
    %c0_i32_0 = arith.constant 0 : i32
    %c0_i32_1 = arith.constant 0 : i32
    %c0_i32_2 = arith.constant 0 : i32
    return %c0_i32, %c0_i32_0, %c0_i32_1 : i32, i32, i32
  }
  func.func @transform_3(%arg0: i32) -> (i32, i32, i32) {
    %c0_i32 = arith.constant 0 : i32
    %c0_i32_0 = arith.constant 0 : i32
    %c0_i32_1 = arith.constant 0 : i32
    %c0_i32_2 = arith.constant 0 : i32
    return %c0_i32, %c0_i32_0, %c0_i32_1 : i32, i32, i32
  }
  func.func @transform_4(%arg0: i32) -> (i32, i32, i32) {
    %c0_i32 = arith.constant 0 : i32
    %c0_i32_0 = arith.constant 0 : i32
    %c0_i32_1 = arith.constant 0 : i32
    %c0_i32_2 = arith.constant 0 : i32
    return %c0_i32, %c0_i32_0, %c0_i32_1 : i32, i32, i32
  }
  func.func @transform_5(%arg0: i32) -> (i32, i32, i32) {
    %c0_i32 = arith.constant 0 : i32
    %c0_i32_0 = arith.constant 0 : i32
    %c0_i32_1 = arith.constant 0 : i32
    return %arg0, %c0_i32, %c0_i32_0 : i32, i32, i32
  }
}

</mosaic_0001>

<bundles_post_ra>
// kernel: convnet_forward.1
= control target key start
LH: loop header
LB: loop body
LE: loop exit
PB: predicated region body
PF: predicated region fallthrough
CT: control target
= control target key end

     0   :  { %s5606_s18 = smov 0   ;;  %s7920_s0 = inlined_call_operand.vmem [shape: f32[2,16,16,32], index: 0, kind: input, shape index: {}]   ;;  %s7921_s1 = inlined_call_operand.vmem [shape: bf16[3,288,32], index: 1, kind: input, shape index: {}]   ;;  %s7922_s2 = inlined_call_operand.vmem [shape: f32[3,1,32], index: 2, kind: input, shape index: {}]   ;;  %s7923_s3 = inlined_call_operand.vmem [shape: f32[3,1,32], index: 3, kind: input, shape index: {}]   ;;  %s7924_s4 = inlined_call_operand.vmem [shape: f32[3,1,32], index: 4, kind: input, shape index: {}]   ;;  %s7925_s5 = inlined_call_operand.vmem [shape: f32[2,4,32], index: 5, kind: output, shape index: {}]  }
   0x1 LB: > { %s4829_s19 = sadd.s32 4294967295, %s5567_s18   ;;  %p4833_p0 = scmp.ge.s32.totalorder %s5567_s18, 1  ;;  %s5567_s18 = sphi %s5606_s18, %s15_s18  }
   0x2   : > { %p187_p1 = scmp.lt.s32.totalorder %s5567_s18, 3 }
   0x4   : > { %p188_p2 = pnand %p4833_p0, %p187_p1 }
   0x5   : > { %s5570_s20 = smov (!%p188_p2), 32   ;;  %s5571_s21 = smov (!%p188_p2), 64  }
   0x6   : > { %191 = sbr.rel (%p188_p2) target bundleno = 2014 (0x7de), region = 40  ;;  %p214_p3 = scmp.lt.s32.totalorder (!%p188_p2), %s4829_s19, 1 }
   0x7   : > { %s5572_s26 = smov (!%p188_p2), 96  }
   0xb   : > { %vm224_vm0 = vcmask 261120   ;;  %v5569_v0 = vmov 0.0   ;;  %vm227_vm1 = vcmask 254976   ;;  %s7927_s19 = smov (!%p214_p3, %s4829_s19), 1  ;;  %v5462_v49 = vld [vmem:[%s7921_s1 + $0x38] sm:$0xff]  ;;  %v5461_v53 = vld [vmem:[%s7921_s1 + $0x30] sm:$0xff] }
   0xc   : > { %225 = vst.msk [vmem:[#allocation2] sm:$0xff] %vm224_vm0, %v5569_v0  ;;  %s5406_s22 = sshll.u32 %s7927_s19, 8  ;;  %2482 = vmatpush.bf16.msra.mxu0 %v5462_v49  ;;  %v5460_v56 = vld [vmem:[%s7921_s1 + $0x28] sm:$0xff]  ;;  %vm409_vm2 = vcmask 257024   ;;  %vm634_vm3 = vcmask 519424   ;;  %vm859_vm4 = vcmask 781824  }
   0xd   : > { %226 = vst.msk [vmem:[#allocation2 + $0x8] sm:$0xff] %vm224_vm0, %v5569_v0  ;;  %s5726_s25 = scalar_lea.vmem %s7920_s0, %s5406_s22  ;;  %vm1084_vm5 = vcmask 1044224   ;;  %vm4204_vm10 = vcmask 259072   ;;  %s4836_s30 = sshll.u32 %s7927_s19, 2 }
   0xe   : > { %229 = vst.msk [vmem:[#allocation2 + $0x18] sm:$0xff] %vm224_vm0, %v5569_v0  ;;  %v280_v9 = vld [vmem:[%s5726_s25] sm:$0xff]  ;;  %v281_v10 = vld [vmem:[%s5726_s25 + $0x8] sm:$0xff]  ;;  %v282_v11 = vld [vmem:[%s5726_s25 + $0x10] sm:$0xff]  ;;  %s222_s8 = scalar_lea.vmem %s7925_s5, %s4836_s30 }
   0xf   : > { %230 = vst.msk [vmem:[#allocation2 + $0x20] sm:$0xff] %vm224_vm0, %v5569_v0  ;;  %v283_v12 = vld [vmem:[%s5726_s25 + $0x18] sm:$0xff]  ;;  %v284_v25 = vld [vmem:[%s5726_s25 + $0x20] sm:$0xff]  ;;  %v285_v26 = vld [vmem:[%s5726_s25 + $0x28] sm:$0xff] }
  0x10   : > { %232 = vst.msk [vmem:[#allocation2 + $0x30] sm:$0xff] %vm224_vm0, %v5569_v0  ;;  %v286_v42 = vld [vmem:[%s5726_s25 + $0x30] sm:$0xff]  ;;  %v287_v43 = vld [vmem:[%s5726_s25 + $0x38] sm:$0xff]  ;;  %2483 = vmatpush.bf16.msra.mxu0 %v5461_v53  ;;  %v288_v59 = vld [vmem:[%s5726_s25 + $0x40] sm:$0xff] }
  0x11   : > { %233 = vst.msk [vmem:[#allocation2 + $0x38] sm:$0xff] %vm224_vm0, %v5569_v0  ;;  %v289_v60 = vld [vmem:[%s5726_s25 + $0x48] sm:$0xff] }
  0x12   : > { %235 = vst.msk [vmem:[#allocation2 + $0x48] sm:$0xff] %vm224_vm0, %v5569_v0 }
  0x13   : > { %236 = vst.msk [vmem:[#allocation2 + $0x50] sm:$0xff] %vm224_vm0, %v5569_v0  ;;  %v345_v61 = vld [vmem:[#allocation2] sm:$0xff] }
  0x14   : > { %v442_v1 = vld [vmem:[#allocation2 + $0x1] sm:$0xff]  ;;  %238 = vst.msk [vmem:[#allocation2 + $0x60] sm:$0xff] %vm224_vm0, %v5569_v0  ;;  %2484 = vmatpush.bf16.msra.mxu0 %v5460_v56  ;;  %v377_v63 = vpack.c.bf16 %v345_v61, %v345_v61 }
  0x15   : > { %v667_v2 = vld [vmem:[#allocation2 + $0x2] sm:$0xff]  ;;  %v474_v3 = vpack.c.bf16 %v442_v1, %v442_v1  ;;  %239 = vst.msk [vmem:[#allocation2 + $0x68] sm:$0xff] %vm224_vm0, %v5569_v0 }
  0x16   : > { %v699_v4 = vpack.c.bf16 %v667_v2, %v667_v2  ;;  %241 = vst.msk [vmem:[#allocation2 + $0x78] sm:$0xff] %vm224_vm0, %v5569_v0 }
  0x17   : > { %538 = vrot.lane.b32.xlu0 %v474_v3, %s5570_s20  ;;  %242 = vst.msk [vmem:[#allocation2 + $0x80] sm:$0xff] %vm224_vm0, %v5569_v0  ;;  %v5459_v3 = vld [vmem:[%s7921_s1 + $0x20] sm:$0xff] }
  0x18   : > { %763 = vrot.lane.b32.xlu1 %v699_v4, %s5571_s21  ;;  %244 = vst.msk [vmem:[#allocation2 + $0x90] sm:$0xff] %vm224_vm0, %v5569_v0  ;;  %v5470_v4 = vld [vmem:[%s7921_s1 + $0x78] sm:$0xff]  ;;  %2485 = vmatpush.bf16.msra.mxu0 %v5459_v3 }
  0x19   : > { %245 = vst.msk [vmem:[#allocation2 + $0x98] sm:$0xff] %vm224_vm0, %v5569_v0  ;;  %2571 = vmatpush.bf16.msra.mxu1 %v5470_v4 }
  0x1a   : > { %247 = vst.msk [vmem:[#allocation2 + $0xa8] sm:$0xff] %vm224_vm0, %v5569_v0 }
  0x1b   : > { %248 = vst.msk [vmem:[#allocation2 + $0xb0] sm:$0xff] %vm224_vm0, %v5569_v0 }
  0x1c   : > { %250 = vst.msk [vmem:[#allocation2 + $0xc0] sm:$0xff] %vm224_vm0, %v5569_v0 }
  0x1d   : > { %251 = vst.msk [vmem:[#allocation2 + $0xc8] sm:$0xff] %vm224_vm0, %v5569_v0 }
  0x1e   : > { %253 = vst.msk [vmem:[#allocation2 + $0xd8] sm:$0xff] %vm224_vm0, %v5569_v0 }
  0x1f   : > { %254 = vst.msk [vmem:[#allocation2 + $0xe0] sm:$0xff] %vm224_vm0, %v5569_v0 }
  0x20   : > { %256 = vst.msk [vmem:[#allocation2 + $0xf0] sm:$0xff] %vm224_vm0, %v5569_v0 }
  0x21   : > { %257 = vst.msk [vmem:[#allocation2 + $0xf8] sm:$0xff] %vm224_vm0, %v5569_v0 }
  0x22   : > { %259 = vst.msk [vmem:[#allocation2 + $0x108] sm:$0xff] %vm224_vm0, %v5569_v0 }
  0x23   : > { %260 = vst.msk [vmem:[#allocation2 + $0x110] sm:$0xff] %vm224_vm0, %v5569_v0 }
  0x24   : > { %262 = vst.msk [vmem:[#allocation2 + $0x120] sm:$0xff] %vm224_vm0, %v5569_v0 }
  0x25   : > { %263 = vst.msk [vmem:[#allocation2 + $0x128] sm:$0xff] %vm224_vm0, %v5569_v0 }
  0x26   : > { %265 = vst.msk [vmem:[#allocation2 + $0x138] sm:$0xff] %vm224_vm0, %v5569_v0 }
  0x27   : > { %266 = vst.msk [vmem:[#allocation2 + $0x140] sm:$0xff] %vm224_vm0, %v5569_v0 }
  0x28   : > { %268 = vst.msk [vmem:[#allocation2 + $0x150] sm:$0xff] %vm224_vm0, %v5569_v0 }
  0x29   : > { %269 = vst.msk [vmem:[#allocation2 + $0x158] sm:$0xff] %vm224_vm0, %v5569_v0 }
  0x2a   : > { %271 = vst.msk [vmem:[#allocation2 + $0x168] sm:$0xff] %vm224_vm0, %v5569_v0 }
  0x2b   : > { %272 = vst.msk [vmem:[#allocation2 + $0x170] sm:$0xff] %vm224_vm0, %v5569_v0 }
  0x2c   : > { %274 = vst.msk [vmem:[#allocation2 + $0x180] sm:$0xff] %vm224_vm0, %v5569_v0 }
  0x2d   : > { %275 = vst.msk [vmem:[#allocation2 + $0x188] sm:$0xff] %vm224_vm0, %v5569_v0 }
  0x2e   : > { %277 = vst.msk [vmem:[#allocation2 + $0x198] sm:$0xff] %vm224_vm0, %v5569_v0 }
  0x2f   : > { %278 = vst.msk [vmem:[#allocation2 + $0x1a0] sm:$0xff] %vm224_vm0, %v5569_v0 }
  0x30   : > { %228 = vst.msk [vmem:[#allocation2 + $0x10] sm:$0x3] %vm227_vm1, %v5569_v0 }
  0x31   : > { %231 = vst.msk [vmem:[#allocation2 + $0x28] sm:$0x3] %vm227_vm1, %v5569_v0 }
  0x32   : > { %234 = vst.msk [vmem:[#allocation2 + $0x40] sm:$0x3] %vm227_vm1, %v5569_v0 }
  0x33   : > { %237 = vst.msk [vmem:[#allocation2 + $0x58] sm:$0x3] %vm227_vm1, %v5569_v0 }
  0x34   : > { %240 = vst.msk [vmem:[#allocation2 + $0x70] sm:$0x3] %vm227_vm1, %v5569_v0 }
  0x35   : > { %243 = vst.msk [vmem:[#allocation2 + $0x88] sm:$0x3] %vm227_vm1, %v5569_v0 }
  0x36   : > { %246 = vst.msk [vmem:[#allocation2 + $0xa0] sm:$0x3] %vm227_vm1, %v5569_v0 }
  0x37   : > { %v443_v5 = vld [vmem:[#allocation2 + $0x9] sm:$0xff]  ;;  %249 = vst.msk [vmem:[#allocation2 + $0xb8] sm:$0x3] %vm227_vm1, %v5569_v0 }
  0x38   : > { %v668_v6 = vld [vmem:[#allocation2 + $0xa] sm:$0xff]  ;;  %v475_v7 = vpack.c.bf16 %v443_v5, %v443_v5  ;;  %252 = vst.msk [vmem:[#allocation2 + $0xd0] sm:$0x3] %vm227_vm1, %v5569_v0 }
  0x39   : > { %v700_v8 = vpack.c.bf16 %v668_v6, %v668_v6  ;;  %255 = vst.msk [vmem:[#allocation2 + $0xe8] sm:$0x3] %vm227_vm1, %v5569_v0 }
  0x3a   : > { %540 = vrot.lane.b32.xlu0 %v475_v7, %s5570_s20  ;;  %258 = vst.msk [vmem:[#allocation2 + $0x100] sm:$0x3] %vm227_vm1, %v5569_v0  ;;  %v5458_v7 = vld [vmem:[%s7921_s1 + $0x18] sm:$0xff] }
  0x3b   : > { %765 = vrot.lane.b32.xlu1 %v700_v8, %s5571_s21  ;;  %261 = vst.msk [vmem:[#allocation2 + $0x118] sm:$0x3] %vm227_vm1, %v5569_v0  ;;  %v346_v8 = vld [vmem:[#allocation2 + $0x8] sm:$0xff]  ;;  %2486 = vmatpush.bf16.msra.mxu0 %v5458_v7 }
  0x3c   : > { %264 = vst.msk [vmem:[#allocation2 + $0x130] sm:$0x3] %vm227_vm1, %v5569_v0 }
  0x3d   : > { %267 = vst.msk [vmem:[#allocation2 + $0x148] sm:$0x3] %vm227_vm1, %v5569_v0 }
  0x3e   : > { %270 = vst.msk [vmem:[#allocation2 + $0x160] sm:$0x3] %vm227_vm1, %v5569_v0 }
  0x3f   : > { %273 = vst.msk [vmem:[#allocation2 + $0x178] sm:$0x3] %vm227_vm1, %v5569_v0 }
  0x40   : > { %276 = vst.msk [vmem:[#allocation2 + $0x190] sm:$0x3] %vm227_vm1, %v5569_v0 }
  0x41   : > { %279 = vst.msk [vmem:[#allocation2 + $0x1a8] sm:$0x3] %vm227_vm1, %v5569_v0 }
  0x42   : > { %313 = vst.msk [vmem:[#allocation2 + $0x19] sm:$0xff] %vm224_vm0, %v280_v9  ;;  %v378_v9 = vpack.c.bf16 %v346_v8, %v346_v8 }
  0x43   : > { %314 = vst.msk [vmem:[#allocation2 + $0x21] sm:$0xff] %vm224_vm0, %v281_v10  ;;  %v5469_v10 = vld [vmem:[%s7921_s1 + $0x70] sm:$0xff] }
  0x44   : > { %315 = vst.msk [vmem:[#allocation2 + $0x31] sm:$0xff] %vm224_vm0, %v282_v11  ;;  %v5457_v11 = vld [vmem:[%s7921_s1 + $0x10] sm:$0xff]  ;;  %2572 = vmatpush.bf16.msra.mxu1 %v5469_v10 }
  0x45   : > { %316 = vst.msk [vmem:[#allocation2 + $0x39] sm:$0xff] %vm224_vm0, %v283_v12  ;;  %v5468_v12 = vld [vmem:[%s7921_s1 + $0x68] sm:$0xff]  ;;  %2487 = vmatpush.bf16.msra.mxu0 %v5457_v11 }
  0x46   : > { %317 = vst.msk [vmem:[#allocation2 + $0x49] sm:$0xff] %vm224_vm0, %v284_v25  ;;  %v5465_v25 = vld [vmem:[%s7921_s1 + $0x50] sm:$0xff] }
  0x47   : > { %318 = vst.msk [vmem:[#allocation2 + $0x51] sm:$0xff] %vm224_vm0, %v285_v26  ;;  %v5472_v26 = vld [vmem:[%s7921_s1 + $0x88] sm:$0xff] }
  0x48   : > { %319 = vst.msk [vmem:[#allocation2 + $0x61] sm:$0xff] %vm224_vm0, %v286_v42  ;;  %2573 = vmatpush.bf16.msra.mxu1 %v5468_v12  ;;  %2666 = vmatpush.bf16.msra.mxu2 %v5472_v26 }
  0x49   : > { %v892_v13 = vld [vmem:[#allocation2 + $0x18] sm:$0xff]  ;;  %320 = vst.msk [vmem:[#allocation2 + $0x69] sm:$0xff] %vm224_vm0, %v287_v43  ;;  %v291_v43 = vld [vmem:[%s5726_s25 + $0x58] sm:$0xff] }
  0x4a   : > { %v1213_v14 = vld [vmem:[#allocation2 + $0x1a] sm:$0xff]  ;;  %v1214_v15 = vld [vmem:[#allocation2 + $0x22] sm:$0xff]  ;;  %v5746_v16 = vpack.c.bf16 %v892_v13, %v892_v13  ;;  %321 = vst.msk [vmem:[#allocation2 + $0x79] sm:$0xff] %vm224_vm0, %v288_v59 }
  0x4b   : > { %v444_v17 = vld [vmem:[#allocation2 + $0x19] sm:$0xff]  ;;  %v1245_v18 = vpack.c.bf16 %v1213_v14, %v1213_v14  ;;  %v1246_v19 = vpack.c.bf16 %v1214_v15, %v1214_v15  ;;  %v445_v20 = vld [vmem:[#allocation2 + $0x21] sm:$0xff]  ;;  %v1662_v22 = vld [vmem:[#allocation2 + $0x31] sm:$0xff]  ;;  %322 = vst.msk [vmem:[#allocation2 + $0x81] sm:$0xff] %vm224_vm0, %v289_v60 }
  0x4c   : > { %v893_v21 = vld [vmem:[#allocation2 + $0x20] sm:$0xff]  ;;  %3269 = vst.msk [vmem:[#allocation2 + $0x18] sm:$0xff] %vm224_vm0, %v5569_v0  ;;  %988 = vrot.lane.b32.xlu2 %v5746_v16, %s5572_s26  ;;  %v894_v23 = vld [vmem:[#allocation2 + $0x30] sm:$0xff]  ;;  %v1439_v27 = vld [vmem:[#allocation2 + $0x38] sm:$0xff]  ;;  %v5768_v31 = vpack.c.bf16 %v1662_v22, %v1662_v22  ;;  %v5778_v33 = vpack.c.bf16 %v444_v17, %v444_v17  ;;  %v5780_v34 = vpack.c.bf16 %v445_v20, %v445_v20 }
  0x4d   : > { %v1215_v24 = vld [vmem:[#allocation2 + $0x32] sm:$0xff]  ;;  %3270 = vst.msk [vmem:[#allocation2 + $0x20] sm:$0x3] %vm227_vm1, %v5569_v0  ;;  %1309 = vrot.lane.b32.xlu0 %v1245_v18, %s5570_s20  ;;  %1311 = vrot.lane.b32.xlu1 %v1246_v19, %s5570_s20  ;;  %v5762_v29 = vpack.c.bf16 %v893_v21, %v893_v21  ;;  %v5766_v30 = vpack.c.bf16 %v1439_v27, %v1439_v27  ;;  %v1664_v36 = vld [vmem:[#allocation2 + $0x49] sm:$0xff]  ;;  %v1216_v39 = vld [vmem:[#allocation2 + $0x3a] sm:$0xff] }
  0x4e   : > { %3271 = vst.msk [vmem:[#allocation2 + $0x30] sm:$0xff] %vm224_vm0, %v5569_v0  ;;  %v1663_v28 = vld [vmem:[#allocation2 + $0x39] sm:$0xff]  ;;  %v5776_v32 = vpack.c.bf16 %v894_v23, %v894_v23  ;;  %v896_v37 = vld [vmem:[#allocation2 + $0x48] sm:$0xff]  ;;  %v5797_v40 = vpack.c.bf16 %v1215_v24, %v1215_v24  ;;  %v5799_v41 = vpack.c.bf16 %v1216_v39, %v1216_v39  ;;  %v1441_v44 = vld [vmem:[#allocation2 + $0x50] sm:$0xff]  ;;  %v5814_v47 = vpack.c.bf16 %v1664_v36, %v1664_v36 }
  0x4f   : > { %3272 = vst.msk [vmem:[#allocation2 + $0x38] sm:$0x3] %vm227_vm1, %v5569_v0  ;;  %v5788_v35 = vpack.c.bf16 %v1663_v28, %v1663_v28  ;;  %v1217_v38 = vld [vmem:[#allocation2 + $0x4a] sm:$0xff]  ;;  %v5812_v46 = vpack.c.bf16 %v1441_v44, %v1441_v44  ;;  %v5822_v48 = vpack.c.bf16 %v896_v37, %v896_v37  ;;  %v1666_v51 = vld [vmem:[#allocation2 + $0x61] sm:$0xff]  ;;  %v1218_v55 = vld [vmem:[#allocation2 + $0x52] sm:$0xff] }
  0x50   : > { %3273 = vst.msk [vmem:[#allocation2 + $0x48] sm:$0xff] %vm224_vm0, %v5569_v0  ;;  %v1665_v45 = vld [vmem:[#allocation2 + $0x51] sm:$0xff]  ;;  %v898_v52 = vld [vmem:[#allocation2 + $0x60] sm:$0xff]  ;;  %v5851_v57 = vpack.c.bf16 %v1217_v38, %v1217_v38  ;;  %v5853_v58 = vpack.c.bf16 %v1218_v55, %v1218_v55  ;;  %v1443_v1 = vld [vmem:[#allocation2 + $0x68] sm:$0xff]  ;;  %v5879_v6 = vpack.c.bf16 %v1666_v51, %v1666_v51 }
  0x51   : > { %3274 = vst.msk [vmem:[#allocation2 + $0x50] sm:$0x3] %vm227_vm1, %v5569_v0  ;;  %v5833_v50 = vpack.c.bf16 %v1665_v45, %v1665_v45  ;;  %v5844_v54 = vld [vmem:[#allocation2 + $0x62] sm:$0xff]  ;;  %v5877_v5 = vpack.c.bf16 %v1443_v1, %v1443_v1  ;;  %v930_v13 = vpack.c.bf16 %v898_v52, %v898_v52  ;;  %v1220_v15 = vld [vmem:[#allocation2 + $0x6a] sm:$0xff]  ;;  %v5467_v17 = vld [vmem:[%s7921_s1 + $0x60] sm:$0xff] }
  0x52   : > { %3275 = vst.msk [vmem:[#allocation2 + $0x60] sm:$0xff] %vm224_vm0, %v5569_v0  ;;  %v5456_v14 = vld [vmem:[%s7921_s1 + $0x8] sm:$0xff]  ;;  %2574 = vmatpush.bf16.msra.mxu1 %v5467_v17  ;;  %v5455_v21 = vld [vmem:[%s7921_s1] sm:$0xff]  ;;  %v5466_v22 = vld [vmem:[%s7921_s1 + $0x58] sm:$0xff] }
  0x53   : > { %3267 = vst.msk [vmem:[#allocation2] sm:$0xff] %vm224_vm0, %v5569_v0  ;;  %2488 = vmatpush.bf16.msra.mxu0 %v5456_v14  ;;  %v1668_v24 = vld [vmem:[#allocation2 + $0x79] sm:$0xff]  ;;  %v1669_v44 = vld [vmem:[#allocation2 + $0x81] sm:$0xff] }
  0x54   : > { %990 = vrot.lane.b32.xlu2 %v5762_v29, %s5572_s26  ;;  %1181 = vst.msk [vmem:[#allocation3 + $0x4] sm:$0xf] %vm409_vm2, %v5778_v33  ;;  %v5979_v28 = vpack.c.bf16 %v1668_v24, %v1668_v24  ;;  %v1221_v36 = vld [vmem:[#allocation2 + $0x7a] sm:$0xff] }
  0x55   : > { %1536 = vrot.lane.b32.xlu0 %v5766_v30, %s5571_s21  ;;  %1758 = vrot.lane.b32.xlu1 %v5768_v31, %s5572_s26  ;;  %410 = vst.msk [vmem:[#allocation3] sm:$0xf] %vm409_vm2, %v377_v63  ;;  %v5463_v45 = vld [vmem:[%s7921_s1 + $0x40] sm:$0xff] }
  0x56   : > { %1182 = vst.msk [vmem:[#allocation3 + $0x10] sm:$0xf] %vm409_vm2, %v5780_v34  ;;  %2575 = vmatpush.bf16.msra.mxu1 %v5466_v22 }
  0x57   : > { %1950 = vst.msk [vmem:[#allocation3 + $0x8] sm:$0xf] %vm409_vm2, %v5797_v40  ;;  %2489 = vmatpush.bf16.msra.mxu0 %v5455_v21 }
  0x58   : > { %1951 = vst.msk [vmem:[#allocation3 + $0x14] sm:$0xf] %vm409_vm2, %v5799_v41 }
  0x59   : > { %3268 = vst.msk [vmem:[#allocation2 + $0x8] sm:$0x3] %vm227_vm1, %v5569_v0 }
  0x5a   : > { %412 = vst.msk [vmem:[#allocation3 + $0x18] sm:$0xf] %vm409_vm2, %v5746_v16  ;;  %v1667_v16 = vld [vmem:[#allocation2 + $0x69] sm:$0xff]  ;;  %v3295_v27 = vld [vmem:[#allocation2] sm:$0xff]  ;;  %2576 = vmatpush.bf16.msra.mxu1 %v5465_v25 }
  0x5b   : > { %411 = vst.msk [vmem:[#allocation3 + $0xc] sm:$0xf] %vm409_vm2, %v378_v9  ;;  %v5944_v20 = vpack.c.bf16 %v1667_v16, %v1667_v16 }
  0x5c   : > { %1534 = vrot.lane.b32.xlu2 %v5776_v32, %s5571_s21  ;;  %413 = vst.msk [vmem:[#allocation3 + $0x24] sm:$0xf] %vm409_vm2, %v5762_v29  ;;  %v5464_v29 = vld [vmem:[%s7921_s1 + $0x48] sm:$0xff] }
  0x5d   : > { %542 = vrot.lane.b32.xlu0 %v5778_v33, %s5570_s20  ;;  %544 = vrot.lane.b32.xlu1 %v5780_v34, %s5570_s20  ;;  %1183 = vst.msk [vmem:[#allocation3 + $0x1c] sm:$0xf] %vm409_vm2, %v5768_v31  ;;  %v1445_v33 = vld [vmem:[#allocation2 + $0x80] sm:$0xff] }
  0x5e   : > { %1184 = vst.msk [vmem:[#allocation3 + $0x28] sm:$0xf] %vm409_vm2, %v5788_v35  ;;  %v4847_v37 = vld [vmem:[#allocation3 + $0x8] sm:$0xf]  ;;  %2577 = vmatpush.bf16.msra.mxu1 %v5464_v29 }
  0x5f   : > { %1952 = vst.msk [vmem:[#allocation3 + $0x20] sm:$0xf] %vm409_vm2, %v5851_v57  ;;  %v5409_v38 = vld [vmem:[#allocation3 + $0x10] sm:$0xf0] }
  0x60   : > { %1953 = vst.msk [vmem:[#allocation3 + $0x2c] sm:$0xf] %vm409_vm2, %v5853_v58  ;;  %v4848_v42 = vor.u32 %v5409_v38, %v4847_v37 }
  0x61   : > { %414 = vst.msk [vmem:[#allocation3 + $0x30] sm:$0xf] %vm409_vm2, %v5776_v32 }
  0x62   : > { %415 = vst.msk [vmem:[#allocation3 + $0x3c] sm:$0xf] %vm409_vm2, %v5766_v30  ;;  %2578 = vmatpush.bf16.msra.mxu1 %v5463_v45 }
  0x63   : > { %1185 = vst.msk [vmem:[#allocation3 + $0x34] sm:$0xf] %vm409_vm2, %v5814_v47 }
  0x64   : > { %1760 = vrot.lane.b32.xlu2 %v5788_v35, %s5572_s26  ;;  %1186 = vst.msk [vmem:[#allocation3 + $0x40] sm:$0xf] %vm409_vm2, %v5833_v50 }
  0x65   : > { %769 = vrot.lane.b32.xlu0 %v1246_v19, %s5571_s21  ;;  %992 = vrot.lane.b32.xlu1 %v5776_v32, %s5572_s26  ;;  %v5942_v19 = vpack.c.bf16 %v1220_v15, %v1220_v15  ;;  %416 = vst.msk [vmem:[#allocation3 + $0x48] sm:$0xf] %vm409_vm2, %v5822_v48  ;;  %v290_v32 = vld [vmem:[%s5726_s25 + $0x50] sm:$0xff] }
  0x66   : > { %417 = vst.msk [vmem:[#allocation3 + $0x54] sm:$0xf] %vm409_vm2, %v5812_v46  ;;  %v4859_v10 = vld [vmem:[#allocation3 + $0x20] sm:$0xf] }
  0x67   : > { %1955 = vst.msk [vmem:[#allocation3 + $0x44] sm:$0xf] %vm409_vm2, %v5942_v19  ;;  %v5412_v11 = vld [vmem:[#allocation3 + $0x28] sm:$0xf0] }
  0x68   : > { %1187 = vst.msk [vmem:[#allocation3 + $0x4c] sm:$0xf] %vm409_vm2, %v5879_v6  ;;  %v4860_v14 = vor.u32 %v5412_v11, %v4859_v10 }
  0x69   : > { %1188 = vst.msk [vmem:[#allocation3 + $0x58] sm:$0xf] %vm409_vm2, %v5944_v20 }
  0x6a   : > { %418 = vst.msk [vmem:[#allocation3 + $0x60] sm:$0xf] %vm409_vm2, %v930_v13 }
  0x6b   : > { %419 = vst.msk [vmem:[#allocation3 + $0x6c] sm:$0xf] %vm409_vm2, %v5877_v5 }
  0x6c   : > { %767 = vrot.lane.b32.xlu2 %v1245_v18, %s5571_s21  ;;  %v5938_v18 = vpack.c.bf16 %v5844_v54, %v5844_v54  ;;  %3276 = vst.msk [vmem:[#allocation2 + $0x68] sm:$0x3] %vm227_vm1, %v5569_v0 }
  0x6d   : > { %1313 = vrot.lane.b32.xlu0 %v5797_v40, %s5570_s20  ;;  %1315 = vrot.lane.b32.xlu1 %v5799_v41, %s5570_s20  ;;  %1189 = vst.msk [vmem:[#allocation3 + $0x64] sm:$0xf] %vm409_vm2, %v5979_v28 }
  0x6e   : > { %1954 = vst.msk [vmem:[#allocation3 + $0x38] sm:$0xf] %vm409_vm2, %v5938_v18 }
  0x6f   : > { %323 = vst.msk [vmem:[#allocation2 + $0x91] sm:$0xff] %vm224_vm0, %v290_v32 }
  0x70   : > { %324 = vst.msk [vmem:[#allocation2 + $0x99] sm:$0xff] %vm224_vm0, %v291_v43 }
  0x74   : > { %994 = vrot.lane.b32.xlu2 %v5766_v30, %s5572_s26  ;;  %v5471_v30 = vld [vmem:[%s7921_s1 + $0x80] sm:$0xff] }
  0x75   : > { %1540 = vrot.lane.b32.xlu0 %v5812_v46, %s5571_s21  ;;  %1762 = vrot.lane.b32.xlu1 %v5814_v47, %s5572_s26  ;;  %v4871_v45 = vld [vmem:[#allocation3 + $0x38] sm:$0xf] }
  0x76   : > { %2667 = vmatpush.bf16.msra.mxu2 %v5471_v30  ;;  %v1670_v52 = vld [vmem:[#allocation2 + $0x91] sm:$0xff] }
  0x77   : > { %v6031_v53 = vpack.c.bf16 %v1670_v52, %v1670_v52  ;;  %v1223_v4 = vld [vmem:[#allocation2 + $0x92] sm:$0xff]  ;;  %v1224_v8 = vld [vmem:[#allocation2 + $0x9a] sm:$0xff] }
  0x78   : > { %v6068_v7 = vpack.c.bf16 %v1223_v4, %v1223_v4  ;;  %v6075_v9 = vpack.c.bf16 %v1224_v8, %v1224_v8 }
  0x79   : > { %5101 = vmatmul.msk.bf16.vlgmr.msra.gmra.mxu2 %vm224_vm0, %v4848_v42  ;;  %1191 = vst.msk [vmem:[#allocation3 + $0x7c] sm:$0xf] %vm409_vm2, %v6031_v53 }
  0x7a   : > { %1958 = vst.msk [vmem:[#allocation3 + $0x68] sm:$0xf] %vm409_vm2, %v6068_v7 }
  0x7b   : > { %1959 = vst.msk [vmem:[#allocation3 + $0x74] sm:$0xf] %vm409_vm2, %v6075_v9 }
  0x7c   : > { %1538 = vrot.lane.b32.xlu2 %v5822_v48, %s5571_s21 }
  0x7d   : > { %546 = vrot.lane.b32.xlu0 %v5768_v31, %s5570_s20  ;;  %548 = vrot.lane.b32.xlu1 %v5788_v35, %s5570_s20  ;;  %v3303_v31 = vpack.c.bf16 %v3295_v27, %v3295_v27 }
  0x84   : > { %1764 = vrot.lane.b32.xlu2 %v5833_v50, %s5572_s26 }
  0x85   : > { %773 = vrot.lane.b32.xlu0 %v5799_v41, %s5571_s21  ;;  %996 = vrot.lane.b32.xlu1 %v5822_v48, %s5572_s26  ;;  %v1222_v41 = vld [vmem:[#allocation2 + $0x82] sm:$0xff]  ;;  %v6011_v48 = vpack.c.bf16 %v1445_v33, %v1445_v33 }
  0x86   : > { %v6013_v49 = vpack.c.bf16 %v1222_v41, %v1222_v41  ;;  %v295_v41 = vld [vmem:[%s5726_s25 + $0x78] sm:$0xff] }
  0x87   : > { %328 = vst.msk [vmem:[#allocation2 + $0xc9] sm:$0xff] %vm224_vm0, %v295_v41 }
  0x88   : > { %1957 = vst.msk [vmem:[#allocation3 + $0x5c] sm:$0xf] %vm409_vm2, %v6013_v49 }
  0x89   : > { %v539_v62 = vpop.permute.xlu0 %538  ;;  %5102 = vmatmul.msk.bf16.gmra.mxu2 %vm224_vm0, %v4860_v14 }
  0x8a   : > { %v764_v2 = vpop.permute.xlu1 %763  ;;  %635 = vst.msk [vmem:[#allocation3] sm:$0xf] %vm634_vm3, %v539_v62  ;;  %v902_v62 = vld [vmem:[#allocation2 + $0x90] sm:$0xff] }
  0x8b   : > { %860 = vst.msk [vmem:[#allocation3] sm:$0xf] %vm859_vm4, %v764_v2  ;;  %v6055_v63 = vpack.c.bf16 %v902_v62, %v902_v62 }
  0x8c   : > { %771 = vrot.lane.b32.xlu2 %v5797_v40, %s5571_s21  ;;  %3279 = vst.msk [vmem:[#allocation2 + $0x90] sm:$0xff] %vm224_vm0, %v5569_v0 }
  0x8d   : > { %1317 = vrot.lane.b32.xlu0 %v5851_v57, %s5570_s20  ;;  %1319 = vrot.lane.b32.xlu1 %v5853_v58, %s5570_s20  ;;  %422 = vst.msk [vmem:[#allocation3 + $0x90] sm:$0xf] %vm409_vm2, %v6055_v63 }
  0x8e   : > { %v1228_v14 = vld [vmem:[#allocation2 + $0xca] sm:$0xff] }
  0x94   : > { %998 = vrot.lane.b32.xlu2 %v5812_v46, %s5572_s26  ;;  %v900_v46 = vld [vmem:[#allocation2 + $0x78] sm:$0xff] }
  0x95   : > { %1544 = vrot.lane.b32.xlu0 %v5877_v5, %s5571_s21  ;;  %1766 = vrot.lane.b32.xlu1 %v5879_v6, %s5572_s26  ;;  %v932_v51 = vpack.c.bf16 %v900_v46, %v900_v46  ;;  %3277 = vst.msk [vmem:[#allocation2 + $0x78] sm:$0xff] %vm224_vm0, %v5569_v0  ;;  %v5415_v46 = vld [vmem:[#allocation3 + $0x40] sm:$0xf0] }
  0x97   : > { %420 = vst.msk [vmem:[#allocation3 + $0x78] sm:$0xf] %vm409_vm2, %v932_v51 }
  0x9c   : > { %1542 = vrot.lane.b32.xlu2 %v930_v13, %s5571_s21 }
  0x9d   : > { %550 = vrot.lane.b32.xlu0 %v5814_v47, %s5570_s20  ;;  %552 = vrot.lane.b32.xlu1 %v5833_v50, %s5570_s20  ;;  %v6009_v47 = vpack.c.bf16 %v1221_v36, %v1221_v36  ;;  %v6017_v50 = vpack.c.bf16 %v1669_v44, %v1669_v44 }
  0x9f   : > { %1956 = vst.msk [vmem:[#allocation3 + $0x50] sm:$0xf] %vm409_vm2, %v6009_v47 }
  0xa0   : > { %1190 = vst.msk [vmem:[#allocation3 + $0x70] sm:$0xf] %vm409_vm2, %v6017_v50 }
  0xa4   : > { %1768 = vrot.lane.b32.xlu2 %v5944_v20, %s5572_s26 }
  0xa5   : > { %777 = vrot.lane.b32.xlu0 %v5853_v58, %s5571_s21  ;;  %1000 = vrot.lane.b32.xlu1 %v930_v13, %s5572_s26  ;;  %v1671_v13 = vld [vmem:[#allocation2 + $0x99] sm:$0xff] }
  0xa6   : > { %v989_v23 = vpop.permute.xlu2 %988 }
  0xa7   : > { %1085 = vst.msk [vmem:[#allocation3] sm:$0xf] %vm1084_vm5, %v989_v23 }
  0xac   : > { %775 = vrot.lane.b32.xlu2 %v5851_v57, %s5571_s21  ;;  %v541_v34 = vpop.permute.xlu0 %540  ;;  %v1447_v57 = vld [vmem:[#allocation2 + $0x98] sm:$0xff] }
  0xad   : > { %v766_v35 = vpop.permute.xlu1 %765  ;;  %1321 = vrot.lane.b32.xlu0 %v5938_v18, %s5570_s20  ;;  %1323 = vrot.lane.b32.xlu1 %v5942_v19, %s5570_s20  ;;  %636 = vst.msk [vmem:[#allocation3 + $0xc] sm:$0xf] %vm634_vm3, %v541_v34  ;;  %v6038_v58 = vpack.c.bf16 %v1447_v57, %v1447_v57 }
  0xae   : > { %v4839_v39 = vld [vmem:[#allocation3] sm:$0xf]  ;;  %861 = vst.msk [vmem:[#allocation3 + $0xc] sm:$0xf] %vm859_vm4, %v766_v35  ;;  %v991_v40 = vpop.permute.xlu2 %990 }
  0xaf   : > { %3311 = vst.msk [vmem:[#allocation3] sm:$0xf] %vm409_vm2, %v3303_v31 }
  0xb0   : > { %1086 = vst.msk [vmem:[#allocation3 + $0xc] sm:$0xf] %vm1084_vm5, %v991_v40  ;;  %v294_v40 = vld [vmem:[%s5726_s25 + $0x70] sm:$0xff] }
  0xb1   : > { %423 = vst.msk [vmem:[#allocation3 + $0x9c] sm:$0xf] %vm409_vm2, %v6038_v58 }
  0xb2   : > { %3280 = vst.msk [vmem:[#allocation2 + $0x98] sm:$0x3] %vm227_vm1, %v5569_v0 }
  0xb3   : > { %327 = vst.msk [vmem:[#allocation2 + $0xc1] sm:$0xff] %vm224_vm0, %v294_v40 }
  0xb4   : > { %1002 = vrot.lane.b32.xlu2 %v5877_v5, %s5572_s26  ;;  %v292_v5 = vld [vmem:[%s5726_s25 + $0x60] sm:$0xff] }
  0xb5   : > { %1548 = vrot.lane.b32.xlu0 %v6011_v48, %s5571_s21  ;;  %1770 = vrot.lane.b32.xlu1 %v5979_v28, %s5572_s26  ;;  %325 = vst.msk [vmem:[#allocation2 + $0xa9] sm:$0xff] %vm224_vm0, %v292_v5 }
  0xb6   : > { %v1535_v54 = vpop.permute.xlu2 %1534 }
  0xb7   : > { %v5408_v55 = vld [vmem:[#allocation3 + $0x8] sm:$0xf0] }
  0xb8   : > { %v4840_v56 = vor.u32 %v5408_v55, %v4839_v39 }
  0xba   : > { %2490 = vmatmul.bf16.vlgmr.msra.gmra.mxu0 %v4840_v56  ;;  %v1674_v57 = vld [vmem:[#allocation2 + $0xc1] sm:$0xff] }
  0xbb   : > { %v1227_v11 = vld [vmem:[#allocation2 + $0xc2] sm:$0xff] }
  0xbc   : > { %1546 = vrot.lane.b32.xlu2 %v932_v51, %s5571_s21  ;;  %v1672_v21 = vld [vmem:[#allocation2 + $0xa9] sm:$0xff] }
  0xbd   : > { %554 = vrot.lane.b32.xlu0 %v5879_v6, %s5570_s20  ;;  %556 = vrot.lane.b32.xlu1 %v5944_v20, %s5570_s20  ;;  %v293_v6 = vld [vmem:[%s5726_s25 + $0x68] sm:$0xff]  ;;  %v6098_v22 = vpack.c.bf16 %v1672_v21, %v1672_v21 }
  0xbe   : > { %v1761_v59 = vpop.permute.xlu2 %1760  ;;  %326 = vst.msk [vmem:[#allocation2 + $0xb1] sm:$0xff] %vm224_vm0, %v293_v6 }
  0xbf   : > { %v1310_v60 = vpop.permute.xlu0 %1309  ;;  %v1312_v61 = vpop.permute.xlu1 %1311  ;;  %1193 = vst.msk [vmem:[#allocation3 + $0x94] sm:$0xf] %vm409_vm2, %v6098_v22 }
  0xc0   : > { %1405 = vst.msk [vmem:[#allocation3 + $0x4] sm:$0xf] %vm634_vm3, %v1310_v60 }
  0xc1   : > { %1406 = vst.msk [vmem:[#allocation3 + $0x10] sm:$0xf] %vm634_vm3, %v1312_v61 }
  0xc2   : > { %1630 = vst.msk [vmem:[#allocation3 + $0x4] sm:$0xf] %vm859_vm4, %v1535_v54 }
  0xc4   : > { %1772 = vrot.lane.b32.xlu2 %v6017_v50, %s5572_s26 }
  0xc5   : > { %781 = vrot.lane.b32.xlu0 %v5942_v19, %s5571_s21  ;;  %1004 = vrot.lane.b32.xlu1 %v932_v51, %s5572_s26  ;;  %v6085_v19 = vpack.c.bf16 %v1671_v13, %v1671_v13  ;;  %v1449_v24 = vld [vmem:[#allocation2 + $0xb0] sm:$0xff]  ;;  %v6202_v13 = vpack.c.bf16 %v1227_v11, %v1227_v11 }
  0xc6   : > { %v768_v1 = vpop.permute.xlu2 %767  ;;  %v6104_v27 = vpack.c.bf16 %v1449_v24, %v1449_v24  ;;  %v1225_v39 = vld [vmem:[#allocation2 + $0xaa] sm:$0xff]  ;;  %v1226_v43 = vld [vmem:[#allocation2 + $0xb2] sm:$0xff] }
  0xc7   : > { %v1537_v2 = vpop.permute.xlu0 %1536  ;;  %v1759_v3 = vpop.permute.xlu1 %1758  ;;  %1192 = vst.msk [vmem:[#allocation3 + $0x88] sm:$0xf] %vm409_vm2, %v6085_v19  ;;  %v6137_v42 = vpack.c.bf16 %v1225_v39, %v1225_v39  ;;  %v6144_v44 = vpack.c.bf16 %v1226_v43, %v1226_v43 }
  0xc8   : > { %1631 = vst.msk [vmem:[#allocation3 + $0x10] sm:$0xf] %vm859_vm4, %v1537_v2 }
  0xc9   : > { %1854 = vst.msk [vmem:[#allocation3 + $0x4] sm:$0xf] %vm1084_vm5, %v1759_v3 }
  0xca   : > { %1855 = vst.msk [vmem:[#allocation3 + $0x10] sm:$0xf] %vm1084_vm5, %v1761_v59  ;;  %v6167_v59 = vpack.c.bf16 %v1674_v57, %v1674_v57 }
  0xcb   : > { %425 = vst.msk [vmem:[#allocation3 + $0xb4] sm:$0xf] %vm409_vm2, %v6104_v27 }
  0xcc   : > { %779 = vrot.lane.b32.xlu2 %v5938_v18, %s5571_s21  ;;  %1960 = vst.msk [vmem:[#allocation3 + $0x80] sm:$0xf] %vm409_vm2, %v6137_v42 }
  0xcd   : > { %1325 = vrot.lane.b32.xlu0 %v6009_v47, %s5570_s20  ;;  %1327 = vrot.lane.b32.xlu1 %v6013_v49, %s5570_s20  ;;  %1961 = vst.msk [vmem:[#allocation3 + $0x8c] sm:$0xf] %vm409_vm2, %v6144_v44 }
  0xce   : > { %v995_v12 = vpop.permute.xlu2 %994  ;;  %1195 = vst.msk [vmem:[#allocation3 + $0xac] sm:$0xf] %vm409_vm2, %v6167_v59 }
  0xcf   : > { %v543_v15 = vpop.permute.xlu0 %542  ;;  %v545_v16 = vpop.permute.xlu1 %544  ;;  %1962 = vst.msk [vmem:[#allocation3 + $0x98] sm:$0xf] %vm409_vm2, %v6202_v13 }
  0xd0   : > { %637 = vst.msk [vmem:[#allocation3 + $0x18] sm:$0xf] %vm634_vm3, %v543_v15  ;;  %v5407_v17 = vld [vmem:[#allocation3 + $0x4] sm:$0xf]  ;;  %v6209_v15 = vpack.c.bf16 %v1228_v14, %v1228_v14 }
  0xd1   : > { %638 = vst.msk [vmem:[#allocation3 + $0x24] sm:$0xf] %vm634_vm3, %v545_v16  ;;  %v4841_v18 = vld [vmem:[#allocation3 + $0xc] sm:$0xf0] }
  0xd2   : > { %862 = vst.msk [vmem:[#allocation3 + $0x18] sm:$0xf] %vm859_vm4, %v768_v1  ;;  %v4844_v20 = vor.u32 %v5407_v17, %v4841_v18  ;;  %v4883_v16 = vld [vmem:[#allocation3 + $0x50] sm:$0xf]  ;;  %v5418_v17 = vld [vmem:[#allocation3 + $0x58] sm:$0xf0] }
  0xd3   : > { %v1451_v18 = vld [vmem:[#allocation2 + $0xc8] sm:$0xff]  ;;  %1963 = vst.msk [vmem:[#allocation3 + $0xa4] sm:$0xf] %vm409_vm2, %v6209_v15 }
  0xd4   : > { %2579 = vmatmul.bf16.vlgmr.msra.gmra.mxu1 %v4844_v20  ;;  %1006 = vrot.lane.b32.xlu2 %v6011_v48, %s5572_s26  ;;  %v4884_v20 = vor.u32 %v5418_v17, %v4883_v16 }
  0xd5   : > { %1552 = vrot.lane.b32.xlu0 %v6038_v58, %s5571_s21  ;;  %1774 = vrot.lane.b32.xlu1 %v6031_v53, %s5572_s26 }
  0xd6   : > { %v1539_v23 = vpop.permute.xlu2 %1538 }
  0xd7   : > { %v770_v25 = vpop.permute.xlu0 %769  ;;  %v993_v26 = vpop.permute.xlu1 %992 }
  0xd8   : > { %863 = vst.msk [vmem:[#allocation3 + $0x24] sm:$0xf] %vm859_vm4, %v770_v25 }
  0xd9   : > { %1087 = vst.msk [vmem:[#allocation3 + $0x18] sm:$0xf] %vm1084_vm5, %v993_v26  ;;  %v6219_v26 = vpack.c.bf16 %v1451_v18, %v1451_v18 }
  0xda   : > { %1088 = vst.msk [vmem:[#allocation3 + $0x24] sm:$0xf] %vm1084_vm5, %v995_v12  ;;  %v296_v12 = vld [vmem:[%s5726_s25 + $0x80] sm:$0xff] }
  0xdb   : > { %329 = vst.msk [vmem:[#allocation2 + $0xd9] sm:$0xff] %vm224_vm0, %v296_v12 }
  0xdc   : > { %1550 = vrot.lane.b32.xlu2 %v6055_v63, %s5571_s21 }
  0xdd   : > { %558 = vrot.lane.b32.xlu0 %v5979_v28, %s5570_s20  ;;  %560 = vrot.lane.b32.xlu1 %v6017_v50, %s5570_s20  ;;  %v904_v28 = vld [vmem:[#allocation2 + $0xa8] sm:$0xff] }
  0xde   : > { %v1765_v29 = vpop.permute.xlu2 %1764  ;;  %v6124_v35 = vpack.c.bf16 %v904_v28, %v904_v28  ;;  %3281 = vst.msk [vmem:[#allocation2 + $0xa8] sm:$0xff] %vm224_vm0, %v5569_v0 }
  0xdf   : > { %v1314_v30 = vpop.permute.xlu0 %1313  ;;  %v1316_v31 = vpop.permute.xlu1 %1315 }
  0xe0   : > { %1407 = vst.msk [vmem:[#allocation3 + $0x1c] sm:$0xf] %vm634_vm3, %v1314_v30  ;;  %v4851_v32 = vld [vmem:[#allocation3 + $0x18] sm:$0xf] }
  0xe1   : > { %1408 = vst.msk [vmem:[#allocation3 + $0x28] sm:$0xf] %vm634_vm3, %v1316_v31  ;;  %v5411_v33 = vld [vmem:[#allocation3 + $0x20] sm:$0xf0] }
  0xe2   : > { %1632 = vst.msk [vmem:[#allocation3 + $0x1c] sm:$0xf] %vm859_vm4, %v1539_v23  ;;  %v4852_v34 = vor.u32 %v5411_v33, %v4851_v32  ;;  %v1676_v31 = vld [vmem:[#allocation2 + $0xd9] sm:$0xff] }
  0xe3   : > { %424 = vst.msk [vmem:[#allocation3 + $0xa8] sm:$0xf] %vm409_vm2, %v6124_v35  ;;  %v6232_v32 = vpack.c.bf16 %v1676_v31, %v1676_v31  ;;  %v5424_v31 = vld [vmem:[#allocation3 + $0x88] sm:$0xf0] }
  0xe4   : > { %2495 = vmatmul.bf16.gmra.mxu0 %v4852_v34  ;;  %1776 = vrot.lane.b32.xlu2 %v6085_v19, %s5572_s26 }
  0xe5   : > { %785 = vrot.lane.b32.xlu0 %v6013_v49, %s5571_s21  ;;  %1008 = vrot.lane.b32.xlu1 %v6055_v63, %s5572_s26  ;;  %v1673_v49 = vld [vmem:[#allocation2 + $0xb1] sm:$0xff]  ;;  %1197 = vst.msk [vmem:[#allocation3 + $0xc4] sm:$0xf] %vm409_vm2, %v6232_v32 }
  0xe6   : > { %v772_v36 = vpop.permute.xlu2 %771  ;;  %v6154_v55 = vpack.c.bf16 %v1673_v49, %v1673_v49  ;;  %3282 = vst.msk [vmem:[#allocation2 + $0xb0] sm:$0x3] %vm227_vm1, %v5569_v0 }
  0xe7   : > { %v1541_v37 = vpop.permute.xlu0 %1540  ;;  %v1763_v38 = vpop.permute.xlu1 %1762 }
  0xe8   : > { %1633 = vst.msk [vmem:[#allocation3 + $0x28] sm:$0xf] %vm859_vm4, %v1541_v37 }
  0xe9   : > { %1856 = vst.msk [vmem:[#allocation3 + $0x1c] sm:$0xf] %vm1084_vm5, %v1763_v38 }
  0xea   : > { %1857 = vst.msk [vmem:[#allocation3 + $0x28] sm:$0xf] %vm1084_vm5, %v1765_v29 }
  0xeb   : > { %1194 = vst.msk [vmem:[#allocation3 + $0xa0] sm:$0xf] %vm409_vm2, %v6154_v55 }
  0xec   : > { %783 = vrot.lane.b32.xlu2 %v6009_v47, %s5571_s21  ;;  %v4872_v47 = vor.u32 %v5415_v46, %v4871_v45 }
  0xed   : > { %1329 = vrot.lane.b32.xlu0 %v6068_v7, %s5570_s20  ;;  %1331 = vrot.lane.b32.xlu1 %v6075_v9, %s5570_s20 }
  0xee   : > { %v999_v48 = vpop.permute.xlu2 %998  ;;  %5103 = vmatmul.msk.bf16.gmra.mxu2 %vm224_vm0, %v4872_v47  ;;  %v4895_v47 = vld [vmem:[#allocation3 + $0x68] sm:$0xf] }
  0xef   : > { %v547_v50 = vpop.permute.xlu0 %546  ;;  %v549_v51 = vpop.permute.xlu1 %548 }
  0xf0   : > { %639 = vst.msk [vmem:[#allocation3 + $0x30] sm:$0xf] %vm634_vm3, %v547_v50  ;;  %v5410_v52 = vld [vmem:[#allocation3 + $0x1c] sm:$0xf]  ;;  %v5421_v50 = vld [vmem:[#allocation3 + $0x70] sm:$0xf0] }
  0xf1   : > { %640 = vst.msk [vmem:[#allocation3 + $0x3c] sm:$0xf] %vm634_vm3, %v549_v51  ;;  %v4853_v54 = vld [vmem:[#allocation3 + $0x24] sm:$0xf0] }
  0xf2   : > { %864 = vst.msk [vmem:[#allocation3 + $0x30] sm:$0xf] %vm859_vm4, %v772_v36  ;;  %v4856_v56 = vor.u32 %v5410_v52, %v4853_v54  ;;  %v4896_v54 = vor.u32 %v5421_v50, %v4895_v47 }
  0xf4   : > { %2584 = vmatmul.bf16.gmra.mxu1 %v4856_v56  ;;  %1010 = vrot.lane.b32.xlu2 %v6038_v58, %s5572_s26 }
  0xf5   : > { %1556 = vrot.lane.b32.xlu0 %v6104_v27, %s5571_s21  ;;  %1778 = vrot.lane.b32.xlu1 %v6098_v22, %s5572_s26 }
  0xf6   : > { %v1543_v60 = vpop.permute.xlu2 %1542 }
  0xf7   : > { %v774_v61 = vpop.permute.xlu0 %773  ;;  %v997_v62 = vpop.permute.xlu1 %996 }
  0xf8   : > { %865 = vst.msk [vmem:[#allocation3 + $0x3c] sm:$0xf] %vm859_vm4, %v774_v61 }
  0xf9   : > { %1089 = vst.msk [vmem:[#allocation3 + $0x30] sm:$0xf] %vm1084_vm5, %v997_v62 }
  0xfa   : > { %1090 = vst.msk [vmem:[#allocation3 + $0x3c] sm:$0xf] %vm1084_vm5, %v999_v48  ;;  %v298_v48 = vld [vmem:[%s5726_s25 + $0x90] sm:$0xff] }
  0xfb   : > { %331 = vst.msk [vmem:[#allocation2 + $0xf1] sm:$0xff] %vm224_vm0, %v298_v48 }
  0xfc   : > { %1554 = vrot.lane.b32.xlu2 %v6124_v35, %s5571_s21 }
  0xfd   : > { %562 = vrot.lane.b32.xlu0 %v6031_v53, %s5570_s20  ;;  %564 = vrot.lane.b32.xlu1 %v6085_v19, %s5570_s20  ;;  %v906_v53 = vld [vmem:[#allocation2 + $0xc0] sm:$0xff] }
  0xfe   : > { %v1769_v58 = vpop.permute.xlu2 %1768  ;;  %v6189_v5 = vpack.c.bf16 %v906_v53, %v906_v53  ;;  %3283 = vst.msk [vmem:[#allocation2 + $0xc0] sm:$0xff] %vm224_vm0, %v5569_v0  ;;  %5104 = vmatmul.msk.bf16.gmra.mxu2 %vm224_vm0, %v4884_v20 }
  0xff   : > { %v1318_v63 = vpop.permute.xlu0 %1317  ;;  %v1320_v1 = vpop.permute.xlu1 %1319 }
 0x100   : > { %1409 = vst.msk [vmem:[#allocation3 + $0x34] sm:$0xf] %vm634_vm3, %v1318_v63  ;;  %v4863_v2 = vld [vmem:[#allocation3 + $0x30] sm:$0xf] }
 0x101   : > { %1410 = vst.msk [vmem:[#allocation3 + $0x40] sm:$0xf] %vm634_vm3, %v1320_v1  ;;  %v5414_v3 = vld [vmem:[#allocation3 + $0x38] sm:$0xf0] }
 0x102   : > { %1634 = vst.msk [vmem:[#allocation3 + $0x34] sm:$0xf] %vm859_vm4, %v1543_v60  ;;  %v4864_v4 = vor.u32 %v5414_v3, %v4863_v2 }
 0x103   : > { %426 = vst.msk [vmem:[#allocation3 + $0xc0] sm:$0xf] %vm409_vm2, %v6189_v5 }
 0x104   : > { %2500 = vmatmul.bf16.gmra.mxu0 %v4864_v4  ;;  %1780 = vrot.lane.b32.xlu2 %v6154_v55, %s5572_s26  ;;  %v1678_v4 = vld [vmem:[#allocation2 + $0xf1] sm:$0xff] }
 0x105   : > { %789 = vrot.lane.b32.xlu0 %v6075_v9, %s5571_s21  ;;  %1012 = vrot.lane.b32.xlu1 %v6124_v35, %s5572_s26  ;;  %v297_v9 = vld [vmem:[%s5726_s25 + $0x88] sm:$0xff]  ;;  %v6298_v53 = vpack.c.bf16 %v1678_v4, %v1678_v4  ;;  %v302_v4 = vld [vmem:[%s5726_s25 + $0xb0] sm:$0xff] }
 0x106   : > { %v776_v6 = vpop.permute.xlu2 %775  ;;  %330 = vst.msk [vmem:[#allocation2 + $0xe1] sm:$0xff] %vm224_vm0, %v297_v9 }
 0x107   : > { %v1545_v8 = vpop.permute.xlu0 %1544  ;;  %v1767_v10 = vpop.permute.xlu1 %1766  ;;  %1199 = vst.msk [vmem:[#allocation3 + $0xdc] sm:$0xf] %vm409_vm2, %v6298_v53 }
 0x108   : > { %1635 = vst.msk [vmem:[#allocation3 + $0x40] sm:$0xf] %vm859_vm4, %v1545_v8 }
 0x109   : > { %1858 = vst.msk [vmem:[#allocation3 + $0x34] sm:$0xf] %vm1084_vm5, %v1767_v10 }
 0x10a   : > { %1859 = vst.msk [vmem:[#allocation3 + $0x40] sm:$0xf] %vm1084_vm5, %v1769_v58 }
 0x10b   : > { %335 = vst.msk [vmem:[#allocation2 + $0x121] sm:$0xff] %vm224_vm0, %v302_v4 }
 0x10c   : > { %787 = vrot.lane.b32.xlu2 %v6068_v7, %s5571_s21  ;;  %v1675_v7 = vld [vmem:[#allocation2 + $0xc9] sm:$0xff] }
 0x10d   : > { %1333 = vrot.lane.b32.xlu0 %v6137_v42, %s5570_s20  ;;  %1335 = vrot.lane.b32.xlu1 %v6144_v44, %s5570_s20  ;;  %v6221_v29 = vpack.c.bf16 %v1675_v7, %v1675_v7  ;;  %v1229_v46 = vld [vmem:[#allocation2 + $0xda] sm:$0xff]  ;;  %v1230_v57 = vld [vmem:[#allocation2 + $0xe2] sm:$0xff] }
 0x10e   : > { %v1003_v19 = vpop.permute.xlu2 %1002  ;;  %v6267_v49 = vpack.c.bf16 %v1229_v46, %v1229_v46  ;;  %v1453_v51 = vld [vmem:[#allocation2 + $0xe0] sm:$0xff]  ;;  %5105 = vmatmul.msk.bf16.gmra.mxu2 %vm224_vm0, %v4896_v54  ;;  %v6285_v2 = vpack.c.bf16 %v1230_v57, %v1230_v57 }
 0x10f   : > { %v551_v21 = vpop.permute.xlu0 %550  ;;  %v553_v23 = vpop.permute.xlu1 %552  ;;  %1196 = vst.msk [vmem:[#allocation3 + $0xb8] sm:$0xf] %vm409_vm2, %v6221_v29  ;;  %v1677_v62 = vld [vmem:[#allocation2 + $0xe1] sm:$0xff]  ;;  %v6282_v63 = vpack.c.bf16 %v1453_v51, %v1453_v51 }
 0x110   : > { %641 = vst.msk [vmem:[#allocation3 + $0x48] sm:$0xf] %vm634_vm3, %v551_v21  ;;  %v5413_v24 = vld [vmem:[#allocation3 + $0x34] sm:$0xf]  ;;  %v6287_v3 = vpack.c.bf16 %v1677_v62, %v1677_v62  ;;  %v300_v21 = vld [vmem:[%s5726_s25 + $0xa0] sm:$0xff] }
 0x111   : > { %642 = vst.msk [vmem:[#allocation3 + $0x54] sm:$0xf] %vm634_vm3, %v553_v23  ;;  %v4865_v25 = vld [vmem:[#allocation3 + $0x3c] sm:$0xf0]  ;;  %v6334_v23 = vld [vmem:[%s7922_s2] ss:$0 sm:$0xff] }
 0x112   : > { %866 = vst.msk [vmem:[#allocation3 + $0x48] sm:$0xf] %vm859_vm4, %v776_v6  ;;  %v4868_v30 = vor.u32 %v5413_v24, %v4865_v25 }
 0x113   : > { %1964 = vst.msk [vmem:[#allocation3 + $0xb0] sm:$0xf] %vm409_vm2, %v6267_v49 }
 0x114   : > { %2589 = vmatmul.bf16.gmra.mxu1 %v4868_v30  ;;  %1014 = vrot.lane.b32.xlu2 %v6104_v27, %s5572_s26  ;;  %1965 = vst.msk [vmem:[#allocation3 + $0xbc] sm:$0xf] %vm409_vm2, %v6285_v2  ;;  %v4907_v30 = vld [vmem:[#allocation3 + $0x80] sm:$0xf] }
 0x115   : > { %1560 = vrot.lane.b32.xlu0 %v6219_v26, %s5571_s21  ;;  %1782 = vrot.lane.b32.xlu1 %v6167_v59, %s5572_s26  ;;  %1198 = vst.msk [vmem:[#allocation3 + $0xd0] sm:$0xf] %vm409_vm2, %v6287_v3 }
 0x116   : > { %v1547_v33 = vpop.permute.xlu2 %1546  ;;  %333 = vst.msk [vmem:[#allocation2 + $0x109] sm:$0xff] %vm224_vm0, %v300_v21 }
 0x117   : > { %v778_v34 = vpop.permute.xlu0 %777  ;;  %v1001_v28 = vpop.permute.xlu1 %1000 }
 0x118   : > { %867 = vst.msk [vmem:[#allocation3 + $0x54] sm:$0xf] %vm859_vm4, %v778_v34 }
 0x119   : > { %1091 = vst.msk [vmem:[#allocation3 + $0x48] sm:$0xf] %vm1084_vm5, %v1001_v28  ;;  %v4908_v28 = vor.u32 %v5424_v31, %v4907_v30 }
 0x11a   : > { %1092 = vst.msk [vmem:[#allocation3 + $0x54] sm:$0xf] %vm1084_vm5, %v1003_v19 }
 0x11c   : > { %1558 = vrot.lane.b32.xlu2 %v6189_v5, %s5571_s21 }
 0x11d   : > { %566 = vrot.lane.b32.xlu0 %v6098_v22, %s5570_s20  ;;  %568 = vrot.lane.b32.xlu1 %v6154_v55, %s5570_s20  ;;  %v908_v22 = vld [vmem:[#allocation2 + $0xd8] sm:$0xff]  ;;  %v356_v55 = vld [vmem:[#allocation2 + $0x80] sm:$0xff]  ;;  %v1680_v48 = vld [vmem:[#allocation2 + $0x109] sm:$0xff] }
 0x11e   : > { %v1773_v27 = vpop.permute.xlu2 %1772  ;;  %v6254_v40 = vpack.c.bf16 %v908_v22, %v908_v22  ;;  %3285 = vst.msk [vmem:[#allocation2 + $0xd8] sm:$0xff] %vm224_vm0, %v5569_v0  ;;  %v388_v60 = vpack.c.bf16 %v356_v55, %v356_v55  ;;  %5106 = vmatmul.msk.bf16.gmra.mxu2 %vm224_vm0, %v4908_v28 }
 0x11f   : > { %v1322_v35 = vpop.permute.xlu0 %1321  ;;  %v1324_v36 = vpop.permute.xlu1 %1323  ;;  %3278 = vst.msk [vmem:[#allocation2 + $0x80] sm:$0x3] %vm227_vm1, %v5569_v0 }
 0x120   : > { %1411 = vst.msk [vmem:[#allocation3 + $0x4c] sm:$0xf] %vm634_vm3, %v1322_v35  ;;  %v4875_v37 = vld [vmem:[#allocation3 + $0x48] sm:$0xf] }
 0x121   : > { %1412 = vst.msk [vmem:[#allocation3 + $0x58] sm:$0xf] %vm634_vm3, %v1324_v36  ;;  %v5417_v38 = vld [vmem:[#allocation3 + $0x50] sm:$0xf0] }
 0x122   : > { %1636 = vst.msk [vmem:[#allocation3 + $0x4c] sm:$0xf] %vm859_vm4, %v1547_v33  ;;  %v4876_v39 = vor.u32 %v5417_v38, %v4875_v37 }
 0x123   : > { %428 = vst.msk [vmem:[#allocation3 + $0xd8] sm:$0xf] %vm409_vm2, %v6254_v40 }
 0x124   : > { %2505 = vmatmul.bf16.gmra.mxu0 %v4876_v39  ;;  %1784 = vrot.lane.b32.xlu2 %v6221_v29, %s5572_s26  ;;  %421 = vst.msk [vmem:[#allocation3 + $0x84] sm:$0xf] %vm409_vm2, %v388_v60  ;;  %v2669_v39 = vpop.f32.mrf.mxu2 }
 0x125   : > { %793 = vrot.lane.b32.xlu0 %v6144_v44, %s5571_s21  ;;  %1016 = vrot.lane.b32.xlu1 %v6189_v5, %s5572_s26  ;;  %v299_v44 = vld [vmem:[%s5726_s25 + $0x98] sm:$0xff] }
 0x126   : > { %v780_v41 = vpop.permute.xlu2 %779  ;;  %332 = vst.msk [vmem:[#allocation2 + $0xf9] sm:$0xff] %vm224_vm0, %v299_v44  ;;  %v6371_v44 = vpack.c.bf16 %v1680_v48, %v1680_v48 }
 0x127   : > { %v1549_v43 = vpop.permute.xlu0 %1548  ;;  %v1771_v45 = vpop.permute.xlu1 %1770 }
 0x128   : > { %1637 = vst.msk [vmem:[#allocation3 + $0x58] sm:$0xf] %vm859_vm4, %v1549_v43 }
 0x129   : > { %1860 = vst.msk [vmem:[#allocation3 + $0x4c] sm:$0xf] %vm1084_vm5, %v1771_v45 }
 0x12a   : > { %1861 = vst.msk [vmem:[#allocation3 + $0x58] sm:$0xf] %vm1084_vm5, %v1773_v27 }
 0x12b   : > { %1201 = vst.msk [vmem:[#allocation3 + $0xf4] sm:$0xf] %vm409_vm2, %v6371_v44 }
 0x12c   : > { %791 = vrot.lane.b32.xlu2 %v6137_v42, %s5571_s21 }
 0x12d   : > { %1337 = vrot.lane.b32.xlu0 %v6202_v13, %s5570_s20  ;;  %1339 = vrot.lane.b32.xlu1 %v6209_v15, %s5570_s20  ;;  %v1231_v20 = vld [vmem:[#allocation2 + $0xf2] sm:$0xff]  ;;  %v1232_v25 = vld [vmem:[#allocation2 + $0xfa] sm:$0xff] }
 0x12e   : > { %v1007_v52 = vpop.permute.xlu2 %1006  ;;  %v6338_v24 = vpack.c.bf16 %v1231_v20, %v1231_v20  ;;  %v1455_v33 = vld [vmem:[#allocation2 + $0xf8] sm:$0xff] }
 0x12f   : > { %v555_v42 = vpop.permute.xlu0 %554  ;;  %v557_v56 = vpop.permute.xlu1 %556  ;;  %v1679_v34 = vld [vmem:[#allocation2 + $0xf9] sm:$0xff] }
 0x130   : > { %643 = vst.msk [vmem:[#allocation3 + $0x60] sm:$0xf] %vm634_vm3, %v555_v42  ;;  %v5416_v61 = vld [vmem:[#allocation3 + $0x4c] sm:$0xf] }
 0x131   : > { %644 = vst.msk [vmem:[#allocation3 + $0x6c] sm:$0xf] %vm634_vm3, %v557_v56  ;;  %v4877_v58 = vld [vmem:[#allocation3 + $0x54] sm:$0xf0] }
 0x132   : > { %868 = vst.msk [vmem:[#allocation3 + $0x60] sm:$0xf] %vm859_vm4, %v780_v41  ;;  %v4880_v1 = vor.u32 %v5416_v61, %v4877_v58  ;;  %v6358_v41 = vpack.c.bf16 %v1679_v34, %v1679_v34 }
 0x133   : > { %1966 = vst.msk [vmem:[#allocation3 + $0xc8] sm:$0xf] %vm409_vm2, %v6338_v24 }
 0x134   : > { %2594 = vmatmul.bf16.gmra.mxu1 %v4880_v1  ;;  %1018 = vrot.lane.b32.xlu2 %v6219_v26, %s5572_s26  ;;  %1200 = vst.msk [vmem:[#allocation3 + $0xe8] sm:$0xf] %vm409_vm2, %v6358_v41 }
 0x135   : > { %1564 = vrot.lane.b32.xlu0 %v6282_v63, %s5571_s21  ;;  %1786 = vrot.lane.b32.xlu1 %v6232_v32, %s5572_s26 }
 0x136   : > { %v1551_v5 = vpop.permute.xlu2 %1550 }
 0x137   : > { %v782_v6 = vpop.permute.xlu0 %781  ;;  %v1005_v8 = vpop.permute.xlu1 %1004 }
 0x138   : > { %869 = vst.msk [vmem:[#allocation3 + $0x6c] sm:$0xf] %vm859_vm4, %v782_v6  ;;  %v2491_v26 = vpop.f32.mrf.mxu0 }
 0x139   : > { %1093 = vst.msk [vmem:[#allocation3 + $0x60] sm:$0xf] %vm1084_vm5, %v1005_v8  ;;  %v2492_v36 = vadd.f32 %v6334_v23, %v2491_v26 }
 0x13a   : > { %1094 = vst.msk [vmem:[#allocation3 + $0x6c] sm:$0xf] %vm1084_vm5, %v1007_v52 }
 0x13c   : > { %1562 = vrot.lane.b32.xlu2 %v6254_v40, %s5571_s21 }
 0x13d   : > { %570 = vrot.lane.b32.xlu0 %v6167_v59, %s5570_s20  ;;  %572 = vrot.lane.b32.xlu1 %v6221_v29, %s5570_s20  ;;  %v910_v59 = vld [vmem:[#allocation2 + $0xf0] sm:$0xff]  ;;  %v6345_v29 = vpack.c.bf16 %v1232_v25, %v1232_v25 }
 0x13e   : > { %v1777_v10 = vpop.permute.xlu2 %1776  ;;  %v6322_v17 = vpack.c.bf16 %v910_v59, %v910_v59 }
 0x13f   : > { %v1326_v11 = vpop.permute.xlu0 %1325  ;;  %v1328_v12 = vpop.permute.xlu1 %1327  ;;  %1967 = vst.msk [vmem:[#allocation3 + $0xd4] sm:$0xf] %vm409_vm2, %v6345_v29 }
 0x140   : > { %1413 = vst.msk [vmem:[#allocation3 + $0x64] sm:$0xf] %vm634_vm3, %v1326_v11  ;;  %v4887_v9 = vld [vmem:[#allocation3 + $0x60] sm:$0xf]  ;;  %v6389_v60 = vpop.f32.mrf.mxu0 }
 0x141   : > { %1414 = vst.msk [vmem:[#allocation3 + $0x70] sm:$0xf] %vm634_vm3, %v1328_v12  ;;  %v5420_v14 = vld [vmem:[#allocation3 + $0x68] sm:$0xf0]  ;;  %v4919_v12 = vld [vmem:[#allocation3 + $0x98] sm:$0xf] }
 0x142   : > { %1638 = vst.msk [vmem:[#allocation3 + $0x64] sm:$0xf] %vm859_vm4, %v1551_v5  ;;  %v4888_v16 = vor.u32 %v5420_v14, %v4887_v9  ;;  %v303_v5 = vld [vmem:[%s5726_s25 + $0xb8] sm:$0xff] }
 0x143   : > { %430 = vst.msk [vmem:[#allocation3 + $0xf0] sm:$0xf] %vm409_vm2, %v6322_v17  ;;  %v5427_v9 = vld [vmem:[#allocation3 + $0xa0] sm:$0xf0] }
 0x144   : > { %2510 = vmatmul.bf16.gmra.mxu0 %v4888_v16  ;;  %1788 = vrot.lane.b32.xlu2 %v6287_v3, %s5572_s26  ;;  %336 = vst.msk [vmem:[#allocation2 + $0x129] sm:$0xff] %vm224_vm0, %v303_v5  ;;  %v4920_v59 = vor.u32 %v5427_v9, %v4919_v12 }
 0x145   : > { %797 = vrot.lane.b32.xlu0 %v6209_v15, %s5571_s21  ;;  %1020 = vrot.lane.b32.xlu1 %v6254_v40, %s5572_s26  ;;  %v301_v15 = vld [vmem:[%s5726_s25 + $0xa8] sm:$0xff]  ;;  %v6356_v40 = vpack.c.bf16 %v1455_v33, %v1455_v33 }
 0x146   : > { %v784_v18 = vpop.permute.xlu2 %783  ;;  %334 = vst.msk [vmem:[#allocation2 + $0x111] sm:$0xff] %vm224_vm0, %v301_v15  ;;  %5107 = vmatmul.msk.bf16.gmra.mxu2 %vm224_vm0, %v4920_v59 }
 0x147   : > { %v1553_v19 = vpop.permute.xlu0 %1552  ;;  %v1775_v7 = vpop.permute.xlu1 %1774 }
 0x148   : > { %1639 = vst.msk [vmem:[#allocation3 + $0x70] sm:$0xf] %vm859_vm4, %v1553_v19 }
 0x149   : > { %1862 = vst.msk [vmem:[#allocation3 + $0x64] sm:$0xf] %vm1084_vm5, %v1775_v7 }
 0x14a   : > { %1863 = vst.msk [vmem:[#allocation3 + $0x70] sm:$0xf] %vm1084_vm5, %v1777_v10 }
 0x14c   : > { %795 = vrot.lane.b32.xlu2 %v6202_v13, %s5571_s21 }
 0x14d   : > { %1341 = vrot.lane.b32.xlu0 %v6267_v49, %s5570_s20  ;;  %1343 = vrot.lane.b32.xlu1 %v6285_v2, %s5570_s20  ;;  %v1234_v8 = vld [vmem:[#allocation2 + $0x112] sm:$0xff] }
 0x14e   : > { %v1011_v13 = vpop.permute.xlu2 %1010  ;;  %v6417_v11 = vpack.c.bf16 %v1234_v8, %v1234_v8  ;;  %v1457_v14 = vld [vmem:[#allocation2 + $0x110] sm:$0xff] }
 0x14f   : > { %v559_v27 = vpop.permute.xlu0 %558  ;;  %v561_v35 = vpop.permute.xlu1 %560  ;;  %v1681_v16 = vld [vmem:[#allocation2 + $0x111] sm:$0xff]  ;;  %v6428_v25 = vpack.c.bf16 %v1457_v14, %v1457_v14 }
 0x150   : > { %645 = vst.msk [vmem:[#allocation3 + $0x78] sm:$0xf] %vm634_vm3, %v559_v27  ;;  %v5419_v37 = vld [vmem:[#allocation3 + $0x64] sm:$0xf]  ;;  %v6430_v26 = vpack.c.bf16 %v1681_v16, %v1681_v16 }
 0x151   : > { %646 = vst.msk [vmem:[#allocation3 + $0x84] sm:$0xf] %vm634_vm3, %v561_v35  ;;  %v2580_v38 = vpop.f32.mrf.mxu1  ;;  %v4889_v22 = vld [vmem:[#allocation3 + $0x6c] sm:$0xf0] }
 0x152   : > { %v2581_v43 = vadd.f32 %v2580_v38, %v2492_v36  ;;  %870 = vst.msk [vmem:[#allocation3 + $0x78] sm:$0xf] %vm859_vm4, %v784_v18  ;;  %v4892_v45 = vor.u32 %v5419_v37, %v4889_v22 }
 0x153   : > { %1969 = vst.msk [vmem:[#allocation3 + $0xec] sm:$0xf] %vm409_vm2, %v6417_v11 }
 0x154   : > { %v6363_v46 = vadd.f32 %v2669_v39, %v2581_v43  ;;  %2599 = vmatmul.bf16.gmra.mxu1 %v4892_v45  ;;  %1022 = vrot.lane.b32.xlu2 %v6282_v63, %s5572_s26  ;;  %1202 = vst.msk [vmem:[#allocation3 + $0x100] sm:$0xf] %vm409_vm2, %v6430_v26 }
 0x155   : > { %1568 = vrot.lane.b32.xlu0 %v6356_v40, %s5571_s21  ;;  %1790 = vrot.lane.b32.xlu1 %v6298_v53, %s5572_s26 }
 0x156   : > { %v1555_v47 = vpop.permute.xlu2 %1554 }
 0x157   : > { %v786_v50 = vpop.permute.xlu0 %785  ;;  %v1009_v51 = vpop.permute.xlu1 %1008 }
 0x158   : > { %871 = vst.msk [vmem:[#allocation3 + $0x84] sm:$0xf] %vm859_vm4, %v786_v50 }
 0x159   : > { %1095 = vst.msk [vmem:[#allocation3 + $0x78] sm:$0xf] %vm1084_vm5, %v1009_v51  ;;  %v6400_v1 = vpop.f32.mrf.mxu1 }
 0x15a   : > { %1096 = vst.msk [vmem:[#allocation3 + $0x84] sm:$0xf] %vm1084_vm5, %v1011_v13  ;;  %v1682_v13 = vld [vmem:[#allocation2 + $0x121] sm:$0xff] }
 0x15b   : > { %v6443_v34 = vpack.c.bf16 %v1682_v13, %v1682_v13 }
 0x15c   : > { %1566 = vrot.lane.b32.xlu2 %v6322_v17, %s5571_s21 }
 0x15d   : > { %574 = vrot.lane.b32.xlu0 %v6232_v32, %s5570_s20  ;;  %576 = vrot.lane.b32.xlu1 %v6287_v3, %s5570_s20  ;;  %v912_v32 = vld [vmem:[#allocation2 + $0x108] sm:$0xff]  ;;  %v6402_v3 = vpop.f32.mrf.mxu2  ;;  %1203 = vst.msk [vmem:[#allocation3 + $0x10c] sm:$0xf] %vm409_vm2, %v6443_v34 }
 0x15e   : > { %v1781_v52 = vpop.permute.xlu2 %1780  ;;  %v6395_v61 = vpack.c.bf16 %v912_v32, %v912_v32  ;;  %v1459_v32 = vld [vmem:[#allocation2 + $0x128] sm:$0xff] }
 0x15f   : > { %v1330_v54 = vpop.permute.xlu0 %1329  ;;  %v1332_v55 = vpop.permute.xlu1 %1331 }
 0x160   : > { %1415 = vst.msk [vmem:[#allocation3 + $0x7c] sm:$0xf] %vm634_vm3, %v1330_v54  ;;  %v4899_v42 = vld [vmem:[#allocation3 + $0x78] sm:$0xf]  ;;  %v305_v54 = vld [vmem:[%s5726_s25 + $0xc8] sm:$0xff] }
 0x161   : > { %1416 = vst.msk [vmem:[#allocation3 + $0x88] sm:$0xf] %vm634_vm3, %v1332_v55  ;;  %v5423_v56 = vld [vmem:[#allocation3 + $0x80] sm:$0xf0]  ;;  %v2496_v10 = vpop.f32.mrf.mxu0 }
 0x162   : > { %1640 = vst.msk [vmem:[#allocation3 + $0x7c] sm:$0xf] %vm859_vm4, %v1555_v47  ;;  %v4900_v57 = vor.u32 %v5423_v56, %v4899_v42  ;;  %v2497_v19 = vadd.f32 %v6334_v23, %v2496_v10  ;;  %v4931_v56 = vld [vmem:[#allocation3 + $0xb0] sm:$0xf]  ;;  %v1683_v10 = vld [vmem:[#allocation2 + $0x129] sm:$0xff] }
 0x163   : > { %432 = vst.msk [vmem:[#allocation3 + $0x108] sm:$0xf] %vm409_vm2, %v6395_v61 }
 0x164   : > { %2515 = vmatmul.bf16.gmra.mxu0 %v4900_v57  ;;  %1792 = vrot.lane.b32.xlu2 %v6358_v41, %s5572_s26  ;;  %v5430_v57 = vld [vmem:[#allocation3 + $0xb8] sm:$0xf0]  ;;  %338 = vst.msk [vmem:[#allocation2 + $0x141] sm:$0xff] %vm224_vm0, %v305_v54  ;;  %v5433_v54 = vld [vmem:[#allocation3 + $0xd0] sm:$0xf0] }
 0x165   : > { %801 = vrot.lane.b32.xlu0 %v6285_v2, %s5571_s21  ;;  %1024 = vrot.lane.b32.xlu1 %v6322_v17, %s5572_s26  ;;  %v1233_v2 = vld [vmem:[#allocation2 + $0x10a] sm:$0xff]  ;;  %v2674_v21 = vpop.f32.mrf.mxu2 }
 0x166   : > { %v788_v62 = vpop.permute.xlu2 %787  ;;  %v6410_v6 = vpack.c.bf16 %v1233_v2, %v1233_v2  ;;  %v1236_v2 = vld [vmem:[#allocation2 + $0x12a] sm:$0xff] }
 0x167   : > { %v1557_v58 = vpop.permute.xlu0 %1556  ;;  %v1779_v63 = vpop.permute.xlu1 %1778 }
 0x168   : > { %1641 = vst.msk [vmem:[#allocation3 + $0x88] sm:$0xf] %vm859_vm4, %v1557_v58  ;;  %v362_v58 = vld [vmem:[#allocation2 + $0xc8] sm:$0xff] }
 0x169   : > { %1864 = vst.msk [vmem:[#allocation3 + $0x7c] sm:$0xf] %vm1084_vm5, %v1779_v63  ;;  %v394_v4 = vpack.c.bf16 %v362_v58, %v362_v58 }
 0x16a   : > { %1865 = vst.msk [vmem:[#allocation3 + $0x88] sm:$0xf] %vm1084_vm5, %v1781_v52  ;;  %v304_v52 = vld [vmem:[%s5726_s25 + $0xc0] sm:$0xff] }
 0x16b   : > { %1968 = vst.msk [vmem:[#allocation3 + $0xe0] sm:$0xf] %vm409_vm2, %v6410_v6 }
 0x16c   : > { %799 = vrot.lane.b32.xlu2 %v6267_v49, %s5571_s21  ;;  %337 = vst.msk [vmem:[#allocation2 + $0x139] sm:$0xff] %vm224_vm0, %v304_v52  ;;  %v4943_v52 = vld [vmem:[#allocation3 + $0xc8] sm:$0xf] }
 0x16d   : > { %1345 = vrot.lane.b32.xlu0 %v6338_v24, %s5570_s20  ;;  %1347 = vrot.lane.b32.xlu1 %v6345_v29, %s5570_s20  ;;  %v6474_v51 = vpop.f32.mrf.mxu2  ;;  %3284 = vst.msk [vmem:[#allocation2 + $0xc8] sm:$0x3] %vm227_vm1, %v5569_v0 }
 0x16e   : > { %v1015_v49 = vpop.permute.xlu2 %1014  ;;  %427 = vst.msk [vmem:[#allocation3 + $0xcc] sm:$0xf] %vm409_vm2, %v394_v4 }
 0x16f   : > { %v563_v17 = vpop.permute.xlu0 %562  ;;  %v565_v18 = vpop.permute.xlu1 %564 }
 0x170   : > { %647 = vst.msk [vmem:[#allocation3 + $0x90] sm:$0xf] %vm634_vm3, %v563_v17  ;;  %v5422_v7 = vld [vmem:[#allocation3 + $0x7c] sm:$0xf]  ;;  %v6501_v17 = vpack.c.bf16 %v1236_v2, %v1236_v2 }
 0x171   : > { %648 = vst.msk [vmem:[#allocation3 + $0x9c] sm:$0xf] %vm634_vm3, %v565_v18  ;;  %v2585_v20 = vpop.f32.mrf.mxu1  ;;  %v4901_v15 = vld [vmem:[#allocation3 + $0x84] sm:$0xf0]  ;;  %v6503_v18 = vpack.c.bf16 %v1683_v10, %v1683_v10 }
 0x172   : > { %872 = vst.msk [vmem:[#allocation3 + $0x90] sm:$0xf] %vm859_vm4, %v788_v62  ;;  %v2586_v30 = vadd.f32 %v2585_v20, %v2497_v19  ;;  %v4904_v31 = vor.u32 %v5422_v7, %v4901_v15  ;;  %v4932_v62 = vor.u32 %v5430_v57, %v4931_v56  ;;  %v4944_v56 = vor.u32 %v5433_v54, %v4943_v52  ;;  %v364_v57 = vld [vmem:[#allocation2 + $0xe0] sm:$0xff] }
 0x173   : > { %v1684_v7 = vld [vmem:[#allocation2 + $0x139] sm:$0xff]  ;;  %1971 = vst.msk [vmem:[#allocation3 + $0x104] sm:$0xf] %vm409_vm2, %v6501_v17 }
 0x174   : > { %v6435_v33 = vadd.f32 %v2674_v21, %v2586_v30  ;;  %2604 = vmatmul.bf16.gmra.mxu1 %v4904_v31  ;;  %1026 = vrot.lane.b32.xlu2 %v6356_v40, %s5572_s26  ;;  %v6516_v20 = vpack.c.bf16 %v1684_v7, %v1684_v7  ;;  %1204 = vst.msk [vmem:[#allocation3 + $0x118] sm:$0xf] %vm409_vm2, %v6503_v18  ;;  %v1461_v15 = vld [vmem:[#allocation2 + $0x140] sm:$0xff] }
 0x175   : > { %1572 = vrot.lane.b32.xlu0 %v6428_v25, %s5571_s21  ;;  %1794 = vrot.lane.b32.xlu1 %v6371_v44, %s5572_s26  ;;  %v2679_v9 = vpop.f32.mrf.mxu2  ;;  %3286 = vst.msk [vmem:[#allocation2 + $0xe0] sm:$0x3] %vm227_vm1, %v5569_v0 }
 0x176   : > { %v1559_v28 = vpop.permute.xlu2 %1558  ;;  %5108 = vmatmul.msk.bf16.gmra.mxu2 %vm224_vm0, %v4932_v62  ;;  %1205 = vst.msk [vmem:[#allocation3 + $0x124] sm:$0xf] %vm409_vm2, %v6516_v20  ;;  %v396_v62 = vpack.c.bf16 %v364_v57, %v364_v57 }
 0x177   : > { %v790_v27 = vpop.permute.xlu0 %789  ;;  %v1013_v35 = vpop.permute.xlu1 %1012 }
 0x178   : > { %873 = vst.msk [vmem:[#allocation3 + $0x9c] sm:$0xf] %vm859_vm4, %v790_v27 }
 0x179   : > { %1097 = vst.msk [vmem:[#allocation3 + $0x90] sm:$0xf] %vm1084_vm5, %v1013_v35  ;;  %v6472_v50 = vpop.f32.mrf.mxu1 }
 0x17a   : > { %1098 = vst.msk [vmem:[#allocation3 + $0x9c] sm:$0xf] %vm1084_vm5, %v1015_v49  ;;  %v6498_v49 = vpack.c.bf16 %v1459_v32, %v1459_v32 }
 0x17b   : > { %429 = vst.msk [vmem:[#allocation3 + $0xe4] sm:$0xf] %vm409_vm2, %v396_v62 }
 0x17c   : > { %1570 = vrot.lane.b32.xlu2 %v6395_v61, %s5571_s21 }
 0x17d   : > { %578 = vrot.lane.b32.xlu0 %v6298_v53, %s5570_s20  ;;  %580 = vrot.lane.b32.xlu1 %v6358_v41, %s5570_s20  ;;  %v914_v53 = vld [vmem:[#allocation2 + $0x120] sm:$0xff]  ;;  %v6461_v41 = vpop.f32.mrf.mxu0 }
 0x17e   : > { %v1785_v36 = vpop.permute.xlu2 %1784  ;;  %v6467_v43 = vpack.c.bf16 %v914_v53, %v914_v53 }
 0x17f   : > { %v1334_v37 = vpop.permute.xlu0 %1333  ;;  %v1336_v38 = vpop.permute.xlu1 %1335 }
 0x180   : > { %1417 = vst.msk [vmem:[#allocation3 + $0x94] sm:$0xf] %vm634_vm3, %v1334_v37  ;;  %v4911_v39 = vld [vmem:[#allocation3 + $0x90] sm:$0xf] }
 0x181   : > { %1418 = vst.msk [vmem:[#allocation3 + $0xa0] sm:$0xf] %vm634_vm3, %v1336_v38  ;;  %v5426_v22 = vld [vmem:[#allocation3 + $0x98] sm:$0xf0] }
 0x182   : > { %1642 = vst.msk [vmem:[#allocation3 + $0x94] sm:$0xf] %vm859_vm4, %v1559_v28  ;;  %v4912_v40 = vor.u32 %v5426_v22, %v4911_v39 }
 0x183   : > { %434 = vst.msk [vmem:[#allocation3 + $0x120] sm:$0xf] %vm409_vm2, %v6467_v43 }
 0x184   : > { %2520 = vmatmul.bf16.gmra.mxu0 %v4912_v40  ;;  %1796 = vrot.lane.b32.xlu2 %v6430_v26, %s5572_s26 }
 0x185   : > { %805 = vrot.lane.b32.xlu0 %v6345_v29, %s5571_s21  ;;  %1028 = vrot.lane.b32.xlu1 %v6395_v61, %s5572_s26  ;;  %v1235_v29 = vld [vmem:[#allocation2 + $0x122] sm:$0xff]  ;;  %v2501_v42 = vpop.f32.mrf.mxu0 }
 0x186   : > { %v792_v45 = vpop.permute.xlu2 %791  ;;  %v6482_v55 = vpack.c.bf16 %v1235_v29, %v1235_v29  ;;  %v2502_v5 = vadd.f32 %v6334_v23, %v2501_v42  ;;  %5109 = vmatmul.msk.bf16.gmra.mxu2 %vm224_vm0, %v4944_v56  ;;  %v5436_v56 = vld [vmem:[#allocation3 + $0xe8] sm:$0xf0] }
 0x187   : > { %v1561_v48 = vpop.permute.xlu0 %1560  ;;  %v1783_v47 = vpop.permute.xlu1 %1782 }
 0x188   : > { %1643 = vst.msk [vmem:[#allocation3 + $0xa0] sm:$0xf] %vm859_vm4, %v1561_v48  ;;  %v307_v48 = vld [vmem:[%s5726_s25 + $0xd8] sm:$0xff] }
 0x189   : > { %1866 = vst.msk [vmem:[#allocation3 + $0x94] sm:$0xf] %vm1084_vm5, %v1783_v47 }
 0x18a   : > { %1867 = vst.msk [vmem:[#allocation3 + $0xa0] sm:$0xf] %vm1084_vm5, %v1785_v36 }
 0x18b   : > { %1970 = vst.msk [vmem:[#allocation3 + $0xf8] sm:$0xf] %vm409_vm2, %v6482_v55 }
 0x18c   : > { %803 = vrot.lane.b32.xlu2 %v6338_v24, %s5571_s21  ;;  %340 = vst.msk [vmem:[#allocation2 + $0x159] sm:$0xff] %vm224_vm0, %v307_v48  ;;  %v309_v48 = vld [vmem:[%s5726_s25 + $0xe8] sm:$0xff] }
 0x18d   : > { %1349 = vrot.lane.b32.xlu0 %v6410_v6, %s5570_s20  ;;  %1351 = vrot.lane.b32.xlu1 %v6417_v11, %s5570_s20  ;;  %342 = vst.msk [vmem:[#allocation2 + $0x171] sm:$0xff] %vm224_vm0, %v309_v48 }
 0x18e   : > { %v1019_v61 = vpop.permute.xlu2 %1018 }
 0x18f   : > { %v567_v24 = vpop.permute.xlu0 %566  ;;  %v569_v63 = vpop.permute.xlu1 %568 }
 0x190   : > { %649 = vst.msk [vmem:[#allocation3 + $0xa8] sm:$0xf] %vm634_vm3, %v567_v24  ;;  %v5425_v8 = vld [vmem:[#allocation3 + $0x94] sm:$0xf] }
 0x191   : > { %650 = vst.msk [vmem:[#allocation3 + $0xb4] sm:$0xf] %vm634_vm3, %v569_v63  ;;  %v2590_v12 = vpop.f32.mrf.mxu1  ;;  %v4913_v14 = vld [vmem:[#allocation3 + $0x9c] sm:$0xf0]  ;;  %v1685_v63 = vld [vmem:[#allocation2 + $0x141] sm:$0xff] }
 0x192   : > { %874 = vst.msk [vmem:[#allocation3 + $0xa8] sm:$0xf] %vm859_vm4, %v792_v45  ;;  %v2591_v16 = vadd.f32 %v2590_v12, %v2502_v5  ;;  %v4916_v59 = vor.u32 %v5425_v8, %v4913_v14  ;;  %v6553_v45 = vpop.f32.mrf.mxu2 }
 0x193   : > { %v1240_v52 = vld [vmem:[#allocation2 + $0x15a] sm:$0xff] }
 0x194   : > { %v6506_v19 = vadd.f32 %v2679_v9, %v2591_v16  ;;  %2609 = vmatmul.bf16.gmra.mxu1 %v4916_v59  ;;  %1030 = vrot.lane.b32.xlu2 %v6428_v25, %s5572_s26  ;;  %v6524_v25 = vpack.c.bf16 %v1461_v15, %v1461_v15  ;;  %v6580_v9 = vpack.c.bf16 %v1685_v63, %v1685_v63  ;;  %v1687_v62 = vld [vmem:[#allocation2 + $0x159] sm:$0xff] }
 0x195   : > { %1576 = vrot.lane.b32.xlu0 %v6498_v49, %s5571_s21  ;;  %1798 = vrot.lane.b32.xlu1 %v6443_v34, %s5572_s26  ;;  %v6645_v54 = vpack.c.bf16 %v1240_v52, %v1240_v52 }
 0x196   : > { %v1563_v21 = vpop.permute.xlu2 %1562  ;;  %437 = vst.msk [vmem:[#allocation3 + $0x144] sm:$0xf] %vm409_vm2, %v6524_v25 }
 0x197   : > { %v794_v30 = vpop.permute.xlu0 %793  ;;  %v1017_v31 = vpop.permute.xlu1 %1016  ;;  %1206 = vst.msk [vmem:[#allocation3 + $0x130] sm:$0xf] %vm409_vm2, %v6580_v9 }
 0x198   : > { %875 = vst.msk [vmem:[#allocation3 + $0xb4] sm:$0xf] %vm859_vm4, %v794_v30 }
 0x199   : > { %1099 = vst.msk [vmem:[#allocation3 + $0xa8] sm:$0xf] %vm1084_vm5, %v1017_v31  ;;  %v6551_v53 = vpop.f32.mrf.mxu1 }
 0x19a   : > { %1100 = vst.msk [vmem:[#allocation3 + $0xb4] sm:$0xf] %vm1084_vm5, %v1019_v61  ;;  %v1238_v61 = vld [vmem:[#allocation2 + $0x142] sm:$0xff]  ;;  %v2684_v4 = vpop.f32.mrf.mxu2 }
 0x19b   : > { %v6578_v12 = vpack.c.bf16 %v1238_v61, %v1238_v61  ;;  %1975 = vst.msk [vmem:[#allocation3 + $0x134] sm:$0xf] %vm409_vm2, %v6645_v54 }
 0x19c   : > { %1574 = vrot.lane.b32.xlu2 %v6467_v43, %s5571_s21 }
 0x19d   : > { %582 = vrot.lane.b32.xlu0 %v6371_v44, %s5570_s20  ;;  %584 = vrot.lane.b32.xlu1 %v6430_v26, %s5570_s20  ;;  %v916_v44 = vld [vmem:[#allocation2 + $0x138] sm:$0xff]  ;;  %v6540_v26 = vpop.f32.mrf.mxu0  ;;  %1973 = vst.msk [vmem:[#allocation3 + $0x11c] sm:$0xf] %vm409_vm2, %v6578_v12 }
 0x19e   : > { %v1789_v13 = vpop.permute.xlu2 %1788  ;;  %v6546_v38 = vpack.c.bf16 %v916_v44, %v916_v44 }
 0x19f   : > { %v1338_v28 = vpop.permute.xlu0 %1337  ;;  %v1340_v27 = vpop.permute.xlu1 %1339 }
 0x1a0   : > { %1419 = vst.msk [vmem:[#allocation3 + $0xac] sm:$0xf] %vm634_vm3, %v1338_v28  ;;  %v4923_v35 = vld [vmem:[#allocation3 + $0xa8] sm:$0xf] }
 0x1a1   : > { %1420 = vst.msk [vmem:[#allocation3 + $0xb8] sm:$0xf] %vm634_vm3, %v1340_v27  ;;  %v5429_v36 = vld [vmem:[#allocation3 + $0xb0] sm:$0xf0] }
 0x1a2   : > { %1644 = vst.msk [vmem:[#allocation3 + $0xac] sm:$0xf] %vm859_vm4, %v1563_v21  ;;  %v4924_v37 = vor.u32 %v5429_v36, %v4923_v35 }
 0x1a3   : > { %436 = vst.msk [vmem:[#allocation3 + $0x138] sm:$0xf] %vm409_vm2, %v6546_v38 }
 0x1a4   : > { %2525 = vmatmul.bf16.gmra.mxu0 %v4924_v37  ;;  %1800 = vrot.lane.b32.xlu2 %v6503_v18, %s5572_s26 }
 0x1a5   : > { %809 = vrot.lane.b32.xlu0 %v6417_v11, %s5571_s21  ;;  %1032 = vrot.lane.b32.xlu1 %v6467_v43, %s5572_s26  ;;  %v1237_v11 = vld [vmem:[#allocation2 + $0x13a] sm:$0xff]  ;;  %v306_v43 = vld [vmem:[%s5726_s25 + $0xd0] sm:$0xff]  ;;  %v2506_v29 = vpop.f32.mrf.mxu0 }
 0x1a6   : > { %v796_v39 = vpop.permute.xlu2 %795  ;;  %v6561_v47 = vpack.c.bf16 %v1237_v11, %v1237_v11  ;;  %339 = vst.msk [vmem:[#allocation2 + $0x151] sm:$0xff] %vm224_vm0, %v306_v43  ;;  %v2507_v58 = vadd.f32 %v6334_v23, %v2506_v29  ;;  %v6630_v11 = vpop.f32.mrf.mxu2  ;;  %v308_v43 = vld [vmem:[%s5726_s25 + $0xe0] sm:$0xff] }
 0x1a7   : > { %v1565_v22 = vpop.permute.xlu0 %1564  ;;  %v1787_v40 = vpop.permute.xlu1 %1786  ;;  %341 = vst.msk [vmem:[#allocation2 + $0x169] sm:$0xff] %vm224_vm0, %v308_v43 }
 0x1a8   : > { %1645 = vst.msk [vmem:[#allocation3 + $0xb8] sm:$0xf] %vm859_vm4, %v1565_v22 }
 0x1a9   : > { %1868 = vst.msk [vmem:[#allocation3 + $0xac] sm:$0xf] %vm1084_vm5, %v1787_v40 }
 0x1aa   : > { %1869 = vst.msk [vmem:[#allocation3 + $0xb8] sm:$0xf] %vm1084_vm5, %v1789_v13 }
 0x1ab   : > { %1972 = vst.msk [vmem:[#allocation3 + $0x110] sm:$0xf] %vm409_vm2, %v6561_v47 }
 0x1ac   : > { %807 = vrot.lane.b32.xlu2 %v6410_v6, %s5571_s21 }
 0x1ad   : > { %1353 = vrot.lane.b32.xlu0 %v6482_v55, %s5570_s20  ;;  %1355 = vrot.lane.b32.xlu1 %v6501_v17, %s5570_s20  ;;  %v1686_v16 = vld [vmem:[#allocation2 + $0x151] sm:$0xff]  ;;  %v6615_v37 = vpop.f32.mrf.mxu0 }
 0x1ae   : > { %v1023_v42 = vpop.permute.xlu2 %1022  ;;  %v6593_v59 = vpack.c.bf16 %v1686_v16, %v1686_v16  ;;  %v1463_v21 = vld [vmem:[#allocation2 + $0x158] sm:$0xff]  ;;  %v6657_v16 = vpack.c.bf16 %v1687_v62, %v1687_v62  ;;  %v4967_v62 = vld [vmem:[#allocation3 + $0xf8] sm:$0xf] }
 0x1af   : > { %v571_v6 = vpop.permute.xlu0 %570  ;;  %v573_v32 = vpop.permute.xlu1 %572 }
 0x1b0   : > { %651 = vst.msk [vmem:[#allocation3 + $0xc0] sm:$0xf] %vm634_vm3, %v571_v6  ;;  %v5428_v24 = vld [vmem:[#allocation3 + $0xac] sm:$0xf] }
 0x1b1   : > { %652 = vst.msk [vmem:[#allocation3 + $0xcc] sm:$0xf] %vm634_vm3, %v573_v32  ;;  %v2595_v2 = vpop.f32.mrf.mxu1  ;;  %v4925_v5 = vld [vmem:[#allocation3 + $0xb4] sm:$0xf0] }
 0x1b2   : > { %876 = vst.msk [vmem:[#allocation3 + $0xc0] sm:$0xf] %vm859_vm4, %v796_v39  ;;  %v2596_v8 = vadd.f32 %v2595_v2, %v2507_v58  ;;  %v4928_v10 = vor.u32 %v5428_v24, %v4925_v5 }
 0x1b3   : > { %1207 = vst.msk [vmem:[#allocation3 + $0x13c] sm:$0xf] %vm409_vm2, %v6593_v59 }
 0x1b4   : > { %v6583_v14 = vadd.f32 %v2684_v4, %v2596_v8  ;;  %2614 = vmatmul.bf16.gmra.mxu1 %v4928_v10  ;;  %1034 = vrot.lane.b32.xlu2 %v6498_v49, %s5572_s26  ;;  %v6601_v49 = vpack.c.bf16 %v1463_v21, %v1463_v21  ;;  %v2689_v4 = vpop.f32.mrf.mxu2  ;;  %v1688_v21 = vld [vmem:[#allocation2 + $0x169] sm:$0xff]  ;;  %1208 = vst.msk [vmem:[#allocation3 + $0x148] sm:$0xf] %vm409_vm2, %v6657_v16 }
 0x1b5   : > { %1580 = vrot.lane.b32.xlu0 %v6524_v25, %s5571_s21  ;;  %1802 = vrot.lane.b32.xlu1 %v6516_v20, %s5572_s26 }
 0x1b6   : > { %v1567_v7 = vpop.permute.xlu2 %1566  ;;  %439 = vst.msk [vmem:[#allocation3 + $0x15c] sm:$0xf] %vm409_vm2, %v6601_v49 }
 0x1b7   : > { %v798_v15 = vpop.permute.xlu0 %797  ;;  %v1021_v30 = vpop.permute.xlu1 %1020 }
 0x1b8   : > { %877 = vst.msk [vmem:[#allocation3 + $0xcc] sm:$0xf] %vm859_vm4, %v798_v15 }
 0x1b9   : > { %1101 = vst.msk [vmem:[#allocation3 + $0xc0] sm:$0xf] %vm1084_vm5, %v1021_v30  ;;  %v6628_v40 = vpop.f32.mrf.mxu1  ;;  %v6670_v30 = vpack.c.bf16 %v1688_v21, %v1688_v21 }
 0x1ba   : > { %1102 = vst.msk [vmem:[#allocation3 + $0xcc] sm:$0xf] %vm1084_vm5, %v1023_v42  ;;  %v4955_v42 = vld [vmem:[#allocation3 + $0xe0] sm:$0xf] }
 0x1bb   : > { %v4956_v6 = vor.u32 %v5436_v56, %v4955_v42  ;;  %1209 = vst.msk [vmem:[#allocation3 + $0x154] sm:$0xf] %vm409_vm2, %v6670_v30 }
 0x1bc   : > { %1578 = vrot.lane.b32.xlu2 %v6546_v38, %s5571_s21  ;;  %v6701_v48 = vpop.f32.mrf.mxu2 }
 0x1bd   : > { %586 = vrot.lane.b32.xlu0 %v6443_v34, %s5570_s20  ;;  %588 = vrot.lane.b32.xlu1 %v6503_v18, %s5570_s20  ;;  %v918_v34 = vld [vmem:[#allocation2 + $0x150] sm:$0xff] }
 0x1be   : > { %v1793_v31 = vpop.permute.xlu2 %1792  ;;  %v6623_v18 = vpack.c.bf16 %v918_v34, %v918_v34  ;;  %5110 = vmatmul.msk.bf16.gmra.mxu2 %vm224_vm0, %v4956_v6  ;;  %v310_v6 = vld [vmem:[%s5726_s25 + $0xf0] sm:$0xff] }
 0x1bf   : > { %v1342_v13 = vpop.permute.xlu0 %1341  ;;  %v1344_v28 = vpop.permute.xlu1 %1343  ;;  %343 = vst.msk [vmem:[#allocation2 + $0x181] sm:$0xff] %vm224_vm0, %v310_v6 }
 0x1c0   : > { %1421 = vst.msk [vmem:[#allocation3 + $0xc4] sm:$0xf] %vm634_vm3, %v1342_v13  ;;  %v4935_v27 = vld [vmem:[#allocation3 + $0xc0] sm:$0xf] }
 0x1c1   : > { %1422 = vst.msk [vmem:[#allocation3 + $0xd0] sm:$0xf] %vm634_vm3, %v1344_v28  ;;  %v5432_v35 = vld [vmem:[#allocation3 + $0xc8] sm:$0xf0]  ;;  %v1465_v13 = vld [vmem:[#allocation2 + $0x170] sm:$0xff] }
 0x1c2   : > { %1646 = vst.msk [vmem:[#allocation3 + $0xc4] sm:$0xf] %vm859_vm4, %v1567_v7  ;;  %v4936_v36 = vor.u32 %v5432_v35, %v4935_v27 }
 0x1c3   : > { %438 = vst.msk [vmem:[#allocation3 + $0x150] sm:$0xf] %vm409_vm2, %v6623_v18 }
 0x1c4   : > { %2530 = vmatmul.bf16.gmra.mxu0 %v4936_v36  ;;  %1804 = vrot.lane.b32.xlu2 %v6580_v9, %s5572_s26  ;;  %v6677_v36 = vpack.c.bf16 %v1465_v13, %v1465_v13 }
 0x1c5   : > { %813 = vrot.lane.b32.xlu0 %v6501_v17, %s5571_s21  ;;  %1036 = vrot.lane.b32.xlu1 %v6546_v38, %s5572_s26  ;;  %v1239_v17 = vld [vmem:[#allocation2 + $0x152] sm:$0xff]  ;;  %v2511_v38 = vpop.f32.mrf.mxu0 }
 0x1c6   : > { %v800_v44 = vpop.permute.xlu2 %799  ;;  %v6638_v29 = vpack.c.bf16 %v1239_v17, %v1239_v17  ;;  %v2512_v24 = vadd.f32 %v6334_v23, %v2511_v38  ;;  %441 = vst.msk [vmem:[#allocation3 + $0x174] sm:$0xf] %vm409_vm2, %v6677_v36 }
 0x1c7   : > { %v1569_v39 = vpop.permute.xlu0 %1568  ;;  %v1791_v22 = vpop.permute.xlu1 %1790 }
 0x1c8   : > { %1647 = vst.msk [vmem:[#allocation3 + $0xd0] sm:$0xf] %vm859_vm4, %v1569_v39 }
 0x1c9   : > { %1870 = vst.msk [vmem:[#allocation3 + $0xc4] sm:$0xf] %vm1084_vm5, %v1791_v22 }
 0x1ca   : > { %1871 = vst.msk [vmem:[#allocation3 + $0xd0] sm:$0xf] %vm1084_vm5, %v1793_v31 }
 0x1cb   : > { %1974 = vst.msk [vmem:[#allocation3 + $0x128] sm:$0xf] %vm409_vm2, %v6638_v29 }
 0x1cc   : > { %811 = vrot.lane.b32.xlu2 %v6482_v55, %s5571_s21  ;;  %v366_v55 = vld [vmem:[#allocation2 + $0xf8] sm:$0xff] }
 0x1cd   : > { %1357 = vrot.lane.b32.xlu0 %v6561_v47, %s5570_s20  ;;  %1359 = vrot.lane.b32.xlu1 %v6578_v12, %s5570_s20  ;;  %v398_v58 = vpack.c.bf16 %v366_v55, %v366_v55  ;;  %v2513_v15 = vpop.f32.mrf.mxu0 }
 0x1ce   : > { %v1027_v57 = vpop.permute.xlu2 %1026 }
 0x1cf   : > { %v575_v32 = vpop.permute.xlu0 %574  ;;  %v577_v61 = vpop.permute.xlu1 %576  ;;  %431 = vst.msk [vmem:[#allocation3 + $0xfc] sm:$0xf] %vm409_vm2, %v398_v58  ;;  %v5439_v58 = vld [vmem:[#allocation3 + $0x100] sm:$0xf0] }
 0x1d0   : > { %653 = vst.msk [vmem:[#allocation3 + $0xd8] sm:$0xf] %vm634_vm3, %v575_v32  ;;  %v5431_v63 = vld [vmem:[#allocation3 + $0xc4] sm:$0xf] }
 0x1d1   : > { %654 = vst.msk [vmem:[#allocation3 + $0xe4] sm:$0xf] %vm634_vm3, %v577_v61  ;;  %v2600_v2 = vpop.f32.mrf.mxu1  ;;  %v4937_v5 = vld [vmem:[#allocation3 + $0xcc] sm:$0xf0]  ;;  %v1242_v32 = vld [vmem:[#allocation2 + $0x172] sm:$0xff] }
 0x1d2   : > { %878 = vst.msk [vmem:[#allocation3 + $0xd8] sm:$0xf] %vm859_vm4, %v800_v44  ;;  %v2601_v8 = vadd.f32 %v2600_v2, %v2512_v24  ;;  %v4940_v10 = vor.u32 %v5431_v63, %v4937_v5  ;;  %v6719_v61 = vpack.c.bf16 %v1242_v32, %v1242_v32  ;;  %v2694_v24 = vpop.f32.mrf.mxu2  ;;  %v368_v2 = vld [vmem:[#allocation2 + $0x110] sm:$0xff] }
 0x1d4   : > { %v6660_v7 = vadd.f32 %v2689_v4, %v2601_v8  ;;  %2619 = vmatmul.bf16.gmra.mxu1 %v4940_v10  ;;  %1038 = vrot.lane.b32.xlu2 %v6524_v25, %s5572_s26  ;;  %v2514_v25 = vadd.f32 %v6334_v23, %v2513_v15  ;;  %v1689_v8 = vld [vmem:[#allocation2 + $0x171] sm:$0xff]  ;;  %v400_v10 = vpack.c.bf16 %v368_v2, %v368_v2  ;;  %v4979_v2 = vld [vmem:[#allocation3 + $0x110] sm:$0xf] }
 0x1d5   : > { %1584 = vrot.lane.b32.xlu0 %v6601_v49, %s5571_s21  ;;  %1806 = vrot.lane.b32.xlu1 %v6593_v59, %s5572_s26  ;;  %1977 = vst.msk [vmem:[#allocation3 + $0x14c] sm:$0xf] %vm409_vm2, %v6719_v61 }
 0x1d6   : > { %v1571_v31 = vpop.permute.xlu2 %1570  ;;  %433 = vst.msk [vmem:[#allocation3 + $0x114] sm:$0xf] %vm409_vm2, %v400_v10 }
 0x1d7   : > { %v802_v28 = vpop.permute.xlu0 %801  ;;  %v1025_v27 = vpop.permute.xlu1 %1024 }
 0x1d8   : > { %879 = vst.msk [vmem:[#allocation3 + $0xe4] sm:$0xf] %vm859_vm4, %v802_v28 }
 0x1d9   : > { %1103 = vst.msk [vmem:[#allocation3 + $0xd8] sm:$0xf] %vm1084_vm5, %v1025_v27  ;;  %v2602_v35 = vpop.f32.mrf.mxu1 }
 0x1da   : > { %1104 = vst.msk [vmem:[#allocation3 + $0xe4] sm:$0xf] %vm1084_vm5, %v1027_v57  ;;  %v6680_v34 = vadd.f32 %v2602_v35, %v2514_v25  ;;  %v6731_v25 = vpack.c.bf16 %v1689_v8, %v1689_v8 }
 0x1dc   : > { %1582 = vrot.lane.b32.xlu2 %v6623_v18, %s5571_s21  ;;  %1210 = vst.msk [vmem:[#allocation3 + $0x160] sm:$0xf] %vm409_vm2, %v6731_v25 }
 0x1dd   : > { %590 = vrot.lane.b32.xlu0 %v6516_v20, %s5570_s20  ;;  %592 = vrot.lane.b32.xlu1 %v6580_v9, %s5570_s20  ;;  %v920_v20 = vld [vmem:[#allocation2 + $0x168] sm:$0xff] }
 0x1de   : > { %v1797_v44 = vpop.permute.xlu2 %1796  ;;  %v6699_v9 = vpack.c.bf16 %v920_v20, %v920_v20 }
 0x1df   : > { %v1346_v39 = vpop.permute.xlu0 %1345  ;;  %v1348_v22 = vpop.permute.xlu1 %1347 }
 0x1e0   : > { %1423 = vst.msk [vmem:[#allocation3 + $0xdc] sm:$0xf] %vm634_vm3, %v1346_v39  ;;  %v4947_v17 = vld [vmem:[#allocation3 + $0xd8] sm:$0xf] }
 0x1e1   : > { %1424 = vst.msk [vmem:[#allocation3 + $0xe8] sm:$0xf] %vm634_vm3, %v1348_v22  ;;  %v5435_v38 = vld [vmem:[#allocation3 + $0xe0] sm:$0xf0]  ;;  %v2516_v57 = vpop.f32.mrf.mxu0 }
 0x1e2   : > { %1648 = vst.msk [vmem:[#allocation3 + $0xdc] sm:$0xf] %vm859_vm4, %v1571_v31  ;;  %v4948_v43 = vor.u32 %v5435_v38, %v4947_v17  ;;  %v2517_v21 = vadd.f32 %v6334_v23, %v2516_v57 }
 0x1e3   : > { %440 = vst.msk [vmem:[#allocation3 + $0x168] sm:$0xf] %vm409_vm2, %v6699_v9 }
 0x1e4   : > { %2535 = vmatmul.bf16.gmra.mxu0 %v4948_v43  ;;  %1808 = vrot.lane.b32.xlu2 %v6657_v16, %s5572_s26 }
 0x1e5   : > { %817 = vrot.lane.b32.xlu0 %v6578_v12, %s5571_s21  ;;  %1040 = vrot.lane.b32.xlu1 %v6623_v18, %s5572_s26  ;;  %v1241_v12 = vld [vmem:[#allocation2 + $0x16a] sm:$0xff] }
 0x1e6   : > { %v804_v52 = vpop.permute.xlu2 %803  ;;  %v311_v18 = vld [vmem:[%s5726_s25 + $0xf8] sm:$0xff]  ;;  %v6712_v55 = vpack.c.bf16 %v1241_v12, %v1241_v12 }
 0x1e7   : > { %v1573_v42 = vpop.permute.xlu0 %1572  ;;  %v1795_v56 = vpop.permute.xlu1 %1794  ;;  %344 = vst.msk [vmem:[#allocation2 + $0x189] sm:$0xff] %vm224_vm0, %v311_v18 }
 0x1e8   : > { %1649 = vst.msk [vmem:[#allocation3 + $0xe8] sm:$0xf] %vm859_vm4, %v1573_v42 }
 0x1e9   : > { %1872 = vst.msk [vmem:[#allocation3 + $0xdc] sm:$0xf] %vm1084_vm5, %v1795_v56  ;;  %v2518_v39 = vpop.f32.mrf.mxu0 }
 0x1ea   : > { %1873 = vst.msk [vmem:[#allocation3 + $0xe8] sm:$0xf] %vm1084_vm5, %v1797_v44  ;;  %v1690_v44 = vld [vmem:[#allocation2 + $0x181] sm:$0xff] }
 0x1eb   : > { %1976 = vst.msk [vmem:[#allocation3 + $0x140] sm:$0xf] %vm409_vm2, %v6712_v55  ;;  %v6744_v22 = vpack.c.bf16 %v1690_v44, %v1690_v44 }
 0x1ec   : > { %815 = vrot.lane.b32.xlu2 %v6561_v47, %s5571_s21  ;;  %v4968_v47 = vor.u32 %v5439_v58, %v4967_v62 }
 0x1ed   : > { %1361 = vrot.lane.b32.xlu0 %v6638_v29, %s5570_s20  ;;  %1363 = vrot.lane.b32.xlu1 %v6645_v54, %s5570_s20  ;;  %1211 = vst.msk [vmem:[#allocation3 + $0x16c] sm:$0xf] %vm409_vm2, %v6744_v22 }
 0x1ee   : > { %v1031_v63 = vpop.permute.xlu2 %1030  ;;  %5111 = vmatmul.msk.bf16.gmra.mxu2 %vm224_vm0, %v4968_v47  ;;  %v1467_v8 = vld [vmem:[#allocation2 + $0x188] sm:$0xff] }
 0x1ef   : > { %v579_v4 = vpop.permute.xlu0 %578  ;;  %v581_v5 = vpop.permute.xlu1 %580 }
 0x1f0   : > { %655 = vst.msk [vmem:[#allocation3 + $0xf0] sm:$0xf] %vm634_vm3, %v579_v4  ;;  %v5434_v15 = vld [vmem:[#allocation3 + $0xdc] sm:$0xf] }
 0x1f1   : > { %656 = vst.msk [vmem:[#allocation3 + $0xfc] sm:$0xf] %vm634_vm3, %v581_v5  ;;  %v2605_v31 = vpop.f32.mrf.mxu1  ;;  %v4949_v13 = vld [vmem:[#allocation3 + $0xe4] sm:$0xf0]  ;;  %v5442_v4 = vld [vmem:[#allocation3 + $0x118] sm:$0xf0] }
 0x1f2   : > { %880 = vst.msk [vmem:[#allocation3 + $0xf0] sm:$0xf] %vm859_vm4, %v804_v52  ;;  %v2606_v28 = vadd.f32 %v2605_v31, %v2517_v21  ;;  %v4952_v27 = vor.u32 %v5434_v15, %v4949_v13  ;;  %v2696_v52 = vpop.f32.mrf.mxu2  ;;  %v4980_v21 = vor.u32 %v5442_v4, %v4979_v2  ;;  %v370_v15 = vld [vmem:[#allocation2 + $0x128] sm:$0xff] }
 0x1f3   : > { %v1691_v13 = vld [vmem:[#allocation2 + $0x189] sm:$0xff] }
 0x1f4   : > { %v6734_v35 = vadd.f32 %v2694_v24, %v2606_v28  ;;  %2624 = vmatmul.bf16.gmra.mxu1 %v4952_v27  ;;  %1042 = vrot.lane.b32.xlu2 %v6601_v49, %s5572_s26  ;;  %v2519_v49 = vadd.f32 %v6334_v23, %v2518_v39  ;;  %v1243_v24 = vld [vmem:[#allocation2 + $0x182] sm:$0xff]  ;;  %v402_v28 = vpack.c.bf16 %v370_v15, %v370_v15 }
 0x1f5   : > { %1588 = vrot.lane.b32.xlu0 %v6677_v36, %s5571_s21  ;;  %1810 = vrot.lane.b32.xlu1 %v6670_v30, %s5572_s26  ;;  %v6772_v47 = vpack.c.bf16 %v1243_v24, %v1243_v24 }
 0x1f6   : > { %v1575_v17 = vpop.permute.xlu2 %1574  ;;  %435 = vst.msk [vmem:[#allocation3 + $0x12c] sm:$0xf] %vm409_vm2, %v402_v28 }
 0x1f7   : > { %v806_v38 = vpop.permute.xlu0 %805  ;;  %v1029_v43 = vpop.permute.xlu1 %1028  ;;  %1978 = vst.msk [vmem:[#allocation3 + $0x158] sm:$0xf] %vm409_vm2, %v6772_v47 }
 0x1f8   : > { %881 = vst.msk [vmem:[#allocation3 + $0xfc] sm:$0xf] %vm859_vm4, %v806_v38  ;;  %v6790_v38 = vpack.c.bf16 %v1467_v8, %v1467_v8  ;;  %v4991_v8 = vld [vmem:[#allocation3 + $0x128] sm:$0xf] }
 0x1f9   : > { %1105 = vst.msk [vmem:[#allocation3 + $0xf0] sm:$0xf] %vm1084_vm5, %v1029_v43  ;;  %v2607_v20 = vpop.f32.mrf.mxu1 }
 0x1fa   : > { %1106 = vst.msk [vmem:[#allocation3 + $0xfc] sm:$0xf] %vm1084_vm5, %v1031_v63  ;;  %v2608_v42 = vadd.f32 %v2607_v20, %v2519_v49  ;;  %v2699_v5 = vpop.f32.mrf.mxu2  ;;  %v1723_v20 = vpack.c.bf16 %v1691_v13, %v1691_v13 }
 0x1fc   : > { %v6752_v56 = vadd.f32 %v2696_v52, %v2608_v42  ;;  %1586 = vrot.lane.b32.xlu2 %v6699_v9, %s5571_s21  ;;  %1212 = vst.msk [vmem:[#allocation3 + $0x178] sm:$0xf] %vm409_vm2, %v1723_v20  ;;  %v922_v42 = vld [vmem:[#allocation2 + $0x180] sm:$0xff] }
 0x1fd   : > { %594 = vrot.lane.b32.xlu0 %v6593_v59, %s5570_s20  ;;  %596 = vrot.lane.b32.xlu1 %v6657_v16, %s5570_s20 }
 0x1fe   : > { %v1801_v12 = vpop.permute.xlu2 %1800  ;;  %5112 = vmatmul.msk.bf16.gmra.mxu2 %vm224_vm0, %v4980_v21  ;;  %v5445_v21 = vld [vmem:[#allocation3 + $0x130] sm:$0xf0] }
 0x1ff   : > { %v1350_v57 = vpop.permute.xlu0 %1349  ;;  %v1352_v6 = vpop.permute.xlu1 %1351  ;;  %v4992_v15 = vor.u32 %v5445_v21, %v4991_v8  ;;  %v5003_v21 = vld [vmem:[#allocation3 + $0x140] sm:$0xf] }
 0x200   : > { %1425 = vst.msk [vmem:[#allocation3 + $0xf4] sm:$0xf] %vm634_vm3, %v1350_v57  ;;  %v4959_v18 = vld [vmem:[#allocation3 + $0xf0] sm:$0xf] }
 0x201   : > { %1426 = vst.msk [vmem:[#allocation3 + $0x100] sm:$0xf] %vm634_vm3, %v1352_v6  ;;  %v5438_v32 = vld [vmem:[#allocation3 + $0xf8] sm:$0xf0]  ;;  %v2521_v63 = vpop.f32.mrf.mxu0 }
 0x202   : > { %1650 = vst.msk [vmem:[#allocation3 + $0xf4] sm:$0xf] %vm859_vm4, %v1575_v17  ;;  %v4960_v62 = vor.u32 %v5438_v32, %v4959_v18  ;;  %v2522_v27 = vadd.f32 %v6334_v23, %v2521_v63  ;;  %v6806_v18 = vld [vmem:[%s7922_s2] ss:$0 sm:$0xff]  ;;  %v954_v32 = vpack.c.bf16 %v922_v42, %v922_v42 }
 0x203   : > { %v1468_v42 = vld [vmem:[#allocation2 + $0x198] sm:$0xff] }
 0x204   : > { %2540 = vmatmul.bf16.gmra.mxu0 %v4960_v62  ;;  %1812 = vrot.lane.b32.xlu2 %v6731_v25, %s5572_s26 }
 0x205   : > { %821 = vrot.lane.b32.xlu0 %v6645_v54, %s5571_s21  ;;  %1044 = vrot.lane.b32.xlu1 %v6699_v9, %s5572_s26  ;;  %v1244_v54 = vld [vmem:[#allocation2 + $0x18a] sm:$0xff] }
 0x206   : > { %v808_v59 = vpop.permute.xlu2 %807  ;;  %v6780_v9 = vpack.c.bf16 %v1244_v54, %v1244_v54 }
 0x207   : > { %v1577_v16 = vpop.permute.xlu0 %1576  ;;  %v1799_v58 = vpop.permute.xlu1 %1798 }
 0x208   : > { %1651 = vst.msk [vmem:[#allocation3 + $0x100] sm:$0xf] %vm859_vm4, %v1577_v16 }
 0x209   : > { %1874 = vst.msk [vmem:[#allocation3 + $0xf4] sm:$0xf] %vm1084_vm5, %v1799_v58  ;;  %v2523_v23 = vpop.f32.mrf.mxu0 }
 0x20a   : > { %1875 = vst.msk [vmem:[#allocation3 + $0x100] sm:$0xf] %vm1084_vm5, %v1801_v12 }
 0x20b   : > { %1979 = vst.msk [vmem:[#allocation3 + $0x164] sm:$0xf] %vm409_vm2, %v6780_v9 }
 0x20c   : > { %819 = vrot.lane.b32.xlu2 %v6638_v29, %s5571_s21 }
 0x20d   : > { %1365 = vrot.lane.b32.xlu0 %v6712_v55, %s5570_s20  ;;  %1367 = vrot.lane.b32.xlu1 %v6719_v61, %s5570_s20 }
 0x20e   : > { %v1035_v10 = vpop.permute.xlu2 %1034  ;;  %5113 = vmatmul.msk.bf16.gmra.mxu2 %vm224_vm0, %v4992_v15  ;;  %v5448_v15 = vld [vmem:[#allocation3 + $0x148] sm:$0xf0] }
 0x20f   : > { %v583_v29 = vpop.permute.xlu0 %582  ;;  %v585_v31 = vpop.permute.xlu1 %584 }
 0x210   : > { %657 = vst.msk [vmem:[#allocation3 + $0x108] sm:$0xf] %vm634_vm3, %v583_v29  ;;  %v5437_v44 = vld [vmem:[#allocation3 + $0xf4] sm:$0xf] }
 0x211   : > { %658 = vst.msk [vmem:[#allocation3 + $0x114] sm:$0xf] %vm634_vm3, %v585_v31  ;;  %v2610_v39 = vpop.f32.mrf.mxu1  ;;  %v4961_v17 = vld [vmem:[#allocation3 + $0xfc] sm:$0xf0]  ;;  %v1469_v29 = vld [vmem:[#allocation2 + $0x1a0] sm:$0xff] }
 0x212   : > { %882 = vst.msk [vmem:[#allocation3 + $0x108] sm:$0xf] %vm859_vm4, %v808_v59  ;;  %v2611_v43 = vadd.f32 %v2610_v39, %v2522_v27  ;;  %v4964_v49 = vor.u32 %v5437_v44, %v4961_v17  ;;  %v2701_v59 = vpop.f32.mrf.mxu2  ;;  %v1692_v31 = vld [vmem:[#allocation2 + $0x199] sm:$0xff]  ;;  %v1501_v17 = vpack.c.bf16 %v1469_v29, %v1469_v29  ;;  %v5004_v29 = vor.u32 %v5448_v15, %v5003_v21 }
 0x214   : > { %v6794_v52 = vadd.f32 %v2699_v5, %v2611_v43  ;;  %2629 = vmatmul.bf16.gmra.mxu1 %v4964_v49  ;;  %1046 = vrot.lane.b32.xlu2 %v6677_v36, %s5572_s26  ;;  %v2524_v36 = vadd.f32 %v6806_v18, %v2523_v23  ;;  %v1724_v43 = vpack.c.bf16 %v1692_v31, %v1692_v31 }
 0x215   : > { %1592 = vrot.lane.b32.xlu0 %v6790_v38, %s5571_s21  ;;  %1814 = vrot.lane.b32.xlu1 %v6744_v22, %s5572_s26 }
 0x216   : > { %v1579_v12 = vpop.permute.xlu2 %1578 }
 0x217   : > { %v810_v57 = vpop.permute.xlu0 %809  ;;  %v1033_v6 = vpop.permute.xlu1 %1032 }
 0x218   : > { %883 = vst.msk [vmem:[#allocation3 + $0x114] sm:$0xf] %vm859_vm4, %v810_v57 }
 0x219   : > { %1107 = vst.msk [vmem:[#allocation3 + $0x108] sm:$0xf] %vm1084_vm5, %v1033_v6  ;;  %v2612_v62 = vpop.f32.mrf.mxu1 }
 0x21a   : > { %1108 = vst.msk [vmem:[#allocation3 + $0x114] sm:$0xf] %vm1084_vm5, %v1035_v10  ;;  %v2613_v22 = vadd.f32 %v2612_v62, %v2524_v36 }
 0x21c   : > { %v6812_v16 = vadd.f32 %v2701_v59, %v2613_v22  ;;  %1590 = vrot.lane.b32.xlu2 %v954_v32, %s5571_s21 }
 0x21d   : > { %598 = vrot.lane.b32.xlu0 %v6670_v30, %s5570_s20  ;;  %600 = vrot.lane.b32.xlu1 %v6731_v25, %s5570_s20 }
 0x21e   : > { %v1805_v58 = vpop.permute.xlu2 %1804  ;;  %5114 = vmatmul.msk.bf16.gmra.mxu2 %vm224_vm0, %v5004_v29 }
 0x21f   : > { %v1354_v24 = vpop.permute.xlu0 %1353  ;;  %v1356_v63 = vpop.permute.xlu1 %1355 }
 0x220   : > { %1427 = vst.msk [vmem:[#allocation3 + $0x10c] sm:$0xf] %vm634_vm3, %v1354_v24  ;;  %v4971_v54 = vld [vmem:[#allocation3 + $0x108] sm:$0xf] }
 0x221   : > { %1428 = vst.msk [vmem:[#allocation3 + $0x118] sm:$0xf] %vm634_vm3, %v1356_v63  ;;  %v5441_v2 = vld [vmem:[#allocation3 + $0x110] sm:$0xf0]  ;;  %v2526_v10 = vpop.f32.mrf.mxu0 }
 0x222   : > { %1652 = vst.msk [vmem:[#allocation3 + $0x10c] sm:$0xf] %vm859_vm4, %v1579_v12  ;;  %v4972_v4 = vor.u32 %v5441_v2, %v4971_v54  ;;  %v2527_v44 = vadd.f32 %v6806_v18, %v2526_v10 }
 0x224   : > { %2545 = vmatmul.bf16.gmra.mxu0 %v4972_v4  ;;  %1816 = vrot.lane.b32.xlu2 %v1723_v20, %s5572_s26 }
 0x225   : > { %825 = vrot.lane.b32.xlu0 %v6719_v61, %s5571_s21  ;;  %1048 = vrot.lane.b32.xlu1 %v954_v32, %s5572_s26  ;;  %v2704_v61 = vpop.f32.mrf.mxu2  ;;  %v1500_v32 = vpack.c.bf16 %v1468_v42, %v1468_v42 }
 0x226   : > { %v812_v30 = vpop.permute.xlu2 %811 }
 0x227   : > { %v1581_v25 = vpop.permute.xlu0 %1580  ;;  %v1803_v5 = vpop.permute.xlu1 %1802 }
 0x228   : > { %1653 = vst.msk [vmem:[#allocation3 + $0x118] sm:$0xf] %vm859_vm4, %v1581_v25 }
 0x229   : > { %1876 = vst.msk [vmem:[#allocation3 + $0x10c] sm:$0xf] %vm1084_vm5, %v1803_v5  ;;  %v2528_v23 = vpop.f32.mrf.mxu0 }
 0x22a   : > { %1877 = vst.msk [vmem:[#allocation3 + $0x118] sm:$0xf] %vm1084_vm5, %v1805_v58  ;;  %v2529_v36 = vadd.f32 %v6806_v18, %v2528_v23  ;;  %v1693_v58 = vld [vmem:[#allocation2 + $0x1a1] sm:$0xff] }
 0x22b   : > { %v1725_v4 = vpack.c.bf16 %v1693_v58, %v1693_v58 }
 0x22c   : > { %823 = vrot.lane.b32.xlu2 %v6712_v55, %s5571_s21 }
 0x22d   : > { %1369 = vrot.lane.b32.xlu0 %v6772_v47, %s5570_s20  ;;  %1371 = vrot.lane.b32.xlu1 %v6780_v9, %s5570_s20  ;;  %v2706_v59 = vpop.f32.mrf.mxu2 }
 0x22e   : > { %v1039_v13 = vpop.permute.xlu2 %1038 }
 0x22f   : > { %v587_v28 = vpop.permute.xlu0 %586  ;;  %v589_v27 = vpop.permute.xlu1 %588 }
 0x230   : > { %659 = vst.msk [vmem:[#allocation3 + $0x120] sm:$0xf] %vm634_vm3, %v587_v28  ;;  %v5440_v55 = vld [vmem:[#allocation3 + $0x10c] sm:$0xf] }
 0x231   : > { %660 = vst.msk [vmem:[#allocation3 + $0x12c] sm:$0xf] %vm634_vm3, %v589_v27  ;;  %v2615_v39 = vpop.f32.mrf.mxu1  ;;  %v4973_v47 = vld [vmem:[#allocation3 + $0x114] sm:$0xf0] }
 0x232   : > { %884 = vst.msk [vmem:[#allocation3 + $0x120] sm:$0xf] %vm859_vm4, %v812_v30  ;;  %v2616_v9 = vadd.f32 %v2615_v39, %v2527_v44  ;;  %v4976_v49 = vor.u32 %v5440_v55, %v4973_v47 }
 0x234   : > { %v6840_v20 = vadd.f32 %v2704_v61, %v2616_v9  ;;  %2634 = vmatmul.bf16.gmra.mxu1 %v4976_v49  ;;  %1050 = vrot.lane.b32.xlu2 %v6790_v38, %s5572_s26 }
 0x235   : > { %1596 = vrot.lane.b32.xlu0 %v1501_v17, %s5571_s21  ;;  %1818 = vrot.lane.b32.xlu1 %v1724_v43, %s5572_s26  ;;  %v2709_v31 = vpop.f32.mrf.mxu2 }
 0x236   : > { %v1583_v12 = vpop.permute.xlu2 %1582 }
 0x237   : > { %v814_v57 = vpop.permute.xlu0 %813  ;;  %v1037_v6 = vpop.permute.xlu1 %1036 }
 0x238   : > { %885 = vst.msk [vmem:[#allocation3 + $0x12c] sm:$0xf] %vm859_vm4, %v814_v57 }
 0x239   : > { %1109 = vst.msk [vmem:[#allocation3 + $0x120] sm:$0xf] %vm1084_vm5, %v1037_v6  ;;  %v2617_v62 = vpop.f32.mrf.mxu1 }
 0x23a   : > { %1110 = vst.msk [vmem:[#allocation3 + $0x12c] sm:$0xf] %vm1084_vm5, %v1039_v13  ;;  %v2618_v38 = vadd.f32 %v2617_v62, %v2529_v36 }
 0x23c   : > { %v6850_v22 = vadd.f32 %v2706_v59, %v2618_v38  ;;  %1594 = vrot.lane.b32.xlu2 %v1500_v32, %s5571_s21 }
 0x23d   : > { %v2711_v36 = vpop.f32.mrf.mxu2 }
 0x23e   : > { %v1809_v24 = vpop.permute.xlu2 %1808 }
 0x23f   : > { %v1358_v63 = vpop.permute.xlu0 %1357  ;;  %v1360_v54 = vpop.permute.xlu1 %1359 }
 0x240   : > { %1429 = vst.msk [vmem:[#allocation3 + $0x124] sm:$0xf] %vm634_vm3, %v1358_v63  ;;  %v4983_v2 = vld [vmem:[#allocation3 + $0x120] sm:$0xf] }
 0x241   : > { %1430 = vst.msk [vmem:[#allocation3 + $0x130] sm:$0xf] %vm634_vm3, %v1360_v54  ;;  %v5444_v30 = vld [vmem:[#allocation3 + $0x128] sm:$0xf0]  ;;  %v2531_v61 = vpop.f32.mrf.mxu0 }
 0x242   : > { %1654 = vst.msk [vmem:[#allocation3 + $0x124] sm:$0xf] %vm859_vm4, %v1583_v12  ;;  %v4984_v25 = vor.u32 %v5444_v30, %v4983_v2  ;;  %v2532_v44 = vadd.f32 %v6806_v18, %v2531_v61 }
 0x244   : > { %2550 = vmatmul.bf16.gmra.mxu0 %v4984_v25  ;;  %1820 = vrot.lane.b32.xlu2 %v1725_v4, %s5572_s26  ;;  %v5015_v25 = vld [vmem:[#allocation3 + $0x158] sm:$0xf] }
 0x245   : > { %v2714_v21 = vpop.f32.mrf.mxu2 }
 0x246   : > { %v816_v5 = vpop.permute.xlu2 %815 }
 0x247   : > { %v1585_v8 = vpop.permute.xlu0 %1584  ;;  %v1807_v10 = vpop.permute.xlu1 %1806 }
 0x248   : > { %1655 = vst.msk [vmem:[#allocation3 + $0x130] sm:$0xf] %vm859_vm4, %v1585_v8 }
 0x249   : > { %1878 = vst.msk [vmem:[#allocation3 + $0x124] sm:$0xf] %vm1084_vm5, %v1807_v10  ;;  %v2533_v49 = vpop.f32.mrf.mxu0 }
 0x24a   : > { %1879 = vst.msk [vmem:[#allocation3 + $0x130] sm:$0xf] %vm1084_vm5, %v1809_v24  ;;  %v2534_v57 = vadd.f32 %v6806_v18, %v2533_v49 }
 0x24e   : > { %v1043_v13 = vpop.permute.xlu2 %1042 }
 0x24f   : > { %v591_v28 = vpop.permute.xlu0 %590  ;;  %v593_v27 = vpop.permute.xlu1 %592 }
 0x250   : > { %661 = vst.msk [vmem:[#allocation3 + $0x138] sm:$0xf] %vm634_vm3, %v591_v28  ;;  %v5443_v55 = vld [vmem:[#allocation3 + $0x124] sm:$0xf] }
 0x251   : > { %662 = vst.msk [vmem:[#allocation3 + $0x144] sm:$0xf] %vm634_vm3, %v593_v27  ;;  %v2620_v39 = vpop.f32.mrf.mxu1  ;;  %v4985_v47 = vld [vmem:[#allocation3 + $0x12c] sm:$0xf0] }
 0x252   : > { %886 = vst.msk [vmem:[#allocation3 + $0x138] sm:$0xf] %vm859_vm4, %v816_v5  ;;  %v2621_v17 = vadd.f32 %v2620_v39, %v2532_v44  ;;  %v4988_v43 = vor.u32 %v5443_v55, %v4985_v47  ;;  %v5451_v5 = vld [vmem:[#allocation3 + $0x160] sm:$0xf0] }
 0x253   : > { %v5016_v10 = vor.u32 %v5451_v5, %v5015_v25 }
 0x254   : > { %v6865_v9 = vadd.f32 %v2709_v31, %v2621_v17  ;;  %2639 = vmatmul.bf16.gmra.mxu1 %v4988_v43 }
 0x255   : > { %5115 = vmatmul.msk.bf16.gmra.mxu2 %vm224_vm0, %v5016_v10 }
 0x256   : > { %v1587_v23 = vpop.permute.xlu2 %1586 }
 0x257   : > { %v818_v42 = vpop.permute.xlu0 %817  ;;  %v1041_v12 = vpop.permute.xlu1 %1040 }
 0x258   : > { %887 = vst.msk [vmem:[#allocation3 + $0x144] sm:$0xf] %vm859_vm4, %v818_v42 }
 0x259   : > { %1111 = vst.msk [vmem:[#allocation3 + $0x138] sm:$0xf] %vm1084_vm5, %v1041_v12  ;;  %v2622_v6 = vpop.f32.mrf.mxu1  ;;  %v2716_v12 = vpop.f32.mrf.mxu2 }
 0x25a   : > { %1112 = vst.msk [vmem:[#allocation3 + $0x144] sm:$0xf] %vm1084_vm5, %v1043_v13  ;;  %v2623_v32 = vadd.f32 %v2622_v6, %v2534_v57  ;;  %v1916_v6 = vld [vmem:[#allocation2 + $0x19a] sm:$0xff] }
 0x25c   : > { %v6871_v62 = vadd.f32 %v2711_v36, %v2623_v32  ;;  %v1917_v36 = vld [vmem:[#allocation2 + $0x1a2] sm:$0xff] }
 0x25e   : > { %v1813_v59 = vpop.permute.xlu2 %1812 }
 0x25f   : > { %v1362_v38 = vpop.permute.xlu0 %1361  ;;  %v1364_v58 = vpop.permute.xlu1 %1363 }
 0x260   : > { %1431 = vst.msk [vmem:[#allocation3 + $0x13c] sm:$0xf] %vm634_vm3, %v1362_v38  ;;  %v4995_v24 = vld [vmem:[#allocation3 + $0x138] sm:$0xf]  ;;  %v1949_v38 = vpack.c.bf16 %v1917_v36, %v1917_v36 }
 0x261   : > { %1432 = vst.msk [vmem:[#allocation3 + $0x148] sm:$0xf] %vm634_vm3, %v1364_v58  ;;  %v5447_v63 = vld [vmem:[#allocation3 + $0x140] sm:$0xf0]  ;;  %v2536_v8 = vpop.f32.mrf.mxu0 }
 0x262   : > { %1656 = vst.msk [vmem:[#allocation3 + $0x13c] sm:$0xf] %vm859_vm4, %v1587_v23  ;;  %v4996_v54 = vor.u32 %v5447_v63, %v4995_v24  ;;  %v2537_v31 = vadd.f32 %v6806_v18, %v2536_v8 }
 0x263   : > { %1981 = vst.msk [vmem:[#allocation3 + $0x17c] sm:$0xf] %vm409_vm2, %v1949_v38 }
 0x264   : > { %2555 = vmatmul.bf16.gmra.mxu0 %v4996_v54 }
 0x266   : > { %v820_v2 = vpop.permute.xlu2 %819 }
 0x267   : > { %v1589_v4 = vpop.permute.xlu0 %1588  ;;  %v1811_v30 = vpop.permute.xlu1 %1810 }
 0x268   : > { %1657 = vst.msk [vmem:[#allocation3 + $0x148] sm:$0xf] %vm859_vm4, %v1589_v4 }
 0x269   : > { %1880 = vst.msk [vmem:[#allocation3 + $0x13c] sm:$0xf] %vm1084_vm5, %v1811_v30  ;;  %v2538_v47 = vpop.f32.mrf.mxu0 }
 0x26a   : > { %1881 = vst.msk [vmem:[#allocation3 + $0x148] sm:$0xf] %vm1084_vm5, %v1813_v59  ;;  %v2539_v23 = vadd.f32 %v6806_v18, %v2538_v47  ;;  %v1948_v59 = vpack.c.bf16 %v1916_v6, %v1916_v6  ;;  %v5454_v25 = vld [vmem:[#allocation3 + $0x178] sm:$0xf0] }
 0x26c   : > { %1980 = vst.msk [vmem:[#allocation3 + $0x170] sm:$0xf] %vm409_vm2, %v1948_v59 }
 0x26e   : > { %v1047_v15 = vpop.permute.xlu2 %1046 }
 0x26f   : > { %v595_v61 = vpop.permute.xlu0 %594  ;;  %v597_v29 = vpop.permute.xlu1 %596 }
 0x270   : > { %663 = vst.msk [vmem:[#allocation3 + $0x150] sm:$0xf] %vm634_vm3, %v595_v61  ;;  %v5446_v13 = vld [vmem:[#allocation3 + $0x13c] sm:$0xf] }
 0x271   : > { %664 = vst.msk [vmem:[#allocation3 + $0x15c] sm:$0xf] %vm634_vm3, %v597_v29  ;;  %v2625_v28 = vpop.f32.mrf.mxu1  ;;  %v4997_v27 = vld [vmem:[#allocation3 + $0x144] sm:$0xf0] }
 0x272   : > { %888 = vst.msk [vmem:[#allocation3 + $0x150] sm:$0xf] %vm859_vm4, %v820_v2  ;;  %v2626_v44 = vadd.f32 %v2625_v28, %v2537_v31  ;;  %v5000_v55 = vor.u32 %v5446_v13, %v4997_v27  ;;  %v2719_v27 = vpop.f32.mrf.mxu2 }
 0x273   : > { %v5027_v30 = vld [vmem:[#allocation3 + $0x170] sm:$0xf] }
 0x274   : > { %v6884_v39 = vadd.f32 %v2714_v21, %v2626_v44  ;;  %2644 = vmatmul.bf16.gmra.mxu1 %v5000_v55  ;;  %v5028_v10 = vor.u32 %v5454_v25, %v5027_v30 }
 0x276   : > { %v1591_v17 = vpop.permute.xlu2 %1590  ;;  %5116 = vmatmul.msk.bf16.gmra.mxu2 %vm224_vm0, %v5028_v10 }
 0x277   : > { %v822_v43 = vpop.permute.xlu0 %821  ;;  %v1045_v49 = vpop.permute.xlu1 %1044 }
 0x278   : > { %889 = vst.msk [vmem:[#allocation3 + $0x15c] sm:$0xf] %vm859_vm4, %v822_v43 }
 0x279   : > { %1113 = vst.msk [vmem:[#allocation3 + $0x150] sm:$0xf] %vm1084_vm5, %v1045_v49  ;;  %v2627_v42 = vpop.f32.mrf.mxu1 }
 0x27a   : > { %1114 = vst.msk [vmem:[#allocation3 + $0x15c] sm:$0xf] %vm1084_vm5, %v1047_v15  ;;  %v2628_v57 = vadd.f32 %v2627_v42, %v2539_v23  ;;  %v6920_v25 = vpop.f32.mrf.mxu2 }
 0x27c   : > { %v6890_v32 = vadd.f32 %v2716_v12, %v2628_v57 }
 0x27e   : > { %v1817_v58 = vpop.permute.xlu2 %1816 }
 0x27f   : > { %v1366_v24 = vpop.permute.xlu0 %1365  ;;  %v1368_v63 = vpop.permute.xlu1 %1367 }
 0x280   : > { %1433 = vst.msk [vmem:[#allocation3 + $0x154] sm:$0xf] %vm634_vm3, %v1366_v24  ;;  %v5007_v54 = vld [vmem:[#allocation3 + $0x150] sm:$0xf] }
 0x281   : > { %1434 = vst.msk [vmem:[#allocation3 + $0x160] sm:$0xf] %vm634_vm3, %v1368_v63  ;;  %v5450_v2 = vld [vmem:[#allocation3 + $0x158] sm:$0xf0]  ;;  %v2541_v15 = vpop.f32.mrf.mxu0 }
 0x282   : > { %1658 = vst.msk [vmem:[#allocation3 + $0x154] sm:$0xf] %vm859_vm4, %v1591_v17  ;;  %v5008_v4 = vor.u32 %v5450_v2, %v5007_v54  ;;  %v2542_v31 = vadd.f32 %v6806_v18, %v2541_v15  ;;  %v6926_v10 = vpop.f32.mrf.mxu2 }
 0x284   : > { %2560 = vmatmul.bf16.gmra.mxu0 %v5008_v4 }
 0x286   : > { %v824_v21 = vpop.permute.xlu2 %823 }
 0x287   : > { %v1593_v5 = vpop.permute.xlu0 %1592  ;;  %v1815_v8 = vpop.permute.xlu1 %1814 }
 0x288   : > { %1659 = vst.msk [vmem:[#allocation3 + $0x160] sm:$0xf] %vm859_vm4, %v1593_v5 }
 0x289   : > { %1882 = vst.msk [vmem:[#allocation3 + $0x154] sm:$0xf] %vm1084_vm5, %v1815_v8  ;;  %v6916_v4 = vpop.f32.mrf.mxu0 }
 0x28a   : > { %1883 = vst.msk [vmem:[#allocation3 + $0x160] sm:$0xf] %vm1084_vm5, %v1817_v58 }
 0x28e   : > { %v1051_v17 = vpop.permute.xlu2 %1050 }
 0x28f   : > { %v599_v61 = vpop.permute.xlu0 %598  ;;  %v601_v29 = vpop.permute.xlu1 %600 }
 0x290   : > { %665 = vst.msk [vmem:[#allocation3 + $0x168] sm:$0xf] %vm634_vm3, %v599_v61  ;;  %v5449_v13 = vld [vmem:[#allocation3 + $0x154] sm:$0xf]  ;;  %v6932_v61 = vpop.f32.mrf.mxu2 }
 0x291   : > { %666 = vst.msk [vmem:[#allocation3 + $0x174] sm:$0xf] %vm634_vm3, %v601_v29  ;;  %v2630_v28 = vpop.f32.mrf.mxu1  ;;  %v5009_v44 = vld [vmem:[#allocation3 + $0x15c] sm:$0xf0] }
 0x292   : > { %890 = vst.msk [vmem:[#allocation3 + $0x168] sm:$0xf] %vm859_vm4, %v824_v21  ;;  %v2631_v55 = vadd.f32 %v2630_v28, %v2542_v31  ;;  %v5012_v47 = vor.u32 %v5449_v13, %v5009_v44  ;;  %v2494_v31 = vadd.f32 %v6806_v18, %v6389_v60  ;;  %v2499_v28 = vadd.f32 %v6806_v18, %v6461_v41 }
 0x294   : > { %v6905_v43 = vadd.f32 %v2719_v27, %v2631_v55  ;;  %2649 = vmatmul.bf16.gmra.mxu1 %v5012_v47  ;;  %v2583_v13 = vadd.f32 %v6400_v1, %v2494_v31  ;;  %v2588_v47 = vadd.f32 %v6472_v50, %v2499_v28  ;;  %v2509_v50 = vadd.f32 %v6806_v18, %v6615_v37 }
 0x296   : > { %v1595_v42 = vpop.permute.xlu2 %1594  ;;  %v6946_v55 = vadd.f32 %v6402_v3, %v2583_v13  ;;  %v6956_v1 = vadd.f32 %v6474_v51, %v2588_v47  ;;  %v2752_v3 = vsel %vm224_vm0, %v6435_v33, 0.0  ;;  %v2598_v51 = vadd.f32 %v6628_v40, %v2509_v50 }
 0x297   : > { %v826_v49 = vpop.permute.xlu0 %825  ;;  %v1049_v23 = vpop.permute.xlu1 %1048 }
 0x298   : > { %891 = vst.msk [vmem:[#allocation3 + $0x174] sm:$0xf] %vm859_vm4, %v826_v49  ;;  %v6943_v44 = vpop.f32.mrf.mxu2  ;;  %v2750_v60 = vsel %vm224_vm0, %v6946_v55, 0.0 }
 0x299   : > { %1115 = vst.msk [vmem:[#allocation3 + $0x168] sm:$0xf] %vm1084_vm5, %v1049_v23  ;;  %v6918_v30 = vpop.f32.mrf.mxu1  ;;  %v2749_v23 = vsel %vm224_vm0, %v6363_v46, 0.0 }
 0x29a   : > { %1116 = vst.msk [vmem:[#allocation3 + $0x174] sm:$0xf] %vm1084_vm5, %v1051_v17  ;;  %v2504_v17 = vadd.f32 %v6806_v18, %v6540_v26  ;;  %v2751_v26 = vadd.f32 %v2750_v60, %v2749_v23 }
 0x29c   : > { %v2593_v41 = vadd.f32 %v6551_v53, %v2504_v17 }
 0x29e   : > { %v1821_v38 = vpop.permute.xlu2 %1820 }
 0x29f   : > { %v1370_v12 = vpop.permute.xlu0 %1369  ;;  %v1372_v57 = vpop.permute.xlu1 %1371 }
 0x2a0   : > { %1435 = vst.msk [vmem:[#allocation3 + $0x16c] sm:$0xf] %vm634_vm3, %v1370_v12  ;;  %v5019_v6 = vld [vmem:[#allocation3 + $0x168] sm:$0xf]  ;;  %v6968_v12 = vadd.f32 %v6553_v45, %v2593_v41  ;;  %v2760_v45 = vsel %vm224_vm0, %v6583_v14, 0.0  ;;  %v2768_v41 = vsel %vm224_vm0, %v6734_v35, 0.0 }
 0x2a1   : > { %1436 = vst.msk [vmem:[#allocation3 + $0x178] sm:$0xf] %vm634_vm3, %v1372_v57  ;;  %v5453_v36 = vld [vmem:[#allocation3 + $0x170] sm:$0xf0]  ;;  %v6922_v5 = vpop.f32.mrf.mxu0  ;;  %v2753_v57 = vadd.f32 %v2752_v3, %v2751_v26  ;;  %v2772_v3 = vsel %vm224_vm0, %v6794_v52, 0.0 }
 0x2a2   : > { %1660 = vst.msk [vmem:[#allocation3 + $0x16c] sm:$0xf] %vm859_vm4, %v1595_v42  ;;  %v5020_v59 = vor.u32 %v5453_v36, %v5019_v6  ;;  %v2754_v42 = vsel %vm224_vm0, %v6956_v1, 0.0  ;;  %v6971_v6 = vpop.f32.mrf.mxu2  ;;  %v2756_v36 = vsel %vm224_vm0, %v6506_v19, 0.0  ;;  %v2758_v37 = vsel %vm224_vm0, %v6968_v12, 0.0 }
 0x2a4   : > { %2565 = vmatmul.bf16.gmra.mxu0 %v5020_v59  ;;  %v2755_v59 = vadd.f32 %v2754_v42, %v2753_v57 }
 0x2a7   : > { %v1597_v58 = vpop.permute.xlu0 %1596  ;;  %v1819_v24 = vpop.permute.xlu1 %1818 }
 0x2a8   : > { %1661 = vst.msk [vmem:[#allocation3 + $0x178] sm:$0xf] %vm859_vm4, %v1597_v58  ;;  %v6978_v58 = vadd.f32 %v6630_v11, %v2598_v51  ;;  %v2764_v11 = vsel %vm224_vm0, %v6660_v7, 0.0  ;;  %v2774_v51 = vsel %vm224_vm0, %v6812_v16, 0.0 }
 0x2a9   : > { %1884 = vst.msk [vmem:[#allocation3 + $0x16c] sm:$0xf] %vm1084_vm5, %v1819_v24  ;;  %v6928_v21 = vpop.f32.mrf.mxu0  ;;  %v2757_v24 = vadd.f32 %v2756_v36, %v2755_v59  ;;  %v2776_v59 = vsel %vm224_vm0, %v6840_v20, 0.0 }
 0x2aa   : > { %1885 = vst.msk [vmem:[#allocation3 + $0x178] sm:$0xf] %vm1084_vm5, %v1821_v38  ;;  %v6988_v13 = vpop.f32.mrf.mxu2 }
 0x2ab   : > { %v2759_v40 = vadd.f32 %v2758_v37, %v2757_v24  ;;  %v2778_v24 = vsel %vm224_vm0, %v6850_v22, 0.0 }
 0x2b0   : > { %v5452_v63 = vld [vmem:[#allocation3 + $0x16c] sm:$0xf] }
 0x2b1   : > { %v5021_v54 = vld [vmem:[#allocation3 + $0x174] sm:$0xf0]  ;;  %v6924_v8 = vpop.f32.mrf.mxu1 }
 0x2b2   : > { %v5024_v2 = vor.u32 %v5452_v63, %v5021_v54  ;;  %v2762_v63 = vsel %vm224_vm0, %v6978_v58, 0.0  ;;  %v6986_v54 = vadd.f32 %v6701_v48, %v6680_v34  ;;  %v2770_v34 = vsel %vm224_vm0, %v6752_v56, 0.0  ;;  %v2736_v42 = vpop.f32.mrf.mxu2 }
 0x2b4   : > { %2654 = vmatmul.bf16.gmra.mxu1 %v5024_v2  ;;  %v2761_v2 = vadd.f32 %v2760_v45, %v2759_v40  ;;  %v2766_v47 = vsel %vm224_vm0, %v6986_v54, 0.0  ;;  %v2780_v40 = vsel %vm224_vm0, %v6865_v9, 0.0 }
 0x2b6   : > { %v2763_v28 = vadd.f32 %v2762_v63, %v2761_v2  ;;  %v2544_v63 = vadd.f32 %v6806_v18, %v6916_v4 }
 0x2b8   : > { %v2765_v17 = vadd.f32 %v2764_v11, %v2763_v28 }
 0x2b9   : > { %v6930_v15 = vpop.f32.mrf.mxu1 }
 0x2ba   : > { %v2767_v23 = vadd.f32 %v2766_v47, %v2765_v17  ;;  %v2782_v47 = vsel %vm224_vm0, %v6871_v62, 0.0  ;;  %v2633_v17 = vadd.f32 %v6918_v30, %v2544_v63 }
 0x2bc   : > { %v2769_v48 = vadd.f32 %v2768_v41, %v2767_v23  ;;  %v2547_v41 = vadd.f32 %v6806_v18, %v6922_v5 }
 0x2be   : > { %v2771_v50 = vadd.f32 %v2770_v34, %v2769_v48  ;;  %v2784_v34 = vsel %vm224_vm0, %v6884_v39, 0.0  ;;  %v2549_v48 = vadd.f32 %v6806_v18, %v6928_v21  ;;  %v2636_v4 = vadd.f32 %v6924_v8, %v2547_v41 }
 0x2c0   : > { %v2773_v57 = vadd.f32 %v2772_v3, %v2771_v50  ;;  %v2638_v30 = vadd.f32 %v6930_v15, %v2549_v48  ;;  %v7031_v21 = vadd.f32 %v6926_v10, %v2636_v4 }
 0x2c1   : > { %v6934_v29 = vpop.f32.mrf.mxu0 }
 0x2c2   : > { %v2775_v37 = vadd.f32 %v2774_v51, %v2773_v57  ;;  %v2786_v51 = vsel %vm224_vm0, %v6890_v32, 0.0  ;;  %v7023_v57 = vadd.f32 %v6920_v25, %v2633_v17  ;;  %v2552_v5 = vadd.f32 %v6806_v18, %v6934_v29 }
 0x2c3   : > { %v7039_v15 = vadd.f32 %v6932_v61, %v2638_v30  ;;  %v2792_v10 = vsel %vm224_vm0, %v7031_v21, 0.0 }
 0x2c4   : > { %v2777_v45 = vadd.f32 %v2776_v59, %v2775_v37  ;;  %v2788_v37 = vsel %vm224_vm0, %v6905_v43, 0.0  ;;  %v2790_v25 = vsel %vm224_vm0, %v7023_v57, 0.0 }
 0x2c5   : > { %v2794_v61 = vsel %vm224_vm0, %v7039_v15, 0.0 }
 0x2c6   : > { %v2779_v2 = vadd.f32 %v2778_v24, %v2777_v45 }
 0x2c8   : > { %v2781_v23 = vadd.f32 %v2780_v40, %v2779_v2 }
 0x2c9   : > { %v6951_v49 = vpop.f32.mrf.mxu0 }
 0x2ca   : > { %v2783_v3 = vadd.f32 %v2782_v47, %v2781_v23  ;;  %v2554_v8 = vadd.f32 %v6806_v18, %v6951_v49 }
 0x2cc   : > { %v2785_v59 = vadd.f32 %v2784_v34, %v2783_v3 }
 0x2ce   : > { %v2787_v45 = vadd.f32 %v2786_v51, %v2785_v59 }
 0x2d0   : > { %v2789_v63 = vadd.f32 %v2788_v37, %v2787_v45 }
 0x2d1   : > { %v6941_v27 = vpop.f32.mrf.mxu1 }
 0x2d2   : > { %v2641_v24 = vadd.f32 %v6941_v27, %v2552_v5  ;;  %v2791_v41 = vadd.f32 %v2790_v25, %v2789_v63  ;;  %v5573_v63 = vmov 256.0  }
 0x2d3   : > { %5548 = vrcp.f32 %v5573_v63 }
 0x2d4   : > { %v7045_v49 = vadd.f32 %v6943_v44, %v2641_v24  ;;  %v2793_v48 = vadd.f32 %v2792_v10, %v2791_v41 }
 0x2d6   : > { %v2796_v4 = vsel %vm224_vm0, %v7045_v49, 0.0  ;;  %v2795_v3 = vadd.f32 %v2794_v61, %v2793_v48 }
 0x2d8   : > { %v2739_v28 = vpop.f32.mrf.mxu2 }
 0x2d9   : > { %v2642_v53 = vpop.f32.mrf.mxu1 }
 0x2da   : > { %v2643_v29 = vadd.f32 %v2642_v53, %v2554_v8 }
 0x2dc   : > { %v7051_v53 = vadd.f32 %v6971_v6, %v2643_v29 }
 0x2de   : > { %v2798_v51 = vsel %vm224_vm0, %v7051_v53, 0.0 }
 0x2e0   : > { %v2741_v47 = vpop.f32.mrf.mxu2 }
 0x2e1   : > { %v2556_v38 = vpop.f32.mrf.mxu0 }
 0x2e2   : > { %v2557_v40 = vadd.f32 %v6806_v18, %v2556_v38 }
 0x2e9   : > { %v2558_v60 = vpop.f32.mrf.mxu0 }
 0x2ea   : > { %v2559_v27 = vadd.f32 %v6806_v18, %v2558_v60 }
 0x2f1   : > { %v2645_v31 = vpop.f32.mrf.mxu1 }
 0x2f2   : > { %v2646_v17 = vadd.f32 %v2645_v31, %v2557_v40 }
 0x2f4   : > { %v7057_v44 = vadd.f32 %v6988_v13, %v2646_v17 }
 0x2f6   : > { %v2800_v37 = vsel %vm224_vm0, %v7057_v44, 0.0 }
 0x2f9   : > { %v2647_v26 = vpop.f32.mrf.mxu1  ;;  %v2744_v5 = vpop.f32.mrf.mxu2 }
 0x2fa   : > { %v2648_v38 = vadd.f32 %v2647_v26, %v2559_v27 }
 0x2fc   : > { %v7062_v30 = vadd.f32 %v2736_v42, %v2648_v38  ;;  %v5549_v38 = vpop.eup %5548 }
 0x2fd   : > { %vm2823_vm6 = vweird.f32 %v5549_v38 }
 0x301   : > { %v2561_v36 = vpop.f32.mrf.mxu0 }
 0x302   : > { %v2562_v34 = vadd.f32 %v6806_v18, %v2561_v36  ;;  %v2797_v36 = vadd.f32 %v2796_v4, %v2795_v3 }
 0x309   : > { %v2563_v50 = vpop.f32.mrf.mxu0 }
 0x30a   : > { %v2564_v31 = vadd.f32 %v6806_v18, %v2563_v50  ;;  %v2799_v50 = vadd.f32 %v2798_v51, %v2797_v36 }
 0x30c   : > { %v2801_v42 = vadd.f32 %v2800_v37, %v2799_v50 }
 0x311   : > { %v2650_v11 = vpop.f32.mrf.mxu1 }
 0x312   : > { %v2651_v60 = vadd.f32 %v2650_v11, %v2562_v34  ;;  %v2802_v11 = vsel %vm224_vm0, %v7062_v30, 0.0 }
 0x313   : > { %v2803_v40 = vadd.f32 %v2802_v11, %v2801_v42 }
 0x314   : > { %v7067_v13 = vadd.f32 %v2739_v28, %v2651_v60 }
 0x316   : > { %v2804_v25 = vsel %vm224_vm0, %v7067_v13, 0.0 }
 0x317   : > { %v2805_v10 = vadd.f32 %v2804_v25, %v2803_v40 }
 0x319   : > { %v2652_v2 = vpop.f32.mrf.mxu1 }
 0x31a   : > { %v2653_v6 = vadd.f32 %v2652_v2, %v2564_v31  ;;  %v2819_v31 = vmul.f32 256.0, %v5549_v38 }
 0x31c   : > { %v7071_v24 = vadd.f32 %v2741_v47, %v2653_v6 }
 0x31e   : > { %v2806_v28 = vsel %vm224_vm0, %v7071_v24, 0.0 }
 0x31f   : > { %v2807_v41 = vadd.f32 %v2806_v28, %v2805_v10 }
 0x321   : > { %v2566_v23 = vpop.f32.mrf.mxu0 }
 0x322   : > { %v2567_v26 = vadd.f32 %v6806_v18, %v2566_v23  ;;  %v2746_v23 = vpop.f32.mrf.mxu2 }
 0x329   : > { %v2568_v45 = vpop.f32.mrf.mxu0 }
 0x32a   : > { %v2569_v2 = vadd.f32 %v6806_v18, %v2568_v45  ;;  %v2820_v18 = vsub.f32 1.0, %v2819_v31 }
 0x331   : > { %v2655_v59 = vpop.f32.mrf.mxu1 }
 0x332   : > { %v2656_v8 = vadd.f32 %v2655_v59, %v2567_v26  ;;  %v2821_v26 = vmul.f32 %v5549_v38, %v2820_v18 }
 0x334   : > { %v7075_v29 = vadd.f32 %v2744_v5, %v2656_v8  ;;  %v2822_v5 = vadd.f32 %v5549_v38, %v2821_v26 }
 0x336   : > { %v2808_v47 = vsel %vm224_vm0, %v7075_v29, 0.0  ;;  %v7086_v37 = vsel %vm2823_vm6, %v5549_v38, %v2822_v5 }
 0x337   : > { %v2809_v34 = vadd.f32 %v2808_v47, %v2807_v41 }
 0x339   : > { %v2657_v27 = vpop.f32.mrf.mxu1 }
 0x33a   : > { %v2658_v17 = vadd.f32 %v2657_v27, %v2569_v2 }
 0x33c   : > { %v7082_v61 = vadd.f32 %v2746_v23, %v2658_v17 }
 0x33e   : > { %v2810_v48 = vsel %vm224_vm0, %v7082_v61, 0.0 }
 0x33f   : > { %v2811_v4 = vadd.f32 %v2810_v48, %v2809_v34 }
 0x341   : > { %v2812_v60 = vrot.slane %v2811_v4, 4 }
 0x343   : > { %v2813_v3 = vadd.f32 %v2812_v60, %v2811_v4 }
 0x345   : > { %v2814_v51 = vrot.slane %v2813_v3, 2 }
 0x347   : > { %v2815_v6 = vadd.f32 %v2814_v51, %v2813_v3 }
 0x349   : > { %v2816_v36 = vrot.slane %v2815_v6, 1 }
 0x34b   : > { %v2817_v59 = vadd.f32 %v2816_v36, %v2815_v6 }
 0x34d   : > { %v7089_v8 = vmul.f32 %v7086_v37, %v2817_v59 }
 0x34f   : > { %v7093_v50 = vsub.f32 %v6363_v46, %v7089_v8  ;;  %v7097_v11 = vsub.f32 %v6946_v55, %v7089_v8  ;;  %v7101_v42 = vsub.f32 %v6435_v33, %v7089_v8  ;;  %v7105_v45 = vsub.f32 %v6956_v1, %v7089_v8 }
 0x350   : > { %v7113_v46 = vsub.f32 %v6506_v19, %v7089_v8  ;;  %v7119_v33 = vsub.f32 %v6968_v12, %v7089_v8  ;;  %v7127_v10 = vsub.f32 %v6583_v14, %v7089_v8  ;;  %v7134_v12 = vsub.f32 %v6978_v58, %v7089_v8 }
 0x351   : > { %v2858_v25 = vmul.f32 %v7093_v50, %v7093_v50  ;;  %v2859_v40 = vmul.f32 %v7097_v11, %v7097_v11  ;;  %v2860_v55 = vmul.f32 %v7101_v42, %v7101_v42  ;;  %v2861_v1 = vmul.f32 %v7105_v45, %v7105_v45 }
 0x352   : > { %v2862_v19 = vmul.f32 %v7113_v46, %v7113_v46  ;;  %v2863_v17 = vmul.f32 %v7119_v33, %v7119_v33  ;;  %v7141_v14 = vsub.f32 %v6660_v7, %v7089_v8  ;;  %v2864_v38 = vmul.f32 %v7127_v10, %v7127_v10 }
 0x353   : > { %v2890_v63 = vsel %vm224_vm0, %v2858_v25, 0.0  ;;  %v2891_v28 = vsel %vm224_vm0, %v2859_v40, 0.0  ;;  %v2893_v27 = vsel %vm224_vm0, %v2860_v55, 0.0  ;;  %v2895_v41 = vsel %vm224_vm0, %v2861_v1, 0.0 }
 0x354   : > { %v2892_v2 = vadd.f32 %v2891_v28, %v2890_v63  ;;  %v2897_v34 = vsel %vm224_vm0, %v2862_v19, 0.0  ;;  %v7148_v58 = vsub.f32 %v6986_v54, %v7089_v8  ;;  %v2865_v4 = vmul.f32 %v7134_v12, %v7134_v12 }
 0x355   : > { %v2899_v31 = vsel %vm224_vm0, %v2863_v17, 0.0  ;;  %v7155_v7 = vsub.f32 %v6734_v35, %v7089_v8  ;;  %v2866_v3 = vmul.f32 %v7141_v14, %v7141_v14  ;;  %v2901_v18 = vsel %vm224_vm0, %v2864_v38, 0.0 }
 0x356   : > { %v2894_v47 = vadd.f32 %v2893_v27, %v2892_v2  ;;  %v7162_v54 = vsub.f32 %v6752_v56, %v7089_v8  ;;  %v2867_v6 = vmul.f32 %v7148_v58, %v7148_v58  ;;  %v2903_v26 = vsel %vm224_vm0, %v2865_v4, 0.0 }
 0x357   : > { %v7169_v35 = vsub.f32 %v6794_v52, %v7089_v8  ;;  %v2868_v5 = vmul.f32 %v7155_v7, %v7155_v7  ;;  %v2905_v59 = vsel %vm224_vm0, %v2866_v3, 0.0  ;;  %v7176_v56 = vsub.f32 %v6812_v16, %v7089_v8 }
 0x358   : > { %v2896_v23 = vadd.f32 %v2895_v41, %v2894_v47  ;;  %v2869_v40 = vmul.f32 %v7162_v54, %v7162_v54  ;;  %v2907_v55 = vsel %vm224_vm0, %v2867_v6, 0.0  ;;  %v7183_v52 = vsub.f32 %v6840_v20, %v7089_v8 }
 0x359   : > { %v2870_v63 = vmul.f32 %v7169_v35, %v7169_v35  ;;  %v2909_v28 = vsel %vm224_vm0, %v2868_v5, 0.0  ;;  %v7190_v16 = vsub.f32 %v6850_v22, %v7089_v8  ;;  %v2871_v19 = vmul.f32 %v7176_v56, %v7176_v56 }
 0x35a   : > { %v2898_v48 = vadd.f32 %v2897_v34, %v2896_v23  ;;  %v2911_v27 = vsel %vm224_vm0, %v2869_v40, 0.0  ;;  %v7197_v20 = vsub.f32 %v6865_v9, %v7089_v8  ;;  %v2872_v17 = vmul.f32 %v7183_v52, %v7183_v52 }
 0x35b   : > { %v2913_v41 = vsel %vm224_vm0, %v2870_v63, 0.0  ;;  %v7204_v22 = vsub.f32 %v6871_v62, %v7089_v8  ;;  %v2873_v38 = vmul.f32 %v7190_v16, %v7190_v16  ;;  %v2915_v34 = vsel %vm224_vm0, %v2871_v19, 0.0 }
 0x35c   : > { %v2900_v60 = vadd.f32 %v2899_v31, %v2898_v48  ;;  %v7211_v9 = vsub.f32 %v6884_v39, %v7089_v8  ;;  %v2874_v4 = vmul.f32 %v7197_v20, %v7197_v20  ;;  %v2917_v31 = vsel %vm224_vm0, %v2872_v17, 0.0 }
 0x35d   : > { %v7218_v62 = vsub.f32 %v6890_v32, %v7089_v8  ;;  %v2875_v3 = vmul.f32 %v7204_v22, %v7204_v22  ;;  %v7225_v39 = vsub.f32 %v6905_v43, %v7089_v8  ;;  %v7232_v32 = vsub.f32 %v7023_v57, %v7089_v8 }
 0x35e   : > { %v2902_v51 = vadd.f32 %v2901_v18, %v2900_v60  ;;  %v2919_v18 = vsel %vm224_vm0, %v2873_v38, 0.0  ;;  %v2876_v6 = vmul.f32 %v7211_v9, %v7211_v9  ;;  %v7239_v43 = vsub.f32 %v7031_v21, %v7089_v8 }
 0x35f   : > { %v2877_v5 = vmul.f32 %v7218_v62, %v7218_v62  ;;  %v2878_v40 = vmul.f32 %v7225_v39, %v7225_v39  ;;  %v7246_v57 = vsub.f32 %v7039_v15, %v7089_v8  ;;  %v2879_v63 = vmul.f32 %v7232_v32, %v7232_v32 }
 0x360   : > { %v2904_v36 = vadd.f32 %v2903_v26, %v2902_v51  ;;  %v2921_v26 = vsel %vm224_vm0, %v2874_v4, 0.0  ;;  %v7253_v21 = vsub.f32 %v7045_v49, %v7089_v8  ;;  %v2880_v19 = vmul.f32 %v7239_v43, %v7239_v43 }
 0x361   : > { %v7260_v15 = vsub.f32 %v7051_v53, %v7089_v8  ;;  %v2881_v17 = vmul.f32 %v7246_v57, %v7246_v57  ;;  %v7267_v49 = vsub.f32 %v7057_v44, %v7089_v8  ;;  %v7274_v53 = vsub.f32 %v7062_v30, %v7089_v8 }
 0x362   : > { %v2906_v25 = vadd.f32 %v2905_v59, %v2904_v36  ;;  %v2923_v59 = vsel %vm224_vm0, %v2875_v3, 0.0  ;;  %v2882_v38 = vmul.f32 %v7253_v21, %v7253_v21  ;;  %v2854_v44 = vsub.f32 %v7067_v13, %v7089_v8 }
 0x363   : > { %v2883_v4 = vmul.f32 %v7260_v15, %v7260_v15  ;;  %v2884_v3 = vmul.f32 %v7267_v49, %v7267_v49  ;;  %v2885_v30 = vmul.f32 %v7274_v53, %v7274_v53 }
 0x364   : > { %v2908_v1 = vadd.f32 %v2907_v55, %v2906_v25  ;;  %v2925_v55 = vsel %vm224_vm0, %v2876_v6, 0.0  ;;  %v2855_v6 = vsub.f32 %v7071_v24, %v7089_v8 }
 0x365   : > { %v2941_v13 = vsel %vm224_vm0, %v2884_v3, 0.0 }
 0x366   : > { %v2910_v2 = vadd.f32 %v2909_v28, %v2908_v1  ;;  %v2927_v28 = vsel %vm224_vm0, %v2877_v5, 0.0  ;;  %v2856_v5 = vsub.f32 %v7075_v29, %v7089_v8 }
 0x368   : > { %v2912_v47 = vadd.f32 %v2911_v27, %v2910_v2  ;;  %v2929_v27 = vsel %vm224_vm0, %v2878_v40, 0.0  ;;  %v2857_v40 = vsub.f32 %v7082_v61, %v7089_v8 }
 0x36a   : > { %v2914_v23 = vadd.f32 %v2913_v41, %v2912_v47  ;;  %v2931_v41 = vsel %vm224_vm0, %v2879_v63, 0.0  ;;  %v2888_v63 = vmul.f32 %v2856_v5, %v2856_v5 }
 0x36c   : > { %v2916_v48 = vadd.f32 %v2915_v34, %v2914_v23  ;;  %v2933_v34 = vsel %vm224_vm0, %v2880_v19, 0.0  ;;  %v2889_v19 = vmul.f32 %v2857_v40, %v2857_v40  ;;  %v2949_v29 = vsel %vm224_vm0, %v2888_v63, 0.0 }
 0x36e   : > { %v2918_v60 = vadd.f32 %v2917_v31, %v2916_v48  ;;  %v2935_v31 = vsel %vm224_vm0, %v2881_v17, 0.0 }
 0x370   : > { %v2920_v51 = vadd.f32 %v2919_v18, %v2918_v60  ;;  %v2937_v18 = vsel %vm224_vm0, %v2882_v38, 0.0 }
 0x372   : > { %v2922_v36 = vadd.f32 %v2921_v26, %v2920_v51  ;;  %v2939_v26 = vsel %vm224_vm0, %v2883_v4, 0.0 }
 0x374   : > { %v2924_v25 = vadd.f32 %v2923_v59, %v2922_v36  ;;  %v2886_v59 = vmul.f32 %v2854_v44, %v2854_v44 }
 0x376   : > { %v2926_v1 = vadd.f32 %v2925_v55, %v2924_v25  ;;  %v2887_v55 = vmul.f32 %v2855_v6, %v2855_v6 }
 0x378   : > { %v2928_v2 = vadd.f32 %v2927_v28, %v2926_v1  ;;  %v2943_v1 = vsel %vm224_vm0, %v2885_v30, 0.0  ;;  %v2945_v28 = vsel %vm224_vm0, %v2886_v59, 0.0  ;;  %v7303_v59 = vld [vmem:[%s7923_s3] ss:$0 sm:$0xff] }
 0x37a   : > { %v2930_v47 = vadd.f32 %v2929_v27, %v2928_v2  ;;  %v2947_v27 = vsel %vm224_vm0, %v2887_v55, 0.0 }
 0x37c   : > { %v2932_v23 = vadd.f32 %v2931_v41, %v2930_v47  ;;  %v2951_v41 = vsel %vm224_vm0, %v2889_v19, 0.0 }
 0x37e   : > { %v2934_v48 = vadd.f32 %v2933_v34, %v2932_v23 }
 0x380   : > { %v2936_v60 = vadd.f32 %v2935_v31, %v2934_v48 }
 0x382   : > { %v2938_v51 = vadd.f32 %v2937_v18, %v2936_v60 }
 0x384   : > { %v2940_v36 = vadd.f32 %v2939_v26, %v2938_v51 }
 0x386   : > { %v2942_v25 = vadd.f32 %v2941_v13, %v2940_v36 }
 0x388   : > { %v2944_v24 = vadd.f32 %v2943_v1, %v2942_v25 }
 0x38a   : > { %v2946_v2 = vadd.f32 %v2945_v28, %v2944_v24 }
 0x38c   : > { %v2948_v47 = vadd.f32 %v2947_v27, %v2946_v2 }
 0x38e   : > { %v2950_v17 = vadd.f32 %v2949_v29, %v2948_v47 }
 0x390   : > { %v2952_v23 = vadd.f32 %v2951_v41, %v2950_v17  ;;  %v3375_v41 = vld [vmem:[#allocation2 + $0x2] sm:$0xff] }
 0x392   : > { %v2953_v38 = vrot.slane %v2952_v23, 4 }
 0x394   : > { %v2954_v61 = vadd.f32 %v2953_v38, %v2952_v23  ;;  %v3383_v23 = vpack.c.bf16 %v3375_v41, %v3375_v41 }
 0x396   : > { %v2955_v8 = vrot.slane %v2954_v61, 2  ;;  %3399 = vrot.lane.b32.xlu2 %v3383_v23, %s5571_s21 }
 0x398   : > { %v2956_v34 = vadd.f32 %v2955_v8, %v2954_v61  ;;  %v3319_v8 = vld [vmem:[#allocation2 + $0x1] sm:$0xff] }
 0x399   : > { %4205 = vst.msk [vmem:[#allocation2] sm:$0x3f] %vm4204_vm10, %v5569_v0 }
 0x39a   : > { %v2957_v48 = vrot.slane %v2956_v34, 1 }
 0x39c   : > { %v2958_v4 = vadd.f32 %v2957_v48, %v2956_v34 }
 0x39e   : > { %v2959_v31 = vmul.f32 %v2958_v4, %v7086_v37  ;;  %v7310_v37 = vld [vmem:[%s7924_s4] ss:$0 sm:$0xff] }
 0x3a0   : > { %v2960_v60 = vadd.f32 1e-05, %v2959_v31 }
 0x3a2   : > { %5550 = vrsqrt.f32 %v2960_v60  ;;  %vm2967_vm8 = vweird.f32 %v2960_v60 }
 0x3a8   : > { %v5551_v3 = vpop.eup %5550 }
 0x3a9   : > { %v2962_v18 = vmul.f32 %v5551_v3, %v2960_v60  ;;  %vm2968_vm7 = vweird.f32 %v5551_v3 }
 0x3aa   : > { %vm2969_vm9 = vmor %vm2967_vm8, %vm2968_vm7 }
 0x3ab   : > { %v2963_v51 = vmul.f32 %v5551_v3, %v2962_v18 }
 0x3ad   : > { %v2964_v30 = vmul.f32 0.5, %v2963_v51 }
 0x3af   : > { %v2965_v26 = vsub.f32 1.5, %v2964_v30 }
 0x3b1   : > { %v2966_v36 = vmul.f32 %v5551_v3, %v2965_v26 }
 0x3b3   : > { %v7305_v13 = vsel %vm2969_vm9, %v5551_v3, %v2966_v36 }
 0x3b4   : > { %v2999_v25 = vmul.f32 %v7305_v13, %v2854_v44  ;;  %v3000_v55 = vmul.f32 %v7305_v13, %v2855_v6  ;;  %v3001_v1 = vmul.f32 %v7305_v13, %v2856_v5  ;;  %v3002_v24 = vmul.f32 %v7305_v13, %v2857_v40 }
 0x3b5   : > { %v2975_v38 = vmul.f32 %v7305_v13, %v7113_v46  ;;  %v2976_v61 = vmul.f32 %v7305_v13, %v7119_v33  ;;  %v2977_v4 = vmul.f32 %v7305_v13, %v7127_v10  ;;  %v2978_v31 = vmul.f32 %v7305_v13, %v7134_v12 }
 0x3b6   : > { %v3035_v63 = vmul.f32 %v7303_v59, %v2999_v25  ;;  %v3036_v28 = vmul.f32 %v7303_v59, %v3000_v55  ;;  %v3037_v2 = vmul.f32 %v7303_v59, %v3001_v1  ;;  %v3038_v19 = vmul.f32 %v7303_v59, %v3002_v24 }
 0x3b7   : > { %v2971_v3 = vmul.f32 %v7305_v13, %v7093_v50  ;;  %v3011_v46 = vmul.f32 %v7303_v59, %v2975_v38  ;;  %v3012_v30 = vmul.f32 %v7303_v59, %v2976_v61  ;;  %v3327_v33 = vpack.c.bf16 %v3319_v8, %v3319_v8 }
 0x3b8   : > { %v3071_v27 = vadd.f32 %v7310_v37, %v3035_v63  ;;  %v3072_v47 = vadd.f32 %v7310_v37, %v3036_v28  ;;  %v3073_v44 = vadd.f32 %v7310_v37, %v3037_v2  ;;  %v3074_v6 = vadd.f32 %v7310_v37, %v3038_v19 }
 0x3b9   : > { %v2972_v10 = vmul.f32 %v7305_v13, %v7097_v11  ;;  %v2973_v12 = vmul.f32 %v7305_v13, %v7101_v42  ;;  %v3013_v36 = vmul.f32 %v7303_v59, %v2977_v4  ;;  %v3014_v50 = vmul.f32 %v7303_v59, %v2978_v31  ;;  %3343 = vrot.lane.b32.xlu0 %v3327_v33, %s5570_s20 }
 0x3ba   : > { %v3103_v29 = vmax.f32 %v3071_v27, 0.0  ;;  %v3104_v5 = vmax.f32 %v3072_v47, 0.0  ;;  %v3105_v17 = vmax.f32 %v3073_v44, 0.0  ;;  %v3106_v40 = vmax.f32 %v3074_v6, 0.0 }
 0x3bb   : > { %v2974_v25 = vmul.f32 %v7305_v13, %v7105_v45  ;;  %v2979_v11 = vmul.f32 %v7305_v13, %v7141_v14  ;;  %v3007_v55 = vmul.f32 %v7303_v59, %v2971_v3  ;;  %v3047_v42 = vadd.f32 %v7310_v37, %v3011_v46 }
 0x3bc   : > { %3135 = vst.msk [vmem:[#allocation4 + $0xe0] sm:$0xff] %vm224_vm0, %v3103_v29  ;;  %v3048_v1 = vadd.f32 %v7310_v37, %v3012_v30  ;;  %v2980_v24 = vmul.f32 %v7305_v13, %v7148_v58  ;;  %v3008_v63 = vmul.f32 %v7303_v59, %v2972_v10  ;;  %v3009_v28 = vmul.f32 %v7303_v59, %v2973_v12 }
 0x3bd   : > { %3136 = vst.msk [vmem:[#allocation4 + $0xe8] sm:$0xff] %vm224_vm0, %v3104_v5  ;;  %v3049_v2 = vadd.f32 %v7310_v37, %v3013_v36  ;;  %v3050_v45 = vadd.f32 %v7310_v37, %v3014_v50  ;;  %v2981_v14 = vmul.f32 %v7305_v13, %v7155_v7  ;;  %v3010_v19 = vmul.f32 %v7303_v59, %v2974_v25 }
 0x3be   : > { %3137 = vst.msk [vmem:[#allocation4 + $0xf0] sm:$0xff] %vm224_vm0, %v3105_v17  ;;  %v3015_v47 = vmul.f32 %v7303_v59, %v2979_v11  ;;  %v3043_v44 = vadd.f32 %v7310_v37, %v3007_v55  ;;  %v3079_v6 = vmax.f32 %v3047_v42, 0.0  ;;  %v3080_v58 = vmax.f32 %v3048_v1, 0.0  ;;  %v4215_v17 = vld [vmem:[#allocation2] sm:$0xf] }
 0x3bf   : > { %3138 = vst.msk [vmem:[#allocation4 + $0xf8] sm:$0xff] %vm224_vm0, %v3106_v40  ;;  %v2982_v29 = vmul.f32 %v7305_v13, %v7162_v54  ;;  %v3016_v5 = vmul.f32 %v7303_v59, %v2980_v24  ;;  %v3044_v40 = vadd.f32 %v7310_v37, %v3008_v63  ;;  %v2983_v7 = vmul.f32 %v7305_v13, %v7169_v35 }
 0x3c0   : > { %4223 = vst [vmem:[#allocation1] ss:$2 sm:$0xff] %v4215_v17  ;;  %v3045_v23 = vadd.f32 %v7310_v37, %v3009_v28  ;;  %v3081_v38 = vmax.f32 %v3049_v2, 0.0  ;;  %v3082_v61 = vmax.f32 %v3050_v45, 0.0  ;;  %v2984_v54 = vmul.f32 %v7305_v13, %v7176_v56 }
 0x3c1   : > { %3111 = vst.msk [vmem:[#allocation4 + $0x20] sm:$0xff] %vm224_vm0, %v3079_v6  ;;  %v3051_v4 = vadd.f32 %v7310_v37, %v3015_v47  ;;  %v3075_v35 = vmax.f32 %v3043_v44, 0.0  ;;  %v3052_v3 = vadd.f32 %v7310_v37, %v3016_v5  ;;  %v3019_v46 = vmul.f32 %v7303_v59, %v2983_v7 }
 0x3c2   : > { %3112 = vst.msk [vmem:[#allocation4 + $0x28] sm:$0xff] %vm224_vm0, %v3080_v58  ;;  %v3077_v56 = vmax.f32 %v3045_v23, 0.0  ;;  %v2986_v30 = vmul.f32 %v7305_v13, %v7190_v16  ;;  %v2987_v10 = vmul.f32 %v7305_v13, %v7197_v20  ;;  %v3020_v12 = vmul.f32 %v7303_v59, %v2984_v54 }
 0x3c3   : > { %3113 = vst.msk [vmem:[#allocation4 + $0x30] sm:$0xff] %vm224_vm0, %v3081_v38  ;;  %v3083_v36 = vmax.f32 %v3051_v4, 0.0  ;;  %v3084_v25 = vmax.f32 %v3052_v3, 0.0  ;;  %v2989_v16 = vmul.f32 %v7305_v13, %v7211_v9  ;;  %v3055_v20 = vadd.f32 %v7310_v37, %v3019_v46 }
 0x3c4   : > { %v3167_v34 = vld [vmem:[#allocation4 + $0xe0] ss:$2 sm:$0xff]  ;;  %v3199_v48 = vld [vmem:[#allocation4 + $0xe1] ss:$2 sm:$0xff]  ;;  %3114 = vst.msk [vmem:[#allocation4 + $0x38] sm:$0xff] %vm224_vm0, %v3082_v61  ;;  %v2990_v55 = vmul.f32 %v7305_v13, %v7218_v62  ;;  %v3022_v42 = vmul.f32 %v7303_v59, %v2986_v30  ;;  %v3023_v63 = vmul.f32 %v7303_v59, %v2987_v10  ;;  %v3056_v9 = vadd.f32 %v7310_v37, %v3020_v12 }
 0x3c5   : > { %v3216_v60 = vadd.f32 %v3199_v48, %v3167_v34  ;;  %v3017_v34 = vmul.f32 %v7303_v59, %v2981_v14  ;;  %v3046_v48 = vadd.f32 %v7310_v37, %v3010_v19  ;;  %3107 = vst.msk [vmem:[#allocation4] sm:$0xff] %vm224_vm0, %v3075_v35  ;;  %v2991_v2 = vmul.f32 %v7305_v13, %v7225_v39 }
 0x3c6   : > { %v3169_v18 = vld [vmem:[#allocation4 + $0xf0] ss:$2 sm:$0xff]  ;;  %v3201_v51 = vld [vmem:[#allocation4 + $0xf1] ss:$2 sm:$0xff]  ;;  %3109 = vst.msk [vmem:[#allocation4 + $0x10] sm:$0xff] %vm224_vm0, %v3077_v56  ;;  %v2992_v62 = vmul.f32 %v7305_v13, %v7232_v32  ;;  %v3025_v47 = vmul.f32 %v7303_v59, %v2989_v16  ;;  %v3087_v58 = vmax.f32 %v3055_v20, 0.0  ;;  %v2993_v39 = vmul.f32 %v7305_v13, %v7239_v43 }
 0x3c7   : > { %v3217_v26 = vadd.f32 %v3201_v51, %v3169_v18  ;;  %3232 = vst.msk [vmem:[#allocation5 + $0x70] sm:$0xff] %vm224_vm0, %v3216_v60  ;;  %v3018_v60 = vmul.f32 %v7303_v59, %v2982_v29  ;;  %v3076_v18 = vmax.f32 %v3044_v40, 0.0  ;;  %v2985_v51 = vmul.f32 %v7305_v13, %v7183_v52 }
 0x3c8   : > { %v3053_v33 = vadd.f32 %v7310_v37, %v3017_v34  ;;  %v2988_v52 = vmul.f32 %v7305_v13, %v7204_v22  ;;  %3115 = vst.msk [vmem:[#allocation4 + $0x40] sm:$0xff] %vm224_vm0, %v3083_v36  ;;  %v3026_v32 = vmul.f32 %v7303_v59, %v2990_v55  ;;  %v3058_v29 = vadd.f32 %v7310_v37, %v3022_v42 }
 0x3c9   : > { %3233 = vst.msk [vmem:[#allocation5 + $0x78] sm:$0xff] %vm224_vm0, %v3217_v26  ;;  %v3078_v26 = vmax.f32 %v3046_v48, 0.0  ;;  %v3054_v50 = vadd.f32 %v7310_v37, %v3018_v60  ;;  %v3021_v11 = vmul.f32 %v7303_v59, %v2985_v51  ;;  %v3143_v22 = vld [vmem:[#allocation4 + $0x20] ss:$2 sm:$0xff]  ;;  %v3175_v1 = vld [vmem:[#allocation4 + $0x21] ss:$2 sm:$0xff]  ;;  %v2994_v5 = vmul.f32 %v7305_v13, %v7246_v57 }
 0x3ca   : > { %3108 = vst.msk [vmem:[#allocation4 + $0x8] sm:$0xff] %vm224_vm0, %v3076_v18  ;;  %v3085_v24 = vmax.f32 %v3053_v33, 0.0  ;;  %v3204_v28 = vadd.f32 %v3175_v1, %v3143_v22  ;;  %v3024_v45 = vmul.f32 %v7303_v59, %v2988_v52  ;;  %v3059_v17 = vadd.f32 %v7310_v37, %v3023_v63 }
 0x3cb   : > { %3110 = vst.msk [vmem:[#allocation4 + $0x18] sm:$0xff] %vm224_vm0, %v3078_v26  ;;  %v3145_v14 = vld [vmem:[#allocation4 + $0x30] ss:$2 sm:$0xff]  ;;  %v3177_v19 = vld [vmem:[#allocation4 + $0x31] ss:$2 sm:$0xff]  ;;  %v3057_v44 = vadd.f32 %v7310_v37, %v3021_v11  ;;  %v3088_v40 = vmax.f32 %v3056_v9, 0.0  ;;  %v2995_v23 = vmul.f32 %v7305_v13, %v7253_v21  ;;  %v3027_v43 = vmul.f32 %v7303_v59, %v2991_v2 }
 0x3cc   : > { %3116 = vst.msk [vmem:[#allocation4 + $0x48] sm:$0xff] %vm224_vm0, %v3084_v25  ;;  %v3205_v6 = vadd.f32 %v3177_v19, %v3145_v14  ;;  %v3060_v38 = vadd.f32 %v7310_v37, %v3024_v45  ;;  %v2996_v57 = vmul.f32 %v7305_v13, %v7260_v15  ;;  %v3061_v34 = vadd.f32 %v7310_v37, %v3025_v47 }
 0x3cd   : > { %3220 = vst.msk [vmem:[#allocation5 + $0x10] sm:$0xff] %vm224_vm0, %v3204_v28  ;;  %v3089_v48 = vmax.f32 %v3057_v44, 0.0  ;;  %v3029_v21 = vmul.f32 %v7303_v59, %v2993_v39  ;;  %v3062_v35 = vadd.f32 %v7310_v37, %v3026_v32  ;;  %v2997_v15 = vmul.f32 %v7305_v13, %v7267_v49 }
 0x3ce   : > { %v3241_v27 = vld [vmem:[#allocation5 + $0x70] sm:$0xff]  ;;  %3117 = vst.msk [vmem:[#allocation4 + $0x50] sm:$0xff] %vm224_vm0, %v3085_v24  ;;  %v3030_v3 = vmul.f32 %v7303_v59, %v2994_v5  ;;  %v3091_v18 = vmax.f32 %v3059_v17, 0.0  ;;  %v2998_v51 = vmul.f32 %v7305_v13, %v7274_v53  ;;  %v3063_v46 = vadd.f32 %v7310_v37, %v3027_v43 }
 0x3cf   : > { %3221 = vst.msk [vmem:[#allocation5 + $0x18] sm:$0xff] %vm224_vm0, %v3205_v6  ;;  %v3092_v30 = vmax.f32 %v3060_v38, 0.0  ;;  %v3031_v33 = vmul.f32 %v7303_v59, %v2995_v23  ;;  %v3032_v26 = vmul.f32 %v7303_v59, %v2996_v57  ;;  %v3093_v10 = vmax.f32 %v3061_v34, 0.0 }
 0x3d0   : > { %v3250_v41 = vld [vmem:[#allocation5 + $0x78] sm:$0xff]  ;;  %3119 = vst.msk [vmem:[#allocation4 + $0x60] sm:$0xff] %vm224_vm0, %v3087_v58  ;;  %v3065_v12 = vadd.f32 %v7310_v37, %v3029_v21  ;;  %v3094_v52 = vmax.f32 %v3062_v35, 0.0  ;;  %v3033_v53 = vmul.f32 %v7303_v59, %v2997_v15  ;;  %v3066_v13 = vadd.f32 %v7310_v37, %v3030_v3 }
 0x3d1   : > { %v3258_v8 = vadd.f32 %v3250_v41, %v3241_v27  ;;  %v3086_v27 = vmax.f32 %v3054_v50, 0.0  ;;  %v3139_v41 = vld [vmem:[#allocation4] ss:$2 sm:$0xff]  ;;  %v3171_v7 = vld [vmem:[#allocation4 + $0x1] ss:$2 sm:$0xff]  ;;  %3120 = vst.msk [vmem:[#allocation4 + $0x68] sm:$0xff] %vm224_vm0, %v3088_v40  ;;  %v3034_v25 = vmul.f32 %v7303_v59, %v2998_v51  ;;  %v3067_v11 = vadd.f32 %v7310_v37, %v3031_v33 }
 0x3d2   : > { %v3202_v61 = vadd.f32 %v3171_v7, %v3139_v41  ;;  %v3141_v54 = vld [vmem:[#allocation4 + $0x10] ss:$2 sm:$0xff]  ;;  %v3173_v4 = vld [vmem:[#allocation4 + $0x11] ss:$2 sm:$0xff]  ;;  %3121 = vst.msk [vmem:[#allocation4 + $0x70] sm:$0xff] %vm224_vm0, %v3089_v48  ;;  %v3095_v16 = vmax.f32 %v3063_v46, 0.0  ;;  %v3068_v20 = vadd.f32 %v7310_v37, %v3032_v26  ;;  %v3069_v24 = vadd.f32 %v7310_v37, %v3033_v53 }
 0x3d3   : > { %v3266_v31 = vmul.f32 0.25, %v3258_v8  ;;  %3118 = vst.msk [vmem:[#allocation4 + $0x58] sm:$0xff] %vm224_vm0, %v3086_v27  ;;  %v3028_v8 = vmul.f32 %v7303_v59, %v2992_v62  ;;  %v3203_v60 = vadd.f32 %v3173_v4, %v3141_v54  ;;  %v3097_v1 = vmax.f32 %v3065_v12, 0.0  ;;  %v3147_v14 = vld [vmem:[#allocation4 + $0x40] ss:$2 sm:$0xff] }
 0x3d4   : > { %3218 = vst.msk [vmem:[#allocation5] sm:$0xff] %vm224_vm0, %v3202_v61  ;;  %v3235_v56 = vld [vmem:[#allocation5 + $0x10] sm:$0xff]  ;;  %v3098_v59 = vmax.f32 %v3066_v13, 0.0  ;;  %v3070_v9 = vadd.f32 %v7310_v37, %v3034_v25  ;;  %v3099_v2 = vmax.f32 %v3067_v11, 0.0  ;;  %v3100_v62 = vmax.f32 %v3068_v20, 0.0 }
 0x3d5   : > { %3294 = vst.msk [vmem:[#allocation2 + $0xc1] sm:$0xff] %vm224_vm0, %v3266_v31  ;;  %v3090_v31 = vmax.f32 %v3058_v29, 0.0  ;;  %v3064_v49 = vadd.f32 %v7310_v37, %v3028_v8  ;;  %v3179_v19 = vld [vmem:[#allocation4 + $0x41] ss:$2 sm:$0xff]  ;;  %v3101_v27 = vmax.f32 %v3069_v24, 0.0 }
 0x3d6   : > { %3219 = vst.msk [vmem:[#allocation5 + $0x8] sm:$0xff] %vm224_vm0, %v3203_v60  ;;  %v3244_v36 = vld [vmem:[#allocation5 + $0x18] sm:$0xff]  ;;  %v3102_v6 = vmax.f32 %v3070_v9, 0.0  ;;  %v3206_v29 = vadd.f32 %v3179_v19, %v3147_v14 }
 0x3d7   : > { %3122 = vst.msk [vmem:[#allocation4 + $0x78] sm:$0xff] %vm224_vm0, %v3090_v31  ;;  %v3252_v50 = vadd.f32 %v3244_v36, %v3235_v56  ;;  %v3096_v42 = vmax.f32 %v3064_v49, 0.0 }
 0x3d8   : > { %3123 = vst.msk [vmem:[#allocation4 + $0x80] sm:$0xff] %vm224_vm0, %v3091_v18  ;;  %v3151_v37 = vld [vmem:[#allocation4 + $0x60] ss:$2 sm:$0xff]  ;;  %v3183_v58 = vld [vmem:[#allocation4 + $0x61] ss:$2 sm:$0xff] }
 0x3d9   : > { %3124 = vst.msk [vmem:[#allocation4 + $0x88] sm:$0xff] %vm224_vm0, %v3092_v30  ;;  %v3260_v55 = vmul.f32 0.25, %v3252_v50  ;;  %v3208_v38 = vadd.f32 %v3183_v58, %v3151_v37 }
 0x3da   : > { %3125 = vst.msk [vmem:[#allocation4 + $0x90] sm:$0xff] %vm224_vm0, %v3093_v10  ;;  %v3149_v47 = vld [vmem:[#allocation4 + $0x50] ss:$2 sm:$0xff]  ;;  %v3181_v44 = vld [vmem:[#allocation4 + $0x51] ss:$2 sm:$0xff] }
 0x3db   : > { %v3234_v22 = vld [vmem:[#allocation5] sm:$0xff]  ;;  %3126 = vst.msk [vmem:[#allocation4 + $0x98] sm:$0xff] %vm224_vm0, %v3094_v52  ;;  %v3207_v41 = vadd.f32 %v3181_v44, %v3149_v47 }
 0x3dc   : > { %3288 = vst.msk [vmem:[#allocation2 + $0x31] sm:$0xff] %vm224_vm0, %v3260_v55 }
 0x3dd   : > { %v3243_v63 = vld [vmem:[#allocation5 + $0x8] sm:$0xff]  ;;  %3127 = vst.msk [vmem:[#allocation4 + $0xa0] sm:$0xff] %vm224_vm0, %v3095_v16 }
 0x3de   : > { %v3251_v28 = vadd.f32 %v3243_v63, %v3234_v22  ;;  %3128 = vst.msk [vmem:[#allocation4 + $0xa8] sm:$0xff] %vm224_vm0, %v3096_v42  ;;  %v3153_v39 = vld [vmem:[#allocation4 + $0x70] ss:$2 sm:$0xff]  ;;  %v3185_v32 = vld [vmem:[#allocation4 + $0x71] ss:$2 sm:$0xff] }
 0x3df   : > { %3129 = vst.msk [vmem:[#allocation4 + $0xb0] sm:$0xff] %vm224_vm0, %v3097_v1  ;;  %v3209_v8 = vadd.f32 %v3185_v32, %v3153_v39  ;;  %v3629_v42 = vld [vmem:[#allocation2 + $0xc1] sm:$0xff] }
 0x3e0   : > { %v3259_v45 = vmul.f32 0.25, %v3251_v28  ;;  %3130 = vst.msk [vmem:[#allocation4 + $0xb8] sm:$0xff] %vm224_vm0, %v3098_v59  ;;  %v3155_v17 = vld [vmem:[#allocation4 + $0x80] ss:$2 sm:$0xff]  ;;  %v3187_v40 = vld [vmem:[#allocation4 + $0x81] ss:$2 sm:$0xff]  ;;  %v7514_v9 = vpack.c.bf16 %v3629_v42, %v3629_v42 }
 0x3e1   : > { %3131 = vst.msk [vmem:[#allocation4 + $0xc0] sm:$0xff] %vm224_vm0, %v3099_v2  ;;  %v3210_v34 = vadd.f32 %v3187_v40, %v3155_v17 }
 0x3e2   : > { %3287 = vst.msk [vmem:[#allocation2 + $0x19] sm:$0xff] %vm224_vm0, %v3259_v45  ;;  %v3157_v23 = vld [vmem:[#allocation4 + $0x90] ss:$2 sm:$0xff]  ;;  %v3189_v43 = vld [vmem:[#allocation4 + $0x91] ss:$2 sm:$0xff] }
 0x3e3   : > { %v3432_v5 = vld [vmem:[#allocation2 + $0x30] sm:$0xff]  ;;  %3132 = vst.msk [vmem:[#allocation4 + $0xc8] sm:$0xff] %vm224_vm0, %v3100_v62  ;;  %v3211_v4 = vadd.f32 %v3189_v43, %v3157_v23 }
 0x3e4   : > { %v7479_v7 = vpack.c.bf16 %v3432_v5, %v3432_v5  ;;  %3133 = vst.msk [vmem:[#allocation4 + $0xd0] sm:$0xff] %vm224_vm0, %v3101_v27  ;;  %v3377_v3 = vld [vmem:[#allocation2 + $0x32] sm:$0xff] }
 0x3e5   : > { %3134 = vst.msk [vmem:[#allocation4 + $0xd8] sm:$0xff] %vm224_vm0, %v3102_v6  ;;  %v3159_v61 = vld [vmem:[#allocation4 + $0xa0] ss:$2 sm:$0xff]  ;;  %v3191_v57 = vld [vmem:[#allocation4 + $0xa1] ss:$2 sm:$0xff]  ;;  %v7496_v49 = vpack.c.bf16 %v3377_v3, %v3377_v3 }
 0x3e6   : > { %3457 = vrot.lane.b32.xlu2 %v7479_v7, %s5572_s26  ;;  %3222 = vst.msk [vmem:[#allocation5 + $0x20] sm:$0xff] %vm224_vm0, %v3206_v29  ;;  %v3212_v31 = vadd.f32 %v3191_v57, %v3159_v61  ;;  %v3321_v52 = vld [vmem:[#allocation2 + $0x31] sm:$0xff] }
 0x3e7   : > { %v3161_v48 = vld [vmem:[#allocation4 + $0xb0] ss:$2 sm:$0xff]  ;;  %v3193_v54 = vld [vmem:[#allocation4 + $0xb1] ss:$2 sm:$0xff]  ;;  %3223 = vst.msk [vmem:[#allocation5 + $0x28] sm:$0xff] %vm224_vm0, %v3207_v41  ;;  %v7505_v16 = vpack.c.bf16 %v3321_v52, %v3321_v52 }
 0x3e8   : > { %3224 = vst.msk [vmem:[#allocation5 + $0x30] sm:$0xff] %vm224_vm0, %v3208_v38  ;;  %v3213_v18 = vadd.f32 %v3193_v54, %v3161_v48  ;;  %v5489_v52 = vld [vmem:[%s7921_s1 + $0xb0] sm:$0xff] }
 0x3e9   : > { %v3376_v21 = vld [vmem:[#allocation2 + $0x1a] sm:$0xff]  ;;  %3225 = vst.msk [vmem:[#allocation5 + $0x38] sm:$0xff] %vm224_vm0, %v3209_v8 }
 0x3ea   : > { %v3320_v35 = vld [vmem:[#allocation2 + $0x19] sm:$0xff]  ;;  %v7488_v60 = vpack.c.bf16 %v3376_v21, %v3376_v21  ;;  %3226 = vst.msk [vmem:[#allocation5 + $0x40] sm:$0xff] %vm224_vm0, %v3210_v34 }
 0x3eb   : > { %v3328_v15 = vpack.c.bf16 %v3320_v35, %v3320_v35  ;;  %v3431_v51 = vld [vmem:[#allocation2 + $0x18] sm:$0xff]  ;;  %3227 = vst.msk [vmem:[#allocation5 + $0x48] sm:$0xff] %vm224_vm0, %v3211_v4 }
 0x3ec   : > { %v3163_v46 = vld [vmem:[#allocation4 + $0xc0] ss:$2 sm:$0xff]  ;;  %v3195_v56 = vld [vmem:[#allocation4 + $0xc1] ss:$2 sm:$0xff]  ;;  %3401 = vrot.lane.b32.xlu0 %v7488_v60, %s5571_s21  ;;  %v3165_v33 = vld [vmem:[#allocation4 + $0xd0] ss:$2 sm:$0xff]  ;;  %v3439_v10 = vpack.c.bf16 %v3431_v51, %v3431_v51 }
 0x3ed   : > { %3345 = vrot.lane.b32.xlu1 %v3328_v15, %s5570_s20  ;;  %v3214_v30 = vadd.f32 %v3195_v56, %v3163_v46  ;;  %v3197_v26 = vld [vmem:[#allocation4 + $0xd1] ss:$2 sm:$0xff]  ;;  %3228 = vst.msk [vmem:[#allocation5 + $0x50] sm:$0xff] %vm224_vm0, %v3212_v31  ;;  %v3236_v36 = vld [vmem:[#allocation5 + $0x20] sm:$0xff] }
 0x3ee   : > { %v3215_v12 = vadd.f32 %v3197_v26, %v3165_v33  ;;  %3229 = vst.msk [vmem:[#allocation5 + $0x58] sm:$0xff] %vm224_vm0, %v3213_v18  ;;  %3403 = vrot.lane.b32.xlu2 %v7496_v49, %s5571_s21  ;;  %v3245_v53 = vld [vmem:[#allocation5 + $0x28] sm:$0xff]  ;;  %v3518_v51 = vld [vmem:[#allocation2 + $0xc2] sm:$0xff] }
 0x3ef   : > { %3230 = vst.msk [vmem:[#allocation5 + $0x60] sm:$0xff] %vm224_vm0, %v3214_v30  ;;  %v3237_v13 = vld [vmem:[#allocation5 + $0x30] sm:$0xff]  ;;  %v3253_v50 = vadd.f32 %v3245_v53, %v3236_v36  ;;  %v7589_v33 = vpack.c.bf16 %v3518_v51, %v3518_v51  ;;  %v5490_v36 = vld [vmem:[%s7921_s1 + $0xb8] sm:$0xff] }
 0x3f0   : > { %3231 = vst.msk [vmem:[#allocation5 + $0x68] sm:$0xff] %vm224_vm0, %v3215_v12  ;;  %v3246_v25 = vld [vmem:[#allocation5 + $0x38] sm:$0xff]  ;;  %v3686_v56 = vld [vmem:[#allocation2 + $0xda] sm:$0xff] }
 0x3f1   : > { %3312 = vst.msk [vmem:[#allocation3 + $0xc] sm:$0xf] %vm409_vm2, %v3439_v10  ;;  %v3238_v11 = vld [vmem:[#allocation5 + $0x40] sm:$0xff]  ;;  %v3254_v20 = vadd.f32 %v3246_v25, %v3237_v13  ;;  %v3261_v55 = vmul.f32 0.25, %v3253_v50  ;;  %v3694_v26 = vpack.c.bf16 %v3686_v56, %v3686_v56  ;;  %v5492_v12 = vld [vmem:[%s7921_s1 + $0xc8] sm:$0xff]  ;;  %v5487_v50 = vld [vmem:[%s7921_s1 + $0xa0] sm:$0xff] }
 0x3f2   : > { %3313 = vst.msk [vmem:[#allocation3 + $0x18] sm:$0xf] %vm409_vm2, %v7479_v7  ;;  %v3247_v22 = vld [vmem:[#allocation5 + $0x48] sm:$0xff]  ;;  %3941 = vmatpush.bf16.msra.mxu3 %v5492_v12  ;;  %v5488_v53 = vld [vmem:[%s7921_s1 + $0xa8] sm:$0xff]  ;;  %v5486_v25 = vld [vmem:[%s7921_s1 + $0x98] sm:$0xff] }
 0x3f3   : > { %3503 = vst.msk [vmem:[#allocation3 + $0x4] sm:$0xf] %vm409_vm2, %v3328_v15  ;;  %v3262_v24 = vmul.f32 0.25, %v3254_v20  ;;  %v3255_v59 = vadd.f32 %v3247_v22, %v3238_v11  ;;  %v5500_v20 = vld [vmem:[%s7921_s1 + $0x108] sm:$0xff] }
 0x3f4   : > { %3347 = vrot.lane.b32.xlu0 %v7505_v16, %s5570_s20  ;;  %v3239_v1 = vld [vmem:[#allocation5 + $0x50] sm:$0xff]  ;;  %3289 = vst.msk [vmem:[#allocation2 + $0x49] sm:$0xff] %vm224_vm0, %v3261_v55  ;;  %v3574_v55 = vld [vmem:[#allocation2 + $0xd8] sm:$0xff] }
 0x3f5   : > { %3455 = vrot.lane.b32.xlu1 %v3439_v10, %s5572_s26  ;;  %v3248_v63 = vld [vmem:[#allocation5 + $0x58] sm:$0xff]  ;;  %4206 = vst.msk [vmem:[#allocation2 + $0x18] sm:$0x3f] %vm4204_vm10, %v5569_v0  ;;  %v3263_v62 = vmul.f32 0.25, %v3255_v59  ;;  %v3582_v22 = vpack.c.bf16 %v3574_v55, %v3574_v55 }
 0x3f6   : > { %v3240_v28 = vld [vmem:[#allocation5 + $0x60] sm:$0xff]  ;;  %3290 = vst.msk [vmem:[#allocation2 + $0x61] sm:$0xff] %vm224_vm0, %v3262_v24  ;;  %v3256_v2 = vadd.f32 %v3248_v63, %v3239_v1  ;;  %v5499_v1 = vld [vmem:[%s7921_s1 + $0x100] sm:$0xff] }
 0x3f7   : > { %v3249_v45 = vld [vmem:[#allocation5 + $0x68] sm:$0xff]  ;;  %3504 = vst.msk [vmem:[#allocation3 + $0x10] sm:$0xf] %vm409_vm2, %v7505_v16 }
 0x3f8   : > { %v3257_v14 = vadd.f32 %v3249_v45, %v3240_v28  ;;  %v3264_v19 = vmul.f32 0.25, %v3256_v2  ;;  %3291 = vst.msk [vmem:[#allocation2 + $0x79] sm:$0xff] %vm224_vm0, %v3263_v62  ;;  %v3630_v24 = vld [vmem:[#allocation2 + $0xd9] sm:$0xff]  ;;  %v5498_v62 = vld [vmem:[%s7921_s1 + $0xf8] sm:$0xff] }
 0x3f9   : > { %3510 = vst.msk [vmem:[#allocation3 + $0x58] sm:$0xf] %vm409_vm2, %v7514_v9  ;;  %v3638_v59 = vpack.c.bf16 %v3630_v24, %v3630_v24 }
 0x3fa   : > { %v3265_v27 = vmul.f32 0.25, %v3257_v14  ;;  %3292 = vst.msk [vmem:[#allocation2 + $0x91] sm:$0xff] %vm224_vm0, %v3264_v19  ;;  %v5497_v19 = vld [vmem:[%s7921_s1 + $0xf0] sm:$0xff] }
 0x3fb   : > { %v3378_v47 = vld [vmem:[#allocation2 + $0x4a] sm:$0xff]  ;;  %3695 = vst.msk [vmem:[#allocation3 + $0x8] sm:$0xf] %vm409_vm2, %v7496_v49 }
 0x3fc   : > { %v3322_v44 = vld [vmem:[#allocation2 + $0x49] sm:$0xff]  ;;  %v7527_v37 = vpack.c.bf16 %v3378_v47, %v3378_v47  ;;  %3293 = vst.msk [vmem:[#allocation2 + $0xa9] sm:$0xff] %vm224_vm0, %v3265_v27 }
 0x3fd   : > { %v3433_v6 = vld [vmem:[#allocation2 + $0x48] sm:$0xff]  ;;  %v7529_v58 = vpack.c.bf16 %v3322_v44, %v3322_v44  ;;  %v3434_v32 = vld [vmem:[#allocation2 + $0x60] sm:$0xff]  ;;  %4207 = vst.msk [vmem:[#allocation2 + $0x30] sm:$0x3f] %vm4204_vm10, %v5569_v0 }
 0x3fe   : > { %v7532_v39 = vpack.c.bf16 %v3433_v6, %v3433_v6  ;;  %v3323_v29 = vld [vmem:[#allocation2 + $0x61] sm:$0xff]  ;;  %v7536_v5 = vpack.c.bf16 %v3434_v32, %v3434_v32  ;;  %3405 = vrot.lane.b32.xlu0 %v7527_v37, %s5571_s21  ;;  %3696 = vst.msk [vmem:[#allocation3 + $0x14] sm:$0xf] %vm409_vm2, %v7527_v37 }
 0x3ff   : > { %3349 = vrot.lane.b32.xlu1 %v7529_v58, %s5570_s20  ;;  %v7542_v17 = vpack.c.bf16 %v3323_v29, %v3323_v29  ;;  %v3324_v40 = vld [vmem:[#allocation2 + $0x79] sm:$0xff]  ;;  %3505 = vst.msk [vmem:[#allocation3 + $0x1c] sm:$0xf] %vm409_vm2, %v7529_v58  ;;  %v3379_v34 = vld [vmem:[#allocation2 + $0x62] sm:$0xff] }
 0x400   : > { %3314 = vst.msk [vmem:[#allocation3 + $0x24] sm:$0xf] %vm409_vm2, %v7532_v39  ;;  %v3435_v41 = vld [vmem:[#allocation2 + $0x78] sm:$0xff]  ;;  %3461 = vrot.lane.b32.xlu2 %v7536_v5, %s5572_s26  ;;  %v7550_v23 = vpack.c.bf16 %v3324_v40, %v3324_v40  ;;  %v3387_v31 = vpack.c.bf16 %v3379_v34, %v3379_v34 }
 0x401   : > { %v7552_v43 = vpack.c.bf16 %v3435_v41, %v3435_v41  ;;  %3315 = vst.msk [vmem:[#allocation3 + $0x30] sm:$0xf] %vm409_vm2, %v7536_v5  ;;  %v3436_v38 = vld [vmem:[#allocation2 + $0x90] sm:$0xff]  ;;  %v3380_v4 = vld [vmem:[#allocation2 + $0x7a] sm:$0xff] }
 0x402   : > { %v3325_v61 = vld [vmem:[#allocation2 + $0x91] sm:$0xff]  ;;  %3506 = vst.msk [vmem:[#allocation3 + $0x28] sm:$0xf] %vm409_vm2, %v7542_v17  ;;  %v7558_v57 = vpack.c.bf16 %v3436_v38, %v3436_v38  ;;  %v3388_v15 = vpack.c.bf16 %v3380_v4, %v3380_v4 }
 0x403   : > { %v7560_v8 = vpack.c.bf16 %v3325_v61, %v3325_v61  ;;  %3316 = vst.msk [vmem:[#allocation3 + $0x3c] sm:$0xf] %vm409_vm2, %v7552_v43  ;;  %v3326_v48 = vld [vmem:[#allocation2 + $0xa9] sm:$0xff]  ;;  %v3381_v3 = vld [vmem:[#allocation2 + $0x92] sm:$0xff] }
 0x404   : > { %v3437_v54 = vld [vmem:[#allocation2 + $0xa8] sm:$0xff]  ;;  %3507 = vst.msk [vmem:[#allocation3 + $0x34] sm:$0xf] %vm409_vm2, %v7550_v23  ;;  %v7566_v21 = vpack.c.bf16 %v3326_v48, %v3326_v48  ;;  %v3389_v46 = vpack.c.bf16 %v3381_v3, %v3381_v3  ;;  %v5494_v61 = vld [vmem:[%s7921_s1 + $0xd8] sm:$0xff] }
 0x405   : > { %v7568_v35 = vpack.c.bf16 %v3437_v54, %v3437_v54  ;;  %3317 = vst.msk [vmem:[#allocation3 + $0x48] sm:$0xf] %vm409_vm2, %v7558_v57  ;;  %v3382_v18 = vld [vmem:[#allocation2 + $0xaa] sm:$0xff] }
 0x406   : > { %3508 = vst.msk [vmem:[#allocation3 + $0x40] sm:$0xf] %vm409_vm2, %v7560_v8  ;;  %3351 = vrot.lane.b32.xlu0 %v7542_v17, %s5570_s20  ;;  %v3390_v30 = vpack.c.bf16 %v3382_v18, %v3382_v18  ;;  %v5493_v48 = vld [vmem:[%s7921_s1 + $0xd0] sm:$0xff]  ;;  %v5502_v3 = vld [vmem:[%s7921_s1 + $0x118] sm:$0xff] }
 0x407   : > { %3459 = vrot.lane.b32.xlu1 %v7532_v39, %s5572_s26  ;;  %3318 = vst.msk [vmem:[#allocation3 + $0x54] sm:$0xf] %vm409_vm2, %v7568_v35 }
 0x408   : > { %3509 = vst.msk [vmem:[#allocation3 + $0x4c] sm:$0xf] %vm409_vm2, %v7566_v21  ;;  %3407 = vrot.lane.b32.xlu2 %v3387_v31, %s5571_s21 }
 0x409   : > { %4208 = vst.msk [vmem:[#allocation2 + $0x48] sm:$0x3f] %vm4204_vm10, %v5569_v0 }
 0x40a   : > { %3697 = vst.msk [vmem:[#allocation3 + $0x20] sm:$0xf] %vm409_vm2, %v3387_v31 }
 0x40b   : > { %3698 = vst.msk [vmem:[#allocation3 + $0x2c] sm:$0xf] %vm409_vm2, %v3388_v15 }
 0x40c   : > { %4209 = vst.msk [vmem:[#allocation2 + $0x60] sm:$0x3f] %vm4204_vm10, %v5569_v0 }
 0x40d   : > { %4210 = vst.msk [vmem:[#allocation2 + $0x78] sm:$0x3f] %vm4204_vm10, %v5569_v0  ;;  %v3438_v0 = vld [vmem:[#allocation2 + $0xc0] sm:$0xff] }
 0x40e   : > { %3409 = vrot.lane.b32.xlu0 %v3388_v15, %s5571_s21  ;;  %3699 = vst.msk [vmem:[#allocation3 + $0x38] sm:$0xf] %vm409_vm2, %v3389_v46  ;;  %v3446_v10 = vpack.c.bf16 %v3438_v0, %v3438_v0 }
 0x40f   : > { %3353 = vrot.lane.b32.xlu1 %v7550_v23, %s5570_s20  ;;  %3700 = vst.msk [vmem:[#allocation3 + $0x44] sm:$0xf] %vm409_vm2, %v3390_v30 }
 0x410   : > { %3465 = vrot.lane.b32.xlu2 %v7558_v57, %s5572_s26  ;;  %3701 = vst.msk [vmem:[#allocation3 + $0x50] sm:$0xf] %vm409_vm2, %v7589_v33 }
 0x411   : > { %3702 = vst.msk [vmem:[#allocation3 + $0x5c] sm:$0xf] %vm409_vm2, %v3694_v26 }
 0x416   : > { %3355 = vrot.lane.b32.xlu0 %v7560_v8, %s5570_s20 }
 0x417   : > { %3463 = vrot.lane.b32.xlu1 %v7552_v43, %s5572_s26 }
 0x418   : > { %3411 = vrot.lane.b32.xlu2 %v3389_v46, %s5571_s21 }
 0x41e   : > { %3413 = vrot.lane.b32.xlu0 %v3390_v30, %s5571_s21 }
 0x41f   : > { %3357 = vrot.lane.b32.xlu1 %v7566_v21, %s5570_s20 }
 0x420   : > { %3469 = vrot.lane.b32.xlu2 %v3446_v10, %s5572_s26 }
 0x426   : > { %3535 = vrot.lane.b32.xlu0 %v7488_v60, %s5570_s20 }
 0x427   : > { %3467 = vrot.lane.b32.xlu1 %v7568_v35, %s5572_s26 }
 0x428   : > { %3591 = vrot.lane.b32.xlu2 %v7479_v7, %s5571_s21  ;;  %v5491_v7 = vld [vmem:[%s7921_s1 + $0xc0] sm:$0xff] }
 0x429   : > { %3942 = vmatpush.bf16.msra.mxu3 %v5491_v7 }
 0x42b   : > { %v3344_v60 = vpop.permute.xlu0 %3343 }
 0x42c   : > { %3367 = vst.msk [vmem:[#allocation3] sm:$0xf] %vm634_vm3, %v3344_v60 }
 0x42d   : > { %3943 = vmatpush.bf16.msra.mxu3 %v5490_v36 }
 0x42e   : > { %3593 = vrot.lane.b32.xlu0 %v7532_v39, %s5571_s21 }
 0x42f   : > { %3537 = vrot.lane.b32.xlu1 %v7496_v49, %s5570_s20  ;;  %v3400_v49 = vpop.permute.xlu2 %3399 }
 0x430   : > { %3649 = vrot.lane.b32.xlu2 %v7529_v58, %s5572_s26  ;;  %3423 = vst.msk [vmem:[#allocation3] sm:$0xf] %vm859_vm4, %v3400_v49  ;;  %v5496_v58 = vld [vmem:[%s7921_s1 + $0xe8] sm:$0xff] }
 0x431   : > { %3944 = vmatpush.bf16.msra.mxu3 %v5489_v52 }
 0x435   : > { %3945 = vmatpush.bf16.msra.mxu3 %v5488_v53 }
 0x436   : > { %3539 = vrot.lane.b32.xlu0 %v7527_v37, %s5570_s20 }
 0x437   : > { %3647 = vrot.lane.b32.xlu1 %v7505_v16, %s5572_s26  ;;  %v5485_v16 = vld [vmem:[%s7921_s1 + $0x90] sm:$0xff] }
 0x438   : > { %3595 = vrot.lane.b32.xlu2 %v7536_v5, %s5571_s21  ;;  %v5495_v5 = vld [vmem:[%s7921_s1 + $0xe0] sm:$0xff] }
 0x439   : > { %3946 = vmatpush.bf16.msra.mxu3 %v5487_v50  ;;  %v5501_v50 = vld [vmem:[%s7921_s1 + $0x110] sm:$0xff] }
 0x43d   : > { %3947 = vmatpush.bf16.msra.mxu3 %v5486_v25 }
 0x43e   : > { %3597 = vrot.lane.b32.xlu0 %v7552_v43, %s5571_s21 }
 0x43f   : > { %3541 = vrot.lane.b32.xlu1 %v3387_v31, %s5570_s20 }
 0x440   : > { %3653 = vrot.lane.b32.xlu2 %v7550_v23, %s5572_s26  ;;  %v3458_v13 = vpop.permute.xlu2 %3457 }
 0x441   : > { %3948 = vmatpush.bf16.msra.mxu3 %v5485_v16 }
 0x445   : > { %3970 = vmatpush.bf16.msrb.mxu3 %v5500_v20 }
 0x446   : > { %3543 = vrot.lane.b32.xlu0 %v3388_v15, %s5570_s20 }
 0x447   : > { %3651 = vrot.lane.b32.xlu1 %v7542_v17, %s5572_s26 }
 0x448   : > { %3599 = vrot.lane.b32.xlu2 %v7558_v57, %s5571_s21  ;;  %v3404_v11 = vpop.permute.xlu2 %3403 }
 0x449   : > { %3971 = vmatpush.bf16.msrb.mxu3 %v5499_v1 }
 0x44d   : > { %3972 = vmatpush.bf16.msrb.mxu3 %v5498_v62 }
 0x44e   : > { %3601 = vrot.lane.b32.xlu0 %v7568_v35, %s5571_s21 }
 0x44f   : > { %3545 = vrot.lane.b32.xlu1 %v3389_v46, %s5570_s20 }
 0x450   : > { %3657 = vrot.lane.b32.xlu2 %v7566_v21, %s5572_s26 }
 0x451   : > { %3973 = vmatpush.bf16.msrb.mxu3 %v5497_v19 }
 0x455   : > { %3974 = vmatpush.bf16.msrb.mxu3 %v5496_v58 }
 0x456   : > { %3547 = vrot.lane.b32.xlu0 %v3390_v30, %s5570_s20 }
 0x457   : > { %3655 = vrot.lane.b32.xlu1 %v7560_v8, %s5572_s26 }
 0x458   : > { %3603 = vrot.lane.b32.xlu2 %v3446_v10, %s5571_s21 }
 0x459   : > { %3975 = vmatpush.bf16.msrb.mxu3 %v5495_v5  ;;  %v5478_v5 = vld [vmem:[#allocation3 + $0x28] sm:$0xf0] }
 0x45a   : > { %v3462_v42 = vpop.permute.xlu2 %3461 }
 0x45d   : > { %3976 = vmatpush.bf16.msrb.mxu3 %v5494_v61 }
 0x45e   : > { %v3402_v63 = vpop.permute.xlu0 %3401  ;;  %3605 = vrot.lane.b32.xlu0 %v3582_v22, %s5571_s21 }
 0x45f   : > { %3549 = vrot.lane.b32.xlu1 %v7589_v33, %s5570_s20  ;;  %v3346_v28 = vpop.permute.xlu1 %3345 }
 0x460   : > { %3368 = vst.msk [vmem:[#allocation3 + $0xc] sm:$0xf] %vm634_vm3, %v3346_v28  ;;  %3661 = vrot.lane.b32.xlu2 %v3638_v59, %s5572_s26 }
 0x461   : > { %3424 = vst.msk [vmem:[#allocation3 + $0xc] sm:$0xf] %vm859_vm4, %v3402_v63  ;;  %3977 = vmatpush.bf16.msrb.mxu3 %v5493_v48 }
 0x462   : > { %3480 = vst.msk [vmem:[#allocation3 + $0xc] sm:$0xf] %vm1084_vm5, %v3458_v13  ;;  %v3408_v2 = vpop.permute.xlu2 %3407 }
 0x466   : > { %v3348_v45 = vpop.permute.xlu0 %3347 }
 0x467   : > { %3659 = vrot.lane.b32.xlu1 %v7514_v9, %s5572_s26  ;;  %v3456_v14 = vpop.permute.xlu1 %3455  ;;  %3369 = vst.msk [vmem:[#allocation3 + $0x18] sm:$0xf] %vm634_vm3, %v3348_v45 }
 0x468   : > { %3425 = vst.msk [vmem:[#allocation3 + $0x18] sm:$0xf] %vm859_vm4, %v3404_v11 }
 0x469   : > { %3479 = vst.msk [vmem:[#allocation3] sm:$0xf] %vm1084_vm5, %v3456_v14  ;;  %v5474_v37 = vld [vmem:[#allocation3 + $0x8] sm:$0xf0] }
 0x46a   : > { %v3466_v27 = vpop.permute.xlu2 %3465 }
 0x470   : > { %v3406_v47 = vpop.permute.xlu0 %3405  ;;  %v5156_v6 = vld [vmem:[#allocation3] sm:$0xf] }
 0x471   : > { %v3350_v44 = vpop.permute.xlu1 %3349  ;;  %v5157_v9 = vor.u32 %v5474_v37, %v5156_v6  ;;  %v5164_v37 = vld [vmem:[#allocation3 + $0x8] sm:$0xf] }
 0x472   : > { %3370 = vst.msk [vmem:[#allocation3 + $0x24] sm:$0xf] %vm634_vm3, %v3350_v44  ;;  %v3412_v39 = vpop.permute.xlu2 %3411 }
 0x473   : > { %3426 = vst.msk [vmem:[#allocation3 + $0x24] sm:$0xf] %vm859_vm4, %v3406_v47  ;;  %3949 = vmatmul.bf16.vlgmr.msra.gmra.mxu3 %v5157_v9  ;;  %v5475_v9 = vld [vmem:[#allocation3 + $0x10] sm:$0xf0] }
 0x474   : > { %3482 = vst.msk [vmem:[#allocation3 + $0x24] sm:$0xf] %vm1084_vm5, %v3462_v42  ;;  %4005 = vmatpush.bf16.msra.mxu3 %v5502_v3  ;;  %v5165_v58 = vor.u32 %v5475_v9, %v5164_v37 }
 0x478   : > { %v3352_v32 = vpop.permute.xlu0 %3351  ;;  %4006 = vmatpush.bf16.msra.mxu3 %v5501_v50 }
 0x479   : > { %v3460_v29 = vpop.permute.xlu1 %3459  ;;  %3371 = vst.msk [vmem:[#allocation3 + $0x30] sm:$0xf] %vm634_vm3, %v3352_v32 }
 0x47a   : > { %3427 = vst.msk [vmem:[#allocation3 + $0x30] sm:$0xf] %vm859_vm4, %v3408_v2  ;;  %v3470_v41 = vpop.permute.xlu2 %3469 }
 0x47b   : > { %3481 = vst.msk [vmem:[#allocation3 + $0x18] sm:$0xf] %vm1084_vm5, %v3460_v29  ;;  %v5477_v43 = vld [vmem:[#allocation3 + $0x20] sm:$0xf0]  ;;  %v5176_v29 = vld [vmem:[#allocation3 + $0x20] sm:$0xf] }
 0x480   : > { %v3410_v17 = vpop.permute.xlu0 %3409 }
 0x481   : > { %v3354_v40 = vpop.permute.xlu1 %3353 }
 0x482   : > { %3372 = vst.msk [vmem:[#allocation3 + $0x3c] sm:$0xf] %vm634_vm3, %v3354_v40  ;;  %v5168_v23 = vld [vmem:[#allocation3 + $0x18] sm:$0xf]  ;;  %v3592_v34 = vpop.permute.xlu2 %3591 }
 0x483   : > { %3428 = vst.msk [vmem:[#allocation3 + $0x3c] sm:$0xf] %vm859_vm4, %v3410_v17  ;;  %v5169_v38 = vor.u32 %v5477_v43, %v5168_v23  ;;  %v5177_v17 = vor.u32 %v5478_v5, %v5176_v29  ;;  %v5188_v23 = vld [vmem:[#allocation3 + $0x38] sm:$0xf]  ;;  %v5481_v43 = vld [vmem:[#allocation3 + $0x40] sm:$0xf0] }
 0x484   : > { %3484 = vst.msk [vmem:[#allocation3 + $0x3c] sm:$0xf] %vm1084_vm5, %v3466_v27 }
 0x485   : > { %3954 = vmatmul.bf16.gmra.mxu3 %v5169_v38  ;;  %v5189_v38 = vor.u32 %v5481_v43, %v5188_v23 }
 0x488   : > { %v3356_v57 = vpop.permute.xlu0 %3355 }
 0x489   : > { %v3464_v8 = vpop.permute.xlu1 %3463  ;;  %3373 = vst.msk [vmem:[#allocation3 + $0x48] sm:$0xf] %vm634_vm3, %v3356_v57 }
 0x48a   : > { %3429 = vst.msk [vmem:[#allocation3 + $0x48] sm:$0xf] %vm859_vm4, %v3412_v39  ;;  %v3650_v15 = vpop.permute.xlu2 %3649 }
 0x48b   : > { %3483 = vst.msk [vmem:[#allocation3 + $0x30] sm:$0xf] %vm1084_vm5, %v3464_v8  ;;  %v5480_v35 = vld [vmem:[#allocation3 + $0x38] sm:$0xf0]  ;;  %v5200_v8 = vld [vmem:[#allocation3 + $0x50] sm:$0xf] }
 0x490   : > { %v3414_v54 = vpop.permute.xlu0 %3413 }
 0x491   : > { %v3358_v4 = vpop.permute.xlu1 %3357 }
 0x492   : > { %3374 = vst.msk [vmem:[#allocation3 + $0x54] sm:$0xf] %vm634_vm3, %v3358_v4  ;;  %v5180_v21 = vld [vmem:[#allocation3 + $0x30] sm:$0xf]  ;;  %v3596_v46 = vpop.permute.xlu2 %3595 }
 0x493   : > { %3430 = vst.msk [vmem:[#allocation3 + $0x54] sm:$0xf] %vm859_vm4, %v3414_v54  ;;  %v5181_v31 = vor.u32 %v5480_v35, %v5180_v21  ;;  %v5542_v21 = vld [vmem:[%s7922_s2 + $0x1] ss:$0 sm:$0xff] }
 0x494   : > { %3486 = vst.msk [vmem:[#allocation3 + $0x54] sm:$0xf] %vm1084_vm5, %v3470_v41 }
 0x495   : > { %3959 = vmatmul.bf16.gmra.mxu3 %v5181_v31 }
 0x498   : > { %v3536_v18 = vpop.permute.xlu0 %3535 }
 0x499   : > { %v3468_v51 = vpop.permute.xlu1 %3467  ;;  %3559 = vst.msk [vmem:[#allocation3 + $0x4] sm:$0xf] %vm634_vm3, %v3536_v18 }
 0x49a   : > { %3615 = vst.msk [vmem:[#allocation3 + $0x4] sm:$0xf] %vm859_vm4, %v3592_v34  ;;  %v3654_v7 = vpop.permute.xlu2 %3653  ;;  %v5484_v34 = vld [vmem:[#allocation3 + $0x58] sm:$0xf0] }
 0x49b   : > { %3485 = vst.msk [vmem:[#allocation3 + $0x48] sm:$0xf] %vm1084_vm5, %v3468_v51  ;;  %v5483_v26 = vld [vmem:[#allocation3 + $0x50] sm:$0xf0]  ;;  %v5201_v48 = vor.u32 %v5484_v34, %v5200_v8 }
 0x4a0   : > { %v3594_v56 = vpop.permute.xlu0 %3593 }
 0x4a1   : > { %v3538_v30 = vpop.permute.xlu1 %3537 }
 0x4a2   : > { %3560 = vst.msk [vmem:[#allocation3 + $0x10] sm:$0xf] %vm634_vm3, %v3538_v30  ;;  %v5192_v33 = vld [vmem:[#allocation3 + $0x48] sm:$0xf]  ;;  %v3600_v53 = vpop.permute.xlu2 %3599 }
 0x4a3   : > { %3616 = vst.msk [vmem:[#allocation3 + $0x10] sm:$0xf] %vm859_vm4, %v3594_v56  ;;  %v5193_v0 = vor.u32 %v5483_v26, %v5192_v33 }
 0x4a4   : > { %3672 = vst.msk [vmem:[#allocation3 + $0x10] sm:$0xf] %vm1084_vm5, %v3650_v15 }
 0x4a5   : > { %3964 = vmatmul.bf16.gmra.mxu3 %v5193_v0 }
 0x4a8   : > { %v3540_v10 = vpop.permute.xlu0 %3539 }
 0x4a9   : > { %v3648_v12 = vpop.permute.xlu1 %3647  ;;  %3561 = vst.msk [vmem:[#allocation3 + $0x1c] sm:$0xf] %vm634_vm3, %v3540_v10 }
 0x4aa   : > { %3617 = vst.msk [vmem:[#allocation3 + $0x1c] sm:$0xf] %vm859_vm4, %v3596_v46  ;;  %v3658_v11 = vpop.permute.xlu2 %3657 }
 0x4ab   : > { %3671 = vst.msk [vmem:[#allocation3 + $0x4] sm:$0xf] %vm1084_vm5, %v3648_v12  ;;  %v5158_v52 = vld [vmem:[#allocation3 + $0xc] sm:$0xf0] }
 0x4b0   : > { %v3598_v60 = vpop.permute.xlu0 %3597 }
 0x4b1   : > { %v3542_v49 = vpop.permute.xlu1 %3541 }
 0x4b2   : > { %3562 = vst.msk [vmem:[#allocation3 + $0x28] sm:$0xf] %vm634_vm3, %v3542_v49  ;;  %v5473_v36 = vld [vmem:[#allocation3 + $0x4] sm:$0xf]  ;;  %v3604_v24 = vpop.permute.xlu2 %3603 }
 0x4b3   : > { %3618 = vst.msk [vmem:[#allocation3 + $0x28] sm:$0xf] %vm859_vm4, %v3598_v60  ;;  %v5161_v13 = vor.u32 %v5473_v36, %v5158_v52 }
 0x4b4   : > { %3674 = vst.msk [vmem:[#allocation3 + $0x28] sm:$0xf] %vm1084_vm5, %v3654_v7 }
 0x4b5   : > { %3978 = vmatmul.bf16.vlgmr.msrb.gmra.mxu3 %v5161_v13 }
 0x4b8   : > { %v3544_v25 = vpop.permute.xlu0 %3543 }
 0x4b9   : > { %v3652_v16 = vpop.permute.xlu1 %3651  ;;  %3563 = vst.msk [vmem:[#allocation3 + $0x34] sm:$0xf] %vm634_vm3, %v3544_v25 }
 0x4ba   : > { %3619 = vst.msk [vmem:[#allocation3 + $0x34] sm:$0xf] %vm859_vm4, %v3600_v53  ;;  %v3662_v28 = vpop.permute.xlu2 %3661 }
 0x4bb   : > { %3673 = vst.msk [vmem:[#allocation3 + $0x1c] sm:$0xf] %vm1084_vm5, %v3652_v16  ;;  %v5170_v22 = vld [vmem:[#allocation3 + $0x24] sm:$0xf0] }
 0x4c0   : > { %v3602_v20 = vpop.permute.xlu0 %3601 }
 0x4c1   : > { %v3546_v55 = vpop.permute.xlu1 %3545 }
 0x4c2   : > { %3564 = vst.msk [vmem:[#allocation3 + $0x40] sm:$0xf] %vm634_vm3, %v3546_v55  ;;  %v5476_v42 = vld [vmem:[#allocation3 + $0x1c] sm:$0xf] }
 0x4c3   : > { %3620 = vst.msk [vmem:[#allocation3 + $0x40] sm:$0xf] %vm859_vm4, %v3602_v20  ;;  %v5173_v1 = vor.u32 %v5476_v42, %v5170_v22 }
 0x4c4   : > { %3676 = vst.msk [vmem:[#allocation3 + $0x40] sm:$0xf] %vm1084_vm5, %v3658_v11 }
 0x4c5   : > { %3983 = vmatmul.bf16.gmra.mxu3 %v5173_v1 }
 0x4c8   : > { %v3548_v59 = vpop.permute.xlu0 %3547 }
 0x4c9   : > { %v3656_v63 = vpop.permute.xlu1 %3655  ;;  %3565 = vst.msk [vmem:[#allocation3 + $0x4c] sm:$0xf] %vm634_vm3, %v3548_v59 }
 0x4ca   : > { %3621 = vst.msk [vmem:[#allocation3 + $0x4c] sm:$0xf] %vm859_vm4, %v3604_v24 }
 0x4cb   : > { %3675 = vst.msk [vmem:[#allocation3 + $0x34] sm:$0xf] %vm1084_vm5, %v3656_v63  ;;  %v5182_v14 = vld [vmem:[#allocation3 + $0x3c] sm:$0xf0] }
 0x4d0   : > { %v3606_v62 = vpop.permute.xlu0 %3605 }
 0x4d1   : > { %v3550_v2 = vpop.permute.xlu1 %3549 }
 0x4d2   : > { %3566 = vst.msk [vmem:[#allocation3 + $0x58] sm:$0xf] %vm634_vm3, %v3550_v2  ;;  %v5479_v45 = vld [vmem:[#allocation3 + $0x34] sm:$0xf] }
 0x4d3   : > { %3622 = vst.msk [vmem:[#allocation3 + $0x58] sm:$0xf] %vm859_vm4, %v3606_v62  ;;  %v5185_v19 = vor.u32 %v5479_v45, %v5182_v14 }
 0x4d4   : > { %3678 = vst.msk [vmem:[#allocation3 + $0x58] sm:$0xf] %vm1084_vm5, %v3662_v28 }
 0x4d5   : > { %3988 = vmatmul.bf16.gmra.mxu3 %v5185_v19 }
 0x4d9   : > { %v3660_v27 = vpop.permute.xlu1 %3659 }
 0x4da   : > { %3677 = vst.msk [vmem:[#allocation3 + $0x4c] sm:$0xf] %vm1084_vm5, %v3660_v27 }
 0x4db   : > { %v5194_v47 = vld [vmem:[#allocation3 + $0x54] sm:$0xf0] }
 0x4e1   : > { %v5482_v44 = vld [vmem:[#allocation3 + $0x4c] sm:$0xf] }
 0x4e2   : > { %v5197_v6 = vor.u32 %v5482_v44, %v5194_v47 }
 0x4e5   : > { %3993 = vmatmul.bf16.gmra.mxu3 %v5197_v6 }
 0x4f5   : > { %5274 = vmatmul.msk.bf16.vlgmr.msra.gmra.mxu3 %vm224_vm0, %v5165_v58  ;;  %v5574_v58 = vmov 64.0  }
 0x4f6   : > { %v3950_v39 = vpop.f32.mrf.mxu3  ;;  %5552 = vrcp.f32 %v5574_v58 }
 0x4f7   : > { %v3951_v35 = vadd.f32 %v5542_v21, %v3950_v39 }
 0x4fc   : > { %v5553_v5 = vpop.eup %5552 }
 0x4fd   : > { %v4050_v23 = vmul.f32 64.0, %v5553_v5  ;;  %vm4054_vm11 = vweird.f32 %v5553_v5 }
 0x4fe   : > { %v3952_v32 = vpop.f32.mrf.mxu3 }
 0x4ff   : > { %v3953_v53 = vadd.f32 %v5542_v21, %v3952_v32 }
 0x505   : > { %5275 = vmatmul.msk.bf16.gmra.mxu3 %vm224_vm0, %v5177_v17 }
 0x508   : > { %v3955_v40 = vpop.f32.mrf.mxu3 }
 0x509   : > { %v3956_v18 = vadd.f32 %v5542_v21, %v3955_v40 }
 0x510   : > { %v3957_v41 = vpop.f32.mrf.mxu3 }
 0x511   : > { %v3958_v59 = vadd.f32 %v5542_v21, %v3957_v41 }
 0x515   : > { %5276 = vmatmul.msk.bf16.gmra.mxu3 %vm224_vm0, %v5189_v38 }
 0x518   : > { %v3960_v61 = vpop.f32.mrf.mxu3 }
 0x519   : > { %v3961_v30 = vadd.f32 %v5542_v21, %v3960_v61 }
 0x520   : > { %v3962_v57 = vpop.f32.mrf.mxu3 }
 0x521   : > { %v3963_v0 = vadd.f32 %v5542_v21, %v3962_v57  ;;  %v4051_v57 = vsub.f32 1.0, %v4050_v23 }
 0x525   : > { %5277 = vmatmul.msk.bf16.gmra.mxu3 %vm224_vm0, %v5201_v48  ;;  %v4052_v48 = vmul.f32 %v5553_v5, %v4051_v57 }
 0x528   : > { %v3965_v54 = vpop.f32.mrf.mxu3 }
 0x529   : > { %v3966_v7 = vadd.f32 %v5542_v21, %v3965_v54 }
 0x530   : > { %v3967_v4 = vpop.f32.mrf.mxu3 }
 0x531   : > { %v3968_v40 = vadd.f32 %v5542_v21, %v3967_v4 }
 0x538   : > { %v3979_v31 = vpop.f32.mrf.mxu3 }
 0x539   : > { %v3980_v15 = vadd.f32 %v3979_v31, %v3951_v35  ;;  %v4053_v31 = vadd.f32 %v5553_v5, %v4052_v48 }
 0x540   : > { %v3981_v3 = vpop.f32.mrf.mxu3 }
 0x541   : > { %v3982_v13 = vadd.f32 %v3981_v3, %v3953_v53 }
 0x548   : > { %v3984_v51 = vpop.f32.mrf.mxu3 }
 0x549   : > { %v3985_v46 = vadd.f32 %v3984_v51, %v3956_v18  ;;  %v4055_v18 = vsel %vm4054_vm11, %v5553_v5, %v4053_v31 }
 0x550   : > { %v3986_v56 = vpop.f32.mrf.mxu3 }
 0x551   : > { %v3987_v63 = vadd.f32 %v3986_v56, %v3958_v59 }
 0x558   : > { %v3989_v33 = vpop.f32.mrf.mxu3 }
 0x559   : > { %v3990_v26 = vadd.f32 %v3989_v33, %v3961_v30 }
 0x560   : > { %v3991_v10 = vpop.f32.mrf.mxu3 }
 0x561   : > { %v3992_v12 = vadd.f32 %v3991_v10, %v3963_v0 }
 0x568   : > { %v3994_v60 = vpop.f32.mrf.mxu3 }
 0x569   : > { %v3995_v49 = vadd.f32 %v3994_v60, %v3966_v7 }
 0x570   : > { %v3996_v36 = vpop.f32.mrf.mxu3 }
 0x571   : > { %v3997_v41 = vadd.f32 %v3996_v36, %v3968_v40 }
 0x578   : > { %v4008_v52 = vpop.f32.mrf.mxu3 }
 0x579   : > { %v4009_v50 = vadd.f32 %v4008_v52, %v3980_v15 }
 0x57b   : > { %v4028_v11 = vsel %vm224_vm0, %v4009_v50, 0.0 }
 0x580   : > { %v4010_v25 = vpop.f32.mrf.mxu3 }
 0x581   : > { %v4011_v16 = vadd.f32 %v4010_v25, %v3982_v13 }
 0x583   : > { %v4029_v20 = vsel %vm224_vm0, %v4011_v16, 0.0 }
 0x584   : > { %v4030_v55 = vadd.f32 %v4029_v20, %v4028_v11 }
 0x588   : > { %v4013_v42 = vpop.f32.mrf.mxu3 }
 0x589   : > { %v4014_v22 = vadd.f32 %v4013_v42, %v3985_v46 }
 0x58b   : > { %v4031_v1 = vsel %vm224_vm0, %v4014_v22, 0.0 }
 0x58c   : > { %v4032_v24 = vadd.f32 %v4031_v1, %v4030_v55 }
 0x590   : > { %v4015_v28 = vpop.f32.mrf.mxu3 }
 0x591   : > { %v4016_v2 = vadd.f32 %v4015_v28, %v3987_v63 }
 0x593   : > { %v4033_v62 = vsel %vm224_vm0, %v4016_v2, 0.0 }
 0x594   : > { %v4034_v45 = vadd.f32 %v4033_v62, %v4032_v24 }
 0x598   : > { %v4018_v14 = vpop.f32.mrf.mxu3 }
 0x599   : > { %v4019_v19 = vadd.f32 %v4018_v14, %v3990_v26 }
 0x59b   : > { %v4035_v27 = vsel %vm224_vm0, %v4019_v19, 0.0 }
 0x59c   : > { %v4036_v47 = vadd.f32 %v4035_v27, %v4034_v45 }
 0x5a0   : > { %v4020_v44 = vpop.f32.mrf.mxu3 }
 0x5a1   : > { %v4021_v6 = vadd.f32 %v4020_v44, %v3992_v12 }
 0x5a3   : > { %v4037_v37 = vsel %vm224_vm0, %v4021_v6, 0.0 }
 0x5a4   : > { %v4038_v9 = vadd.f32 %v4037_v37, %v4036_v47 }
 0x5a8   : > { %v4023_v39 = vpop.f32.mrf.mxu3 }
 0x5a9   : > { %v4024_v32 = vadd.f32 %v4023_v39, %v3995_v49 }
 0x5ab   : > { %v4039_v29 = vsel %vm224_vm0, %v4024_v32, 0.0 }
 0x5ac   : > { %v4040_v17 = vadd.f32 %v4039_v29, %v4038_v9 }
 0x5b0   : > { %v4025_v43 = vpop.f32.mrf.mxu3 }
 0x5b1   : > { %v4026_v38 = vadd.f32 %v4025_v43, %v3997_v41 }
 0x5b3   : > { %v4041_v61 = vsel %vm224_vm0, %v4026_v38, 0.0 }
 0x5b4   : > { %v4042_v8 = vadd.f32 %v4041_v61, %v4040_v17  ;;  %v5543_v17 = vld [vmem:[%s7923_s3 + $0x1] ss:$0 sm:$0xff] }
 0x5b5   : > { %v5544_v61 = vld [vmem:[%s7924_s4 + $0x1] ss:$0 sm:$0xff] }
 0x5b6   : > { %v4043_v34 = vrot.slane %v4042_v8, 4 }
 0x5b8   : > { %v4044_v54 = vadd.f32 %v4043_v34, %v4042_v8 }
 0x5ba   : > { %v4045_v35 = vrot.slane %v4044_v54, 2 }
 0x5bc   : > { %v4046_v15 = vadd.f32 %v4045_v35, %v4044_v54 }
 0x5be   : > { %v4047_v3 = vrot.slane %v4046_v15, 1 }
 0x5c0   : > { %v4048_v51 = vadd.f32 %v4047_v3, %v4046_v15 }
 0x5c2   : > { %v4056_v46 = vmul.f32 %v4055_v18, %v4048_v51 }
 0x5c4   : > { %v4057_v4 = vsub.f32 %v4009_v50, %v4056_v46  ;;  %v4058_v21 = vsub.f32 %v4011_v16, %v4056_v46  ;;  %v4059_v56 = vsub.f32 %v4014_v22, %v4056_v46  ;;  %v4060_v30 = vsub.f32 %v4016_v2, %v4056_v46 }
 0x5c5   : > { %v4061_v33 = vsub.f32 %v4019_v19, %v4056_v46  ;;  %v4062_v26 = vsub.f32 %v4021_v6, %v4056_v46  ;;  %v4063_v0 = vsub.f32 %v4024_v32, %v4056_v46  ;;  %v4064_v10 = vsub.f32 %v4026_v38, %v4056_v46 }
 0x5c6   : > { %v4065_v12 = vmul.f32 %v4057_v4, %v4057_v4  ;;  %v4066_v7 = vmul.f32 %v4058_v21, %v4058_v21  ;;  %v4067_v60 = vmul.f32 %v4059_v56, %v4059_v56  ;;  %v4068_v49 = vmul.f32 %v4060_v30, %v4060_v30 }
 0x5c7   : > { %v4069_v13 = vmul.f32 %v4061_v33, %v4061_v33  ;;  %v4070_v16 = vmul.f32 %v4062_v26, %v4062_v26  ;;  %v4071_v55 = vmul.f32 %v4063_v0, %v4063_v0  ;;  %v4072_v1 = vmul.f32 %v4064_v10, %v4064_v10 }
 0x5c8   : > { %v4073_v36 = vsel %vm224_vm0, %v4065_v12, 0.0  ;;  %v4074_v52 = vsel %vm224_vm0, %v4066_v7, 0.0  ;;  %v4076_v25 = vsel %vm224_vm0, %v4067_v60, 0.0  ;;  %v4078_v11 = vsel %vm224_vm0, %v4068_v49, 0.0 }
 0x5c9   : > { %v4075_v53 = vadd.f32 %v4074_v52, %v4073_v36  ;;  %v4080_v42 = vsel %vm224_vm0, %v4069_v13, 0.0  ;;  %v4082_v24 = vsel %vm224_vm0, %v4070_v16, 0.0  ;;  %v4084_v63 = vsel %vm224_vm0, %v4071_v55, 0.0  ;;  %v5523_v36 = vld [vmem:[%s7921_s1 + $0x1a8] sm:$0xff] }
 0x5ca   : > { %v4086_v2 = vsel %vm224_vm0, %v4072_v1, 0.0  ;;  %4676 = vmatpush.bf16.msrb.mxu2 %v5523_v36 }
 0x5cb   : > { %v4077_v50 = vadd.f32 %v4076_v25, %v4075_v53 }
 0x5cd   : > { %v4079_v20 = vadd.f32 %v4078_v11, %v4077_v50 }
 0x5cf   : > { %v4081_v22 = vadd.f32 %v4080_v42, %v4079_v20 }
 0x5d1   : > { %v4083_v59 = vadd.f32 %v4082_v24, %v4081_v22 }
 0x5d3   : > { %v4085_v28 = vadd.f32 %v4084_v63, %v4083_v59 }
 0x5d5   : > { %v4087_v62 = vadd.f32 %v4086_v2, %v4085_v28 }
 0x5d7   : > { %v4088_v45 = vrot.slane %v4087_v62, 4 }
 0x5d9   : > { %v4089_v14 = vadd.f32 %v4088_v45, %v4087_v62 }
 0x5db   : > { %v4090_v19 = vrot.slane %v4089_v14, 2 }
 0x5dd   : > { %v4091_v27 = vadd.f32 %v4090_v19, %v4089_v14 }
 0x5df   : > { %v4092_v47 = vrot.slane %v4091_v27, 1 }
 0x5e1   : > { %v4093_v44 = vadd.f32 %v4092_v47, %v4091_v27 }
 0x5e3   : > { %v4094_v6 = vmul.f32 %v4093_v44, %v4055_v18 }
 0x5e5   : > { %v4095_v37 = vadd.f32 1e-05, %v4094_v6 }
 0x5e7   : > { %5554 = vrsqrt.f32 %v4095_v37  ;;  %vm4102_vm13 = vweird.f32 %v4095_v37 }
 0x5ed   : > { %v5555_v9 = vpop.eup %5554 }
 0x5ee   : > { %v4097_v58 = vmul.f32 %v5555_v9, %v4095_v37  ;;  %vm4103_vm12 = vweird.f32 %v5555_v9 }
 0x5ef   : > { %vm4104_vm14 = vmor %vm4102_vm13, %vm4103_vm12 }
 0x5f0   : > { %v4098_v39 = vmul.f32 %v5555_v9, %v4097_v58 }
 0x5f2   : > { %v4099_v32 = vmul.f32 0.5, %v4098_v39 }
 0x5f4   : > { %v4100_v29 = vsub.f32 1.5, %v4099_v32 }
 0x5f6   : > { %v4101_v5 = vmul.f32 %v5555_v9, %v4100_v29 }
 0x5f8   : > { %v4105_v40 = vsel %vm4104_vm14, %v5555_v9, %v4101_v5 }
 0x5f9   : > { %v4106_v41 = vmul.f32 %v4105_v40, %v4057_v4  ;;  %v4107_v23 = vmul.f32 %v4105_v40, %v4058_v21  ;;  %v4108_v43 = vmul.f32 %v4105_v40, %v4059_v56  ;;  %v4109_v38 = vmul.f32 %v4105_v40, %v4060_v30 }
 0x5fa   : > { %v4110_v57 = vmul.f32 %v4105_v40, %v4061_v33  ;;  %v4111_v8 = vmul.f32 %v4105_v40, %v4062_v26  ;;  %v4112_v34 = vmul.f32 %v4105_v40, %v4063_v0  ;;  %v4113_v48 = vmul.f32 %v4105_v40, %v4064_v10 }
 0x5fb   : > { %v4119_v54 = vmul.f32 %v5543_v17, %v4106_v41  ;;  %v4120_v35 = vmul.f32 %v5543_v17, %v4107_v23  ;;  %v4121_v31 = vmul.f32 %v5543_v17, %v4108_v43  ;;  %v4122_v15 = vmul.f32 %v5543_v17, %v4109_v38 }
 0x5fc   : > { %v4123_v3 = vmul.f32 %v5543_v17, %v4110_v57  ;;  %v4124_v18 = vmul.f32 %v5543_v17, %v4111_v8  ;;  %v4125_v51 = vmul.f32 %v5543_v17, %v4112_v34  ;;  %v4126_v46 = vmul.f32 %v5543_v17, %v4113_v48  ;;  %v4238_v57 = vld [vmem:[#allocation2 + $0x1] sm:$0xf] }
 0x5fd   : > { %v4132_v4 = vadd.f32 %v5544_v61, %v4119_v54  ;;  %v4133_v21 = vadd.f32 %v5544_v61, %v4120_v35  ;;  %v4134_v56 = vadd.f32 %v5544_v61, %v4121_v31  ;;  %v4135_v30 = vadd.f32 %v5544_v61, %v4122_v15 }
 0x5fe   : > { %v4136_v12 = vadd.f32 %v5544_v61, %v4123_v3  ;;  %v4137_v7 = vadd.f32 %v5544_v61, %v4124_v18  ;;  %v4138_v60 = vadd.f32 %v5544_v61, %v4125_v51  ;;  %v4139_v0 = vadd.f32 %v5544_v61, %v4126_v46  ;;  %v4269_v3 = vld [vmem:[#allocation2 + $0x2] sm:$0xf] }
 0x5ff   : > { %v4140_v49 = vmax.f32 %v4132_v4, 0.0  ;;  %v4141_v33 = vmax.f32 %v4133_v21, 0.0  ;;  %v4142_v26 = vmax.f32 %v4134_v56, 0.0  ;;  %v4143_v10 = vmax.f32 %v4135_v30, 0.0 }
 0x600   : > { %v4144_v52 = vmax.f32 %v4136_v12, 0.0  ;;  %v4145_v53 = vmax.f32 %v4137_v7, 0.0  ;;  %v4146_v13 = vmax.f32 %v4138_v60, 0.0  ;;  %v4147_v25 = vmax.f32 %v4139_v0, 0.0 }
 0x601   : > { %4148 = vst.msk [vmem:[#allocation4] sm:$0xff] %vm224_vm0, %v4140_v49 }
 0x602   : > { %4149 = vst.msk [vmem:[#allocation4 + $0x8] sm:$0xff] %vm224_vm0, %v4141_v33 }
 0x603   : > { %4150 = vst.msk [vmem:[#allocation4 + $0x10] sm:$0xff] %vm224_vm0, %v4142_v26 }
 0x604   : > { %4151 = vst.msk [vmem:[#allocation4 + $0x18] sm:$0xff] %vm224_vm0, %v4143_v10 }
 0x605   : > { %4152 = vst.msk [vmem:[#allocation4 + $0x20] sm:$0xff] %vm224_vm0, %v4144_v52 }
 0x606   : > { %4153 = vst.msk [vmem:[#allocation4 + $0x28] sm:$0xff] %vm224_vm0, %v4145_v53 }
 0x607   : > { %4154 = vst.msk [vmem:[#allocation4 + $0x30] sm:$0xff] %vm224_vm0, %v4146_v13 }
 0x608   : > { %4155 = vst.msk [vmem:[#allocation4 + $0x38] sm:$0xff] %vm224_vm0, %v4147_v25  ;;  %v5522_v25 = vld [vmem:[%s7921_s1 + $0x1a0] sm:$0xff] }
 0x609   : > { %v4156_v50 = vld [vmem:[#allocation4] ss:$2 sm:$0xff]  ;;  %v4160_v16 = vld [vmem:[#allocation4 + $0x1] ss:$2 sm:$0xff]  ;;  %4677 = vmatpush.bf16.msrb.mxu2 %v5522_v25 }
 0x60a   : > { %v4164_v11 = vadd.f32 %v4160_v16, %v4156_v50 }
 0x60b   : > { %v4157_v20 = vld [vmem:[#allocation4 + $0x10] ss:$2 sm:$0xff]  ;;  %v4161_v55 = vld [vmem:[#allocation4 + $0x11] ss:$2 sm:$0xff] }
 0x60c   : > { %v4165_v42 = vadd.f32 %v4161_v55, %v4157_v20  ;;  %v4172_v22 = vrot.slane %v4164_v11, 4  ;;  %4180 = vst.msk [vmem:[#allocation5] sm:$0xf] %vm409_vm2, %v4164_v11 }
 0x60d   : > { %v4158_v1 = vld [vmem:[#allocation4 + $0x20] ss:$2 sm:$0xff]  ;;  %v4162_v24 = vld [vmem:[#allocation4 + $0x21] ss:$2 sm:$0xff] }
 0x60e   : > { %v4166_v59 = vadd.f32 %v4162_v24, %v4158_v1  ;;  %v4173_v63 = vrot.slane %v4165_v42, 4  ;;  %4181 = vst.msk [vmem:[#allocation5 + $0x8] sm:$0xf] %vm409_vm2, %v4172_v22 }
 0x60f   : > { %v4159_v28 = vld [vmem:[#allocation4 + $0x30] ss:$2 sm:$0xff]  ;;  %v4163_v2 = vld [vmem:[#allocation4 + $0x31] ss:$2 sm:$0xff]  ;;  %4182 = vst.msk [vmem:[#allocation5 + $0x10] sm:$0xf] %vm409_vm2, %v4165_v42 }
 0x610   : > { %v4167_v62 = vadd.f32 %v4163_v2, %v4159_v28  ;;  %v4174_v45 = vrot.slane %v4166_v59, 4  ;;  %4183 = vst.msk [vmem:[#allocation5 + $0x18] sm:$0xf] %vm409_vm2, %v4173_v63 }
 0x611   : > { %4184 = vst.msk [vmem:[#allocation5 + $0x20] sm:$0xf] %vm409_vm2, %v4166_v59 }
 0x612   : > { %v4175_v14 = vrot.slane %v4167_v62, 4  ;;  %4185 = vst.msk [vmem:[#allocation5 + $0x28] sm:$0xf] %vm409_vm2, %v4174_v45 }
 0x613   : > { %4186 = vst.msk [vmem:[#allocation5 + $0x30] sm:$0xf] %vm409_vm2, %v4167_v62  ;;  %v4188_v19 = vld [vmem:[#allocation5] sm:$0xf] }
 0x614   : > { %4187 = vst.msk [vmem:[#allocation5 + $0x38] sm:$0xf] %vm409_vm2, %v4175_v14 }
 0x615   : > { %v4192_v27 = vld [vmem:[#allocation5 + $0x8] sm:$0xf] }
 0x616   : > { %v4196_v47 = vadd.f32 %v4192_v27, %v4188_v19  ;;  %v4189_v44 = vld [vmem:[#allocation5 + $0x10] sm:$0xf]  ;;  %v4388_v19 = vld [vmem:[#allocation2 + $0x78] sm:$0xf] }
 0x617   : > { %v4193_v6 = vld [vmem:[#allocation5 + $0x18] sm:$0xf] }
 0x618   : > { %v4197_v37 = vadd.f32 %v4193_v6, %v4189_v44  ;;  %v4200_v9 = vmul.f32 0.25, %v4196_v47  ;;  %v4190_v58 = vld [vmem:[#allocation5 + $0x20] sm:$0xf] }
 0x619   : > { %v4194_v39 = vld [vmem:[#allocation5 + $0x28] sm:$0xf] }
 0x61a   : > { %v4198_v32 = vadd.f32 %v4194_v39, %v4190_v58  ;;  %v4201_v29 = vmul.f32 0.25, %v4197_v37  ;;  %4211 = vst.msk [vmem:[#allocation2 + $0x19] sm:$0xf] %vm409_vm2, %v4200_v9  ;;  %v4191_v5 = vld [vmem:[#allocation5 + $0x30] sm:$0xf] }
 0x61b   : > { %v4195_v17 = vld [vmem:[#allocation5 + $0x38] sm:$0xf]  ;;  %v4419_v39 = vld [vmem:[#allocation2 + $0x79] sm:$0xf] }
 0x61c   : > { %v4199_v40 = vadd.f32 %v4195_v17, %v4191_v5  ;;  %v4202_v41 = vmul.f32 0.25, %v4198_v32  ;;  %4212 = vst.msk [vmem:[#allocation2 + $0x31] sm:$0xf] %vm409_vm2, %v4201_v29  ;;  %v5513_v32 = vld [vmem:[%s7921_s1 + $0x158] sm:$0xff] }
 0x61d   : > { %4642 = vmatpush.bf16.msrb.mxu3 %v5513_v32 }
 0x61e   : > { %v4203_v23 = vmul.f32 0.25, %v4199_v40  ;;  %4213 = vst.msk [vmem:[#allocation2 + $0x49] sm:$0xf] %vm409_vm2, %v4202_v41 }
 0x620   : > { %4214 = vst.msk [vmem:[#allocation2 + $0x61] sm:$0xf] %vm409_vm2, %v4203_v23 }
 0x621   : > { %v4216_v43 = vld [vmem:[#allocation2 + $0x18] sm:$0xf] }
 0x622   : > { %4225 = vst [vmem:[#allocation1 + $0x1] ss:$2 sm:$0xff] %v4216_v43  ;;  %v4239_v34 = vld [vmem:[#allocation2 + $0x19] sm:$0xf] }
 0x623   : > { %v4217_v38 = vld [vmem:[#allocation2 + $0x30] sm:$0xf]  ;;  %v4270_v46 = vld [vmem:[#allocation2 + $0x1a] sm:$0xf] }
 0x624   : > { %4227 = vst [vmem:[#allocation1 + $0x10] ss:$2 sm:$0xff] %v4217_v38  ;;  %v4240_v54 = vld [vmem:[#allocation2 + $0x31] sm:$0xf]  ;;  %v4300_v7 = vld [vmem:[#allocation2 + $0x18] sm:$0xf] }
 0x625   : > { %v4218_v61 = vld [vmem:[#allocation2 + $0x48] sm:$0xf]  ;;  %v4271_v21 = vld [vmem:[#allocation2 + $0x32] sm:$0xf]  ;;  %v4331_v52 = vld [vmem:[#allocation2 + $0x19] sm:$0xf] }
 0x626   : > { %4229 = vst [vmem:[#allocation1 + $0x11] ss:$2 sm:$0xff] %v4218_v61  ;;  %v4241_v31 = vld [vmem:[#allocation2 + $0x49] sm:$0xf]  ;;  %v4301_v49 = vld [vmem:[#allocation2 + $0x30] sm:$0xf] }
 0x627   : > { %v4272_v30 = vld [vmem:[#allocation2 + $0x4a] sm:$0xf]  ;;  %v4303_v10 = vld [vmem:[#allocation2 + $0x60] sm:$0xf]  ;;  %v4332_v13 = vld [vmem:[#allocation2 + $0x31] sm:$0xf] }
 0x628   : > { %v4302_v26 = vld [vmem:[#allocation2 + $0x48] sm:$0xf]  ;;  %v4334_v20 = vld [vmem:[#allocation2 + $0x61] sm:$0xf]  ;;  %v4354_v42 = vld [vmem:[#allocation2 + $0x1a] sm:$0xf] }
 0x629   : > { %v4230_v8 = vld.sshfl [vmem:[#allocation1] sm:$0xff pattern:$0x75316420]  ;;  %v4333_v16 = vld [vmem:[#allocation2 + $0x49] sm:$0xf] }
 0x62a   : > { %4246 = vst [vmem:[#allocation1] ss:$2 sm:$0xff] %v4238_v57  ;;  %v4234_v35 = vpack.c.bf16 %v4230_v8, %v4230_v8  ;;  %v4355_v22 = vld [vmem:[#allocation2 + $0x32] sm:$0xf]  ;;  %v4356_v59 = vld [vmem:[#allocation2 + $0x4a] sm:$0xf] }
 0x62b   : > { %4248 = vst [vmem:[#allocation1 + $0x1] ss:$2 sm:$0xff] %v4239_v34  ;;  %v4357_v63 = vld [vmem:[#allocation2 + $0x62] sm:$0xf]  ;;  %v4385_v62 = vld [vmem:[#allocation2 + $0x30] sm:$0xf] }
 0x62c   : > { %4236 = vst.msk [vmem:[#allocation3] sm:$0xf] %vm409_vm2, %v4234_v35  ;;  %v4386_v14 = vld [vmem:[#allocation2 + $0x48] sm:$0xf]  ;;  %v4387_v47 = vld [vmem:[#allocation2 + $0x60] sm:$0xf] }
 0x62d   : > { %v4231_v48 = vld.sshfl [vmem:[#allocation1 + $0x10] sm:$0xff pattern:$0x75316420]  ;;  %v4416_v37 = vld [vmem:[#allocation2 + $0x31] sm:$0xf] }
 0x62e   : > { %4250 = vst [vmem:[#allocation1 + $0x10] ss:$2 sm:$0xff] %v4240_v54  ;;  %v4235_v15 = vpack.c.bf16 %v4231_v48, %v4231_v48  ;;  %v4417_v58 = vld [vmem:[#allocation2 + $0x49] sm:$0xf]  ;;  %v4418_v5 = vld [vmem:[#allocation2 + $0x61] sm:$0xf] }
 0x62f   : > { %4252 = vst [vmem:[#allocation1 + $0x11] ss:$2 sm:$0xff] %v4241_v31  ;;  %v4447_v41 = vld [vmem:[#allocation2 + $0x32] sm:$0xf]  ;;  %v4448_v43 = vld [vmem:[#allocation2 + $0x4a] sm:$0xf] }
 0x630   : > { %4237 = vst.msk [vmem:[#allocation3 + $0xc] sm:$0xf] %vm409_vm2, %v4235_v15  ;;  %v4450_v38 = vld [vmem:[#allocation2 + $0x7a] sm:$0xf]  ;;  %v4449_v57 = vld [vmem:[#allocation2 + $0x62] sm:$0xf] }
 0x631   : > { %v5512_v31 = vld [vmem:[%s7921_s1 + $0x150] sm:$0xff] }
 0x632   : > { %v4253_v18 = vld.sshfl [vmem:[#allocation1] sm:$0xff pattern:$0x75316420]  ;;  %4643 = vmatpush.bf16.msrb.mxu3 %v5512_v31 }
 0x633   : > { %v4257_v51 = vpack.c.bf16 %v4253_v18, %v4253_v18  ;;  %4277 = vst [vmem:[#allocation1] ss:$2 sm:$0xff] %v4269_v3 }
 0x634   : > { %4279 = vst [vmem:[#allocation1 + $0x1] ss:$2 sm:$0xff] %v4270_v46  ;;  %v5510_v46 = vld [vmem:[%s7921_s1 + $0x140] sm:$0xff] }
 0x635   : > { %4261 = vrot.lane.b32.xlu0 %v4257_v51, %s5570_s20  ;;  %v5511_v51 = vld [vmem:[%s7921_s1 + $0x148] sm:$0xff] }
 0x636   : > { %v4254_v4 = vld.sshfl [vmem:[#allocation1 + $0x10] sm:$0xff pattern:$0x75316420]  ;;  %4644 = vmatpush.bf16.msrb.mxu3 %v5511_v51 }
 0x637   : > { %v4258_v56 = vpack.c.bf16 %v4254_v4, %v4254_v4  ;;  %4281 = vst [vmem:[#allocation1 + $0x10] ss:$2 sm:$0xff] %v4271_v21  ;;  %v5509_v4 = vld [vmem:[%s7921_s1 + $0x138] sm:$0xff]  ;;  %v5508_v21 = vld [vmem:[%s7921_s1 + $0x130] sm:$0xff] }
 0x638   : > { %4283 = vst [vmem:[#allocation1 + $0x11] ss:$2 sm:$0xff] %v4272_v30  ;;  %v5506_v30 = vld [vmem:[%s7921_s1 + $0x120] sm:$0xff] }
 0x639   : > { %4263 = vrot.lane.b32.xlu1 %v4258_v56, %s5570_s20  ;;  %v5507_v56 = vld [vmem:[%s7921_s1 + $0x128] sm:$0xff] }
 0x63a   : > { %4645 = vmatpush.bf16.msrb.mxu3 %v5510_v46 }
 0x63b   : > { %v4284_v12 = vld.sshfl [vmem:[#allocation1] sm:$0xff pattern:$0x75316420] }
 0x63c   : > { %v4288_v60 = vpack.c.bf16 %v4284_v12, %v4284_v12  ;;  %4308 = vst [vmem:[#allocation1] ss:$2 sm:$0xff] %v4300_v7 }
 0x63d   : > { %4310 = vst [vmem:[#allocation1 + $0x1] ss:$2 sm:$0xff] %v4301_v49 }
 0x63e   : > { %4292 = vrot.lane.b32.xlu2 %v4288_v60, %s5571_s21  ;;  %4646 = vmatpush.bf16.msrb.mxu3 %v5509_v4  ;;  %v5521_v60 = vld [vmem:[%s7921_s1 + $0x198] sm:$0xff] }
 0x63f   : > { %v4285_v33 = vld.sshfl [vmem:[#allocation1 + $0x10] sm:$0xff pattern:$0x75316420] }
 0x640   : > { %v4289_v0 = vpack.c.bf16 %v4285_v33, %v4285_v33  ;;  %4312 = vst [vmem:[#allocation1 + $0x10] ss:$2 sm:$0xff] %v4302_v26  ;;  %v5520_v33 = vld [vmem:[%s7921_s1 + $0x190] sm:$0xff]  ;;  %v5519_v26 = vld [vmem:[%s7921_s1 + $0x188] sm:$0xff] }
 0x641   : > { %4314 = vst [vmem:[#allocation1 + $0x11] ss:$2 sm:$0xff] %v4303_v10 }
 0x642   : > { %4294 = vrot.lane.b32.xlu0 %v4289_v0, %s5571_s21  ;;  %4647 = vmatpush.bf16.msrb.mxu3 %v5508_v21  ;;  %v5518_v0 = vld [vmem:[%s7921_s1 + $0x180] sm:$0xff] }
 0x644   : > { %v4315_v36 = vld.sshfl [vmem:[#allocation1] sm:$0xff pattern:$0x75316420] }
 0x645   : > { %v4319_v53 = vpack.c.bf16 %v4315_v36, %v4315_v36  ;;  %4339 = vst [vmem:[#allocation1] ss:$2 sm:$0xff] %v4331_v52 }
 0x646   : > { %4341 = vst [vmem:[#allocation1 + $0x1] ss:$2 sm:$0xff] %v4332_v13  ;;  %4648 = vmatpush.bf16.msrb.mxu3 %v5507_v56  ;;  %v5516_v13 = vld [vmem:[%s7921_s1 + $0x170] sm:$0xff] }
 0x647   : > { %4323 = vrot.lane.b32.xlu1 %v4319_v53, %s5572_s26  ;;  %v5517_v53 = vld [vmem:[%s7921_s1 + $0x178] sm:$0xff] }
 0x648   : > { %v4316_v50 = vld.sshfl [vmem:[#allocation1 + $0x10] sm:$0xff pattern:$0x75316420] }
 0x649   : > { %v4320_v11 = vpack.c.bf16 %v4316_v50, %v4316_v50  ;;  %4343 = vst [vmem:[#allocation1 + $0x10] ss:$2 sm:$0xff] %v4333_v16  ;;  %v5515_v16 = vld [vmem:[%s7921_s1 + $0x168] sm:$0xff] }
 0x64a   : > { %4345 = vst [vmem:[#allocation1 + $0x11] ss:$2 sm:$0xff] %v4334_v20  ;;  %4649 = vmatpush.bf16.msrb.mxu3 %v5506_v30  ;;  %v5514_v20 = vld [vmem:[%s7921_s1 + $0x160] sm:$0xff] }
 0x64b   : > { %4325 = vrot.lane.b32.xlu2 %v4320_v11, %s5572_s26 }
 0x64d   : > { %v4346_v55 = vld.sshfl [vmem:[#allocation1] sm:$0xff pattern:$0x75316420] }
 0x64e   : > { %4362 = vst [vmem:[#allocation1] ss:$2 sm:$0xff] %v4354_v42  ;;  %v4350_v1 = vpack.c.bf16 %v4346_v55, %v4346_v55  ;;  %4656 = vmatpush.bf16.msra.mxu3 %v5521_v60 }
 0x64f   : > { %4364 = vst [vmem:[#allocation1 + $0x1] ss:$2 sm:$0xff] %v4355_v22 }
 0x650   : > { %4352 = vst.msk [vmem:[#allocation3 + $0x4] sm:$0xf] %vm409_vm2, %v4350_v1 }
 0x651   : > { %v4347_v24 = vld.sshfl [vmem:[#allocation1 + $0x10] sm:$0xff pattern:$0x75316420] }
 0x652   : > { %4366 = vst [vmem:[#allocation1 + $0x10] ss:$2 sm:$0xff] %v4356_v59  ;;  %v4351_v28 = vpack.c.bf16 %v4347_v24, %v4347_v24  ;;  %4657 = vmatpush.bf16.msra.mxu3 %v5520_v33 }
 0x653   : > { %4368 = vst [vmem:[#allocation1 + $0x11] ss:$2 sm:$0xff] %v4357_v63 }
 0x654   : > { %4353 = vst.msk [vmem:[#allocation3 + $0x10] sm:$0xf] %vm409_vm2, %v4351_v28 }
 0x656   : > { %v4369_v2 = vld.sshfl [vmem:[#allocation1] sm:$0xff pattern:$0x75316420]  ;;  %4658 = vmatpush.bf16.msra.mxu3 %v5519_v26 }
 0x657   : > { %v4373_v45 = vpack.c.bf16 %v4369_v2, %v4369_v2  ;;  %4393 = vst [vmem:[#allocation1] ss:$2 sm:$0xff] %v4385_v62 }
 0x658   : > { %4395 = vst [vmem:[#allocation1 + $0x1] ss:$2 sm:$0xff] %v4386_v14  ;;  %v5545_v14 = vld [vmem:[%s7922_s2 + $0x2] ss:$0 sm:$0xff] }
 0x659   : > { %4377 = vrot.lane.b32.xlu0 %v4373_v45, %s5570_s20 }
 0x65a   : > { %v4370_v27 = vld.sshfl [vmem:[#allocation1 + $0x10] sm:$0xff pattern:$0x75316420]  ;;  %4659 = vmatpush.bf16.msra.mxu3 %v5518_v0 }
 0x65b   : > { %v4374_v44 = vpack.c.bf16 %v4370_v27, %v4370_v27  ;;  %4397 = vst [vmem:[#allocation1 + $0x10] ss:$2 sm:$0xff] %v4387_v47  ;;  %v5575_v47 = vmov 16.0  }
 0x65c   : > { %4399 = vst [vmem:[#allocation1 + $0x11] ss:$2 sm:$0xff] %v4388_v19  ;;  %5556 = vrcp.f32 %v5575_v47 }
 0x65d   : > { %4379 = vrot.lane.b32.xlu1 %v4374_v44, %s5570_s20 }
 0x65e   : > { %4660 = vmatpush.bf16.msra.mxu3 %v5517_v53 }
 0x65f   : > { %v4400_v6 = vld.sshfl [vmem:[#allocation1] sm:$0xff pattern:$0x75316420] }
 0x660   : > { %v4404_v9 = vpack.c.bf16 %v4400_v6, %v4400_v6  ;;  %4424 = vst [vmem:[#allocation1] ss:$2 sm:$0xff] %v4416_v37 }
 0x661   : > { %4426 = vst [vmem:[#allocation1 + $0x1] ss:$2 sm:$0xff] %v4417_v58 }
 0x662   : > { %4408 = vrot.lane.b32.xlu2 %v4404_v9, %s5571_s21  ;;  %4661 = vmatpush.bf16.msra.mxu3 %v5516_v13  ;;  %v5557_v37 = vpop.eup %5556 }
 0x663   : > { %v4401_v29 = vld.sshfl [vmem:[#allocation1 + $0x10] sm:$0xff pattern:$0x75316420]  ;;  %vm4698_vm15 = vweird.f32 %v5557_v37 }
 0x664   : > { %v4405_v17 = vpack.c.bf16 %v4401_v29, %v4401_v29  ;;  %4428 = vst [vmem:[#allocation1 + $0x10] ss:$2 sm:$0xff] %v4418_v5  ;;  %v4694_v29 = vmul.f32 16.0, %v5557_v37 }
 0x665   : > { %4430 = vst [vmem:[#allocation1 + $0x11] ss:$2 sm:$0xff] %v4419_v39 }
 0x666   : > { %4410 = vrot.lane.b32.xlu0 %v4405_v17, %s5571_s21  ;;  %4662 = vmatpush.bf16.msra.mxu3 %v5515_v16 }
 0x668   : > { %v4431_v40 = vld.sshfl [vmem:[#allocation1] sm:$0xff pattern:$0x75316420] }
 0x669   : > { %v4435_v23 = vpack.c.bf16 %v4431_v40, %v4431_v40  ;;  %4455 = vst [vmem:[#allocation1] ss:$2 sm:$0xff] %v4447_v41 }
 0x66a   : > { %4457 = vst [vmem:[#allocation1 + $0x1] ss:$2 sm:$0xff] %v4448_v43  ;;  %4663 = vmatpush.bf16.msra.mxu3 %v5514_v20 }
 0x66b   : > { %4439 = vrot.lane.b32.xlu1 %v4435_v23, %s5572_s26  ;;  %v4695_v23 = vsub.f32 1.0, %v4694_v29 }
 0x66c   : > { %v4432_v61 = vld.sshfl [vmem:[#allocation1 + $0x10] sm:$0xff pattern:$0x75316420] }
 0x66d   : > { %v4436_v8 = vpack.c.bf16 %v4432_v61, %v4432_v61  ;;  %4459 = vst [vmem:[#allocation1 + $0x10] ss:$2 sm:$0xff] %v4449_v57  ;;  %v4696_v61 = vmul.f32 %v5557_v37, %v4695_v23 }
 0x66e   : > { %4461 = vst [vmem:[#allocation1 + $0x11] ss:$2 sm:$0xff] %v4450_v38 }
 0x66f   : > { %4441 = vrot.lane.b32.xlu2 %v4436_v8, %s5572_s26 }
 0x671   : > { %v4462_v34 = vld.sshfl [vmem:[#allocation1] sm:$0xff pattern:$0x75316420] }
 0x672   : > { %v4466_v48 = vpack.c.bf16 %v4462_v34, %v4462_v34  ;;  %v4697_v34 = vadd.f32 %v5557_v37, %v4696_v61 }
 0x674   : > { %4468 = vst.msk [vmem:[#allocation3 + $0x8] sm:$0xf] %vm409_vm2, %v4466_v48 }
 0x675   : > { %v4463_v54 = vld.sshfl [vmem:[#allocation1 + $0x10] sm:$0xff pattern:$0x75316420] }
 0x676   : > { %v4467_v35 = vpack.c.bf16 %v4463_v54, %v4463_v54 }
 0x678   : > { %4469 = vst.msk [vmem:[#allocation3 + $0x14] sm:$0xf] %vm409_vm2, %v4467_v35  ;;  %v4699_v35 = vsel %vm4698_vm15, %v5557_v37, %v4697_v34 }
 0x67b   : > { %v5327_v15 = vld [vmem:[#allocation3 + $0x8] sm:$0xf] }
 0x67f   : > { %v5505_v3 = vld [vmem:[#allocation3 + $0x10] sm:$0xf0] }
 0x680   : > { %v5328_v18 = vor.u32 %v5505_v3, %v5327_v15 }
 0x682   : > { %5401 = vmatmul.msk.bf16.vlgmr.msrb.gmra.mxu2 %vm224_vm0, %v5328_v18 }
 0x698   : > { %v4293_v7 = vpop.permute.xlu2 %4292 }
 0x6a5   : > { %v4326_v36 = vpop.permute.xlu2 %4325 }
 0x6a7   : > { %v4262_v12 = vpop.permute.xlu0 %4261 }
 0x6a8   : > { %4267 = vst.msk [vmem:[#allocation3] sm:$0xf] %vm634_vm3, %v4262_v12 }
 0x6a9   : > { %4298 = vst.msk [vmem:[#allocation3] sm:$0xf] %vm859_vm4, %v4293_v7 }
 0x6ab   : > { %v4264_v49 = vpop.permute.xlu1 %4263 }
 0x6ac   : > { %4268 = vst.msk [vmem:[#allocation3 + $0xc] sm:$0xf] %vm634_vm3, %v4264_v49 }
 0x6b4   : > { %v4295_v10 = vpop.permute.xlu0 %4294 }
 0x6b5   : > { %4299 = vst.msk [vmem:[#allocation3 + $0xc] sm:$0xf] %vm859_vm4, %v4295_v10 }
 0x6b6   : > { %4330 = vst.msk [vmem:[#allocation3 + $0xc] sm:$0xf] %vm1084_vm5, %v4326_v36 }
 0x6b9   : > { %v4324_v52 = vpop.permute.xlu1 %4323 }
 0x6ba   : > { %4329 = vst.msk [vmem:[#allocation3] sm:$0xf] %vm1084_vm5, %v4324_v52 }
 0x6bc   : > { %v4409_v42 = vpop.permute.xlu2 %4408 }
 0x6bd   : > { %v5504_v50 = vld [vmem:[#allocation3 + $0x8] sm:$0xf0] }
 0x6c1   : > { %v5319_v25 = vld [vmem:[#allocation3] sm:$0xf] }
 0x6c2   : > { %v5320_v11 = vor.u32 %v5504_v50, %v5319_v25  ;;  %v5546_v50 = vld [vmem:[%s7923_s3 + $0x2] ss:$0 sm:$0xff] }
 0x6c4   : > { %4650 = vmatmul.bf16.vlgmr.msrb.gmra.mxu3 %v5320_v11 }
 0x6c9   : > { %v4442_v24 = vpop.permute.xlu2 %4441 }
 0x6cb   : > { %v4378_v55 = vpop.permute.xlu0 %4377 }
 0x6cc   : > { %4383 = vst.msk [vmem:[#allocation3 + $0x4] sm:$0xf] %vm634_vm3, %v4378_v55  ;;  %v5547_v55 = vld [vmem:[%s7924_s4 + $0x2] ss:$0 sm:$0xff] }
 0x6cd   : > { %4414 = vst.msk [vmem:[#allocation3 + $0x4] sm:$0xf] %vm859_vm4, %v4409_v42 }
 0x6cf   : > { %v4380_v22 = vpop.permute.xlu1 %4379 }
 0x6d0   : > { %4384 = vst.msk [vmem:[#allocation3 + $0x10] sm:$0xf] %vm634_vm3, %v4380_v22 }
 0x6d8   : > { %v4411_v1 = vpop.permute.xlu0 %4410 }
 0x6d9   : > { %4415 = vst.msk [vmem:[#allocation3 + $0x10] sm:$0xf] %vm859_vm4, %v4411_v1 }
 0x6da   : > { %4446 = vst.msk [vmem:[#allocation3 + $0x10] sm:$0xf] %vm1084_vm5, %v4442_v24 }
 0x6dd   : > { %v4440_v59 = vpop.permute.xlu1 %4439 }
 0x6de   : > { %4445 = vst.msk [vmem:[#allocation3 + $0x4] sm:$0xf] %vm1084_vm5, %v4440_v59 }
 0x6e1   : > { %v5321_v28 = vld [vmem:[#allocation3 + $0xc] sm:$0xf0] }
 0x6e5   : > { %v5503_v63 = vld [vmem:[#allocation3 + $0x4] sm:$0xf] }
 0x6e6   : > { %v5324_v2 = vor.u32 %v5503_v63, %v5321_v28 }
 0x6e8   : > { %4664 = vmatmul.bf16.vlgmr.msra.gmra.mxu3 %v5324_v2 }
 0x705   : > { %v4679_v19 = vpop.f32.mrf.mxu2 }
 0x70d   : > { %v4681_v5 = vpop.f32.mrf.mxu2 }
 0x747   : > { %v4651_v62 = vpop.f32.mrf.mxu3 }
 0x748   : > { %v4652_v44 = vadd.f32 %v5545_v14, %v4651_v62 }
 0x74f   : > { %v4653_v45 = vpop.f32.mrf.mxu3 }
 0x750   : > { %v4654_v9 = vadd.f32 %v5545_v14, %v4653_v45 }
 0x76b   : > { %v4665_v27 = vpop.f32.mrf.mxu3 }
 0x76c   : > { %v4666_v6 = vadd.f32 %v4665_v27, %v4652_v44 }
 0x76e   : > { %v4680_v39 = vadd.f32 %v4679_v19, %v4666_v6 }
 0x770   : > { %v4684_v40 = vsel %vm224_vm0, %v4680_v39, 0.0 }
 0x773   : > { %v4667_v58 = vpop.f32.mrf.mxu3 }
 0x774   : > { %v4668_v32 = vadd.f32 %v4667_v58, %v4654_v9 }
 0x776   : > { %v4682_v17 = vadd.f32 %v4681_v5, %v4668_v32 }
 0x778   : > { %v4685_v41 = vsel %vm224_vm0, %v4682_v17, 0.0 }
 0x779   : > { %v4686_v43 = vadd.f32 %v4685_v41, %v4684_v40 }
 0x77b   : > { %v4687_v38 = vrot.slane %v4686_v43, 4 }
 0x77d   : > { %v4688_v57 = vadd.f32 %v4687_v38, %v4686_v43 }
 0x77f   : > { %v4689_v8 = vrot.slane %v4688_v57, 2 }
 0x781   : > { %v4690_v48 = vadd.f32 %v4689_v8, %v4688_v57 }
 0x783   : > { %v4691_v54 = vrot.slane %v4690_v48, 1 }
 0x785   : > { %v4692_v31 = vadd.f32 %v4691_v54, %v4690_v48 }
 0x787   : > { %v4700_v15 = vmul.f32 %v4699_v35, %v4692_v31 }
 0x789   : > { %v4701_v3 = vsub.f32 %v4680_v39, %v4700_v15  ;;  %v4702_v18 = vsub.f32 %v4682_v17, %v4700_v15 }
 0x78b   : > { %v4703_v51 = vmul.f32 %v4701_v3, %v4701_v3  ;;  %v4704_v46 = vmul.f32 %v4702_v18, %v4702_v18 }
 0x78d   : > { %v4705_v4 = vsel %vm224_vm0, %v4703_v51, 0.0  ;;  %v4706_v21 = vsel %vm224_vm0, %v4704_v46, 0.0 }
 0x78e   : > { %v4707_v56 = vadd.f32 %v4706_v21, %v4705_v4 }
 0x790   : > { %v4708_v30 = vrot.slane %v4707_v56, 4 }
 0x792   : > { %v4709_v12 = vadd.f32 %v4708_v30, %v4707_v56 }
 0x794   : > { %v4710_v7 = vrot.slane %v4709_v12, 2 }
 0x796   : > { %v4711_v60 = vadd.f32 %v4710_v7, %v4709_v12 }
 0x798   : > { %v4712_v49 = vrot.slane %v4711_v60, 1 }
 0x79a   : > { %v4713_v33 = vadd.f32 %v4712_v49, %v4711_v60 }
 0x79c   : > { %v4714_v26 = vmul.f32 %v4713_v33, %v4699_v35 }
 0x79e   : > { %v4715_v0 = vadd.f32 1e-05, %v4714_v26 }
 0x7a0   : > { %5558 = vrsqrt.f32 %v4715_v0  ;;  %vm4722_vm4 = vweird.f32 %v4715_v0 }
 0x7a6   : > { %v5559_v10 = vpop.eup %5558 }
 0x7a7   : > { %v4717_v36 = vmul.f32 %v5559_v10, %v4715_v0  ;;  %vm4723_vm3 = vweird.f32 %v5559_v10 }
 0x7a8   : > { %vm4724_vm5 = vmor %vm4722_vm4, %vm4723_vm3 }
 0x7a9   : > { %v4718_v52 = vmul.f32 %v5559_v10, %v4717_v36 }
 0x7ab   : > { %v4719_v53 = vmul.f32 0.5, %v4718_v52 }
 0x7ad   : > { %v4720_v13 = vsub.f32 1.5, %v4719_v53 }
 0x7af   : > { %v4721_v25 = vmul.f32 %v5559_v10, %v4720_v13 }
 0x7b1   : > { %v4725_v16 = vsel %vm4724_vm5, %v5559_v10, %v4721_v25 }
 0x7b2   : > { %v4726_v11 = vmul.f32 %v4725_v16, %v4701_v3  ;;  %v4727_v20 = vmul.f32 %v4725_v16, %v4702_v18 }
 0x7b4   : > { %v4733_v42 = vmul.f32 %v5546_v50, %v4726_v11  ;;  %v4734_v22 = vmul.f32 %v5546_v50, %v4727_v20 }
 0x7b6   : > { %v4740_v1 = vadd.f32 %v5547_v55, %v4733_v42  ;;  %v4741_v24 = vadd.f32 %v5547_v55, %v4734_v22 }
 0x7b8   : > { %v4742_v59 = vmax.f32 %v4740_v1, 0.0  ;;  %v4743_v63 = vmax.f32 %v4741_v24, 0.0 }
 0x7ba   : > { %4744 = vst.msk [vmem:[#allocation4] sm:$0xff] %vm224_vm0, %v4742_v59 }
 0x7bb   : > { %4745 = vst.msk [vmem:[#allocation4 + $0x8] sm:$0xff] %vm224_vm0, %v4743_v63 }
 0x7c2   : > { %v4746_v28 = vld [vmem:[#allocation4] ss:$2 sm:$0xff]  ;;  %v4747_v2 = vld [vmem:[#allocation4 + $0x1] ss:$2 sm:$0xff] }
 0x7c3   : > { %v4748_v62 = vadd.f32 %v4747_v2, %v4746_v28 }
 0x7c5   : > { %v4750_v45 = vrot.slane %v4748_v62, 2  ;;  %v4751_v14 = vrot.slane %v4748_v62, 4  ;;  %v4752_v19 = vrot.slane %v4748_v62, 6  ;;  %4756 = vst.msk [vmem:[#allocation5] sm:$0x3] %vm227_vm1, %v4748_v62 }
 0x7c7   : > { %4757 = vst.msk [vmem:[#allocation5 + $0x8] sm:$0x3] %vm227_vm1, %v4750_v45 }
 0x7c8   : > { %4758 = vst.msk [vmem:[#allocation5 + $0x10] sm:$0x3] %vm227_vm1, %v4751_v14 }
 0x7c9   : > { %4759 = vst.msk [vmem:[#allocation5 + $0x18] sm:$0x3] %vm227_vm1, %v4752_v19 }
 0x7cc   : > { %v4760_v27 = vld [vmem:[#allocation5] sm:$0x3] }
 0x7ce   : > { %v4762_v47 = vld [vmem:[#allocation5 + $0x8] sm:$0x3] }
 0x7cf   : > { %v4761_v44 = vld [vmem:[#allocation5 + $0x10] sm:$0x3]  ;;  %v4764_v6 = vadd.f32 %v4762_v47, %v4760_v27 }
 0x7d0   : > { %v4763_v37 = vld [vmem:[#allocation5 + $0x18] sm:$0x3] }
 0x7d1   : > { %v4765_v9 = vadd.f32 %v4763_v37, %v4761_v44  ;;  %v4766_v58 = vmul.f32 0.25, %v4764_v6 }
 0x7d3   : > { %v4767_v39 = vmul.f32 0.25, %v4765_v9  ;;  %4770 = vst [vmem:[#allocation1] ss:$4 sm:$0xff] %v4766_v58 }
 0x7d5   : > { %4772 = vst [vmem:[#allocation1 + $0x1] ss:$4 sm:$0xff] %v4767_v39 }
 0x7dc   : > { %v4773_v32 = vld.sshfl [vmem:[#allocation1] sm:$0xff pattern:$0x73625140] }
 0x7dd   : > { %4775 = vst.msk [vmem:[%s222_s8] sm:$0xf] %vm409_vm2, %v4773_v32 }
 0x7de PF: > { %s15_s18 = sadd.s32 1, %s5567_s18  }
 0x7df   : > { %p12_p4 = scmp.ge.s32.totalorder %s15_s18, 4  }
 0x7e1   :  { %14 = sbr.rel (!%p12_p4) target bundleno = 1 (0x1), region = 140 }

</bundles_post_ra>
